<compile_context>
chip_gen: v5e
topology: v5e:2x2
jax: 0.10.0
libtpu: 0.0.40
codegen_flags: <defaults>
</compile_context>

<pallas_src>
import functools

import jax
import jax.numpy as jnp
from jax.experimental import pallas as pl
from jax.experimental.pallas import tpu as pltpu


# ---------------------------------------------------------------------------
# Fused Pallas kernel: 4 stacked LSTM layers (+ folded BNs) + FC head
# ---------------------------------------------------------------------------
def _fused_lstm_kernel(
    x_ref,                                   # (T*Bp, F)  bf16, time-major, batch-padded
    wih0_ref, whh0_ref, b0_ref,              # lstm1 layer 0  (input BN folded in)
    wih1_ref, whh1_ref, b1_ref,              # lstm1 layer 1
    wih2_ref, whh2_ref, b2_ref,              # lstm2 layer 0  (mid BN folded in)
    wih3_ref, whh3_ref, b3_ref,              # lstm2 layer 1
    fc1w_ref, fc1b_ref, fc2w_ref, fc2b_ref,  # head (bn_final folded into fc1)
    out_ref,                                 # (Bp, out)
    *, seq_len, batch_pad, hidden,
):
    T, Bp, H = seq_len, batch_pad, hidden
    f32, bf16 = jnp.float32, jnp.bfloat16
    n_layers = 4

    # Hoisted reads: weights / biases stay live across the whole wave loop instead of
    # being re-loaded from VMEM every step.
    whh = [whh0_ref[...], whh1_ref[...], whh2_ref[...], whh3_ref[...]]
    wih = [None, wih1_ref[...], wih2_ref[...], wih3_ref[...]]
    bias = [None,
            jnp.broadcast_to(b1_ref[...], (Bp, 4 * H)),
            jnp.broadcast_to(b2_ref[...], (Bp, 4 * H)),
            jnp.broadcast_to(b3_ref[...], (Bp, 4 * H))]

    # Layer-0 input projection hoisted: one (T*Bp, F) @ (F, 4H) GEMM, bias folded in.
    xg0 = jnp.dot(x_ref[...], wih0_ref[...], preferred_element_type=f32) + b0_ref[...]

    def lstm_step(gates, c_prev):
        # Gate columns are pre-ordered [i, f, o, g]: one contiguous sigmoid + one tanh.
        sg = jax.nn.sigmoid(gates[:, : 3 * H])
        g = jnp.tanh(gates[:, 3 * H:])
        c_new = sg[:, H:2 * H] * c_prev + sg[:, :H] * g
        h_new = sg[:, 2 * H:3 * H] * jnp.tanh(c_new)
        return h_new, c_new

    h = [jnp.zeros((Bp, H), f32) for _ in range(n_layers)]
    c = [jnp.zeros((Bp, H), f32) for _ in range(n_layers)]
    feed = [None] * n_layers  # feed[k]: layer k-1's output feeding layer k's next step

    # Wavefront: at wave w, layer k executes its step t = w - k.  The (up to) 4
    # layer-steps of a wave are mutually independent, so their MXU/EUP latencies
    # overlap; the serial chain shrinks from 4*T dependent steps to T + 3 waves.
    # Layers are processed deepest-first so each consumes feed[] from the previous
    # wave before its producer (layer k-1, same wave) overwrites it.
    for w in range(T + n_layers - 1):
        for k in range(n_layers - 1, -1, -1):
            t = w - k
            if not (0 <= t < T):
                continue
            if k == 0:
                gates = xg0[t * Bp:(t + 1) * Bp]
            else:
                gates = jnp.dot(feed[k], wih[k], preferred_element_type=f32) + bias[k]
            gates = gates + jnp.dot(h[k].astype(bf16), whh[k],
                                    preferred_element_type=f32)
            h[k], c[k] = lstm_step(gates, c[k])
            if k + 1 < n_layers:
                feed[k + 1] = h[k].astype(bf16)

    # Head: (bn_final folded into fc1) -> fc1 -> ReLU -> fc2, all f32.
    y = jnp.dot(h[n_layers - 1], fc1w_ref[...], preferred_element_type=f32) + fc1b_ref[...]
    y = jnp.maximum(y, 0.0)
    out_ref[...] = jnp.dot(y, fc2w_ref[...], preferred_element_type=f32) + fc2b_ref[...]


# ---------------------------------------------------------------------------
# Parameter preparation (BN folding + gate reorder + bf16 cast) and wrapper
# ---------------------------------------------------------------------------
_BN_EPS = 1e-5


def _bn_scale_shift(p):
    s = p["gamma"] / jnp.sqrt(p["var"] + _BN_EPS)
    return s, p["beta"] - p["mean"] * s


def _reorder_ifog(a, hidden):
    # PyTorch gate order along 4H is [i, f, g, o]; reorder columns to [i, f, o, g]
    # so sigmoid covers one contiguous 3H block and tanh the trailing H.
    H = hidden
    return jnp.concatenate([a[..., : 2 * H], a[..., 3 * H: 4 * H], a[..., 2 * H: 3 * H]],
                           axis=-1)


def _layer_arrays(lp, hidden, fold=None):
    wih_t = lp["wih"].T.astype(jnp.float32)                      # (In, 4H)
    whh_t = lp["whh"].T.astype(jnp.float32)                      # (H, 4H)
    bias = (lp["bih"] + lp["bhh"])[None, :].astype(jnp.float32)  # (1, 4H)
    if fold is not None:
        # (x*s + sh) @ W + b  ==  x @ (diag(s) W) + (sh @ W + b)   (exact fold)
        s, sh = fold
        bias = bias + sh[None, :] @ wih_t
        wih_t = s[:, None] * wih_t
    wih_t = _reorder_ifog(wih_t, hidden).astype(jnp.bfloat16)
    whh_t = _reorder_ifog(whh_t, hidden).astype(jnp.bfloat16)
    bias = _reorder_ifog(bias, hidden)                           # keep bias in f32
    return wih_t, whh_t, bias


def forward_pallas(params, x):
    B, T, F = x.shape
    Bp = ((B + 7) // 8) * 8                     # pad batch to a full sublane tile

    assert len(params["lstm1"]) == 2 and len(params["lstm2"]) == 2
    H1 = params["lstm1"][0]["whh"].shape[1]
    H2 = params["lstm2"][0]["whh"].shape[1]
    assert H1 == H2, "fused kernel assumes hidden_size_lstm1 == hidden_size_lstm2"
    H = H1

    in_s, in_sh = _bn_scale_shift(params["input_bn"])
    mid_s, mid_sh = _bn_scale_shift(params["mid_bn"])
    fin_s, fin_sh = _bn_scale_shift(params["bn_final"])

    l10 = _layer_arrays(params["lstm1"][0], H, fold=(in_s, in_sh))
    l11 = _layer_arrays(params["lstm1"][1], H)
    l20 = _layer_arrays(params["lstm2"][0], H, fold=(mid_s, mid_sh))
    l21 = _layer_arrays(params["lstm2"][1], H)

    # Fold bn_final into fc1 (head stays f32).
    w1_t = params["fc1"]["w"].T.astype(jnp.float32)              # (H, H//2)
    b1 = params["fc1"]["b"][None, :] + fin_sh[None, :] @ w1_t
    w1_t = fin_s[:, None] * w1_t
    w2_t = params["fc2"]["w"].T.astype(jnp.float32)              # (H//2, out)
    b2 = params["fc2"]["b"][None, :].astype(jnp.float32)
    out_size = w2_t.shape[1]

    # Time-major, batch-padded, flattened to (T*Bp, F), bf16 for the MXU.
    x_tm = jnp.transpose(x, (1, 0, 2)).astype(jnp.float32)       # (T, B, F)
    x_tm = jnp.pad(x_tm, ((0, 0), (0, Bp - B), (0, 0)))
    x2d = x_tm.reshape(T * Bp, F).astype(jnp.bfloat16)

    args = (x2d, *l10, *l11, *l20, *l21, w1_t, b1, w2_t, b2)

    kernel = functools.partial(_fused_lstm_kernel, seq_len=T, batch_pad=Bp, hidden=H)
    out = pl.pallas_call(
        kernel,
        out_shape=jax.ShapeDtypeStruct((Bp, out_size), jnp.float32),
        in_specs=[pl.BlockSpec(memory_space=pltpu.MemorySpace.VMEM)] * len(args),
        out_specs=pl.BlockSpec(memory_space=pltpu.MemorySpace.VMEM),
    )(*args)
    return out[:B]


# ---------------------------------------------------------------------------
# Pure-JAX reference (explicit, un-folded BN, f32) for numerical validation
# ---------------------------------------------------------------------------
def _lstm_layer_ref(x_tbi, wih_t, whh_t, bias_row):
    T, B, _ = x_tbi.shape
    H = whh_t.shape[0]

    def step(carry, x_t):
        h, c = carry
        gates = x_t @ wih_t + h @ whh_t + bias_row
        i = jax.nn.sigmoid(gates[:, 0:H])
        f = jax.nn.sigmoid(gates[:, H:2 * H])
        g = jnp.tanh(gates[:, 2 * H:3 * H])
        o = jax.nn.sigmoid(gates[:, 3 * H:4 * H])
        c = f * c + i * g
        h = o * jnp.tanh(c)
        return (h, c), h

    init = (jnp.zeros((B, H), jnp.float32), jnp.zeros((B, H), jnp.float32))
    _, hs = jax.lax.scan(step, init, x_tbi)
    return hs


def forward_ref(params, x):
    B, T, F = x.shape

    def bn(p, a):
        s, sh = _bn_scale_shift(p)
        return a * s[None, :] + sh[None, :]

    xf = bn(params["input_bn"], x.reshape(B * T, F)).reshape(B, T, F)
    h = jnp.transpose(xf, (1, 0, 2))                              # (T, B, F)
    for lp in params["lstm1"]:
        h = _lstm_layer_ref(h, lp["wih"].T, lp["whh"].T, (lp["bih"] + lp["bhh"])[None, :])
    H1 = h.shape[-1]
    h = bn(params["mid_bn"], h.reshape(T * B, H1)).reshape(T, B, H1)
    for lp in params["lstm2"]:
        h = _lstm_layer_ref(h, lp["wih"].T, lp["whh"].T, (lp["bih"] + lp["bhh"])[None, :])
    last = bn(params["bn_final"], h[-1])                          # (B, H2)
    y = jnp.maximum(last @ params["fc1"]["w"].T + params["fc1"]["b"][None, :], 0.0)
    return y @ params["fc2"]["w"].T + params["fc2"]["b"][None, :]


# ---------------------------------------------------------------------------
# Deterministic parameter init (mimics the PyTorch module's shapes)
# ---------------------------------------------------------------------------
def init_params(key, input_size, h1=64, h2=64, num_layers=2, output_size=1):
    keys = iter(jax.random.split(key, 64))

    def nrm(shape, s=0.1):
        return (s * jax.random.normal(next(keys), shape)).astype(jnp.float32)

    def bn(c):
        return dict(gamma=1.0 + nrm((c,)), beta=nrm((c,)),
                    mean=nrm((c,)), var=1.0 + jnp.abs(nrm((c,))))

    def lstm(in_size, hidden, layers):
        ls = []
        for l in range(layers):
            i = in_size if l == 0 else hidden
            ls.append(dict(wih=nrm((4 * hidden, i)), whh=nrm((4 * hidden, hidden)),
                           bih=nrm((4 * hidden,)), bhh=nrm((4 * hidden,))))
        return ls

    return dict(
        input_bn=bn(input_size),
        lstm1=lstm(input_size, h1, num_layers),
        mid_bn=bn(h1),
        lstm2=lstm(h1, h2, num_layers),
        bn_final=bn(h2),
        fc1=dict(w=nrm((h2 // 2, h2)), b=nrm((h2 // 2,))),
        fc2=dict(w=nrm((output_size, h2 // 2)), b=nrm((output_size,))),
    )


# ---------------------------------------------------------------------------
if __name__ == "__main__":
    BATCH, SEQ, FEAT = 4, 8, 8
    key = jax.random.PRNGKey(0)
    k_param, k_x = jax.random.split(key)
    params = init_params(k_param, input_size=FEAT, h1=64, h2=64, num_layers=2, output_size=1)
    x = jax.random.normal(k_x, (BATCH, SEQ, FEAT), dtype=jnp.float32)

    out = jax.block_until_ready(forward_pallas(params, x))
    ref = jax.block_until_ready(forward_ref(params, x))

    assert out.shape == (BATCH, 1), out.shape
    # Tolerance loosened vs. the pure-f32 version to account for bf16 MXU operands
    # (f32 accumulation and f32 state retained).
    assert jnp.allclose(out, ref, rtol=2e-2, atol=2e-2), (out, ref)
    print("KERNEL_OK")
</pallas_src>

<mosaic_0001>
module attributes {stable_mosaic.version = 11 : i64} {
  func.func @_fused_lstm_kernel(%arg0: memref<64x8xbf16, #tpu.memory_space<vmem>>, %arg1: memref<8x256xbf16, #tpu.memory_space<vmem>>, %arg2: memref<64x256xbf16, #tpu.memory_space<vmem>>, %arg3: memref<1x256xf32, #tpu.memory_space<vmem>>, %arg4: memref<64x256xbf16, #tpu.memory_space<vmem>>, %arg5: memref<64x256xbf16, #tpu.memory_space<vmem>>, %arg6: memref<1x256xf32, #tpu.memory_space<vmem>>, %arg7: memref<64x256xbf16, #tpu.memory_space<vmem>>, %arg8: memref<64x256xbf16, #tpu.memory_space<vmem>>, %arg9: memref<1x256xf32, #tpu.memory_space<vmem>>, %arg10: memref<64x256xbf16, #tpu.memory_space<vmem>>, %arg11: memref<64x256xbf16, #tpu.memory_space<vmem>>, %arg12: memref<1x256xf32, #tpu.memory_space<vmem>>, %arg13: memref<64x32xf32, #tpu.memory_space<vmem>>, %arg14: memref<1x32xf32, #tpu.memory_space<vmem>>, %arg15: memref<32x1xf32, #tpu.memory_space<vmem>>, %arg16: memref<1x1xf32, #tpu.memory_space<vmem>>, %arg17: memref<8x1xf32, #tpu.memory_space<vmem>>) attributes {dimension_semantics = [], scalar_prefetch = 0 : i64, scratch_operands = 0 : i64, tpu.core_type = #tpu.core_type<tc>} {
    %c0 = arith.constant 0 : index
    %c0_0 = arith.constant 0 : index
    %0 = vector.load %arg2[%c0, %c0_0] : memref<64x256xbf16, #tpu.memory_space<vmem>>, vector<64x256xbf16>
    %c0_1 = arith.constant 0 : index
    %c0_2 = arith.constant 0 : index
    %1 = vector.load %arg5[%c0_1, %c0_2] : memref<64x256xbf16, #tpu.memory_space<vmem>>, vector<64x256xbf16>
    %c0_3 = arith.constant 0 : index
    %c0_4 = arith.constant 0 : index
    %2 = vector.load %arg8[%c0_3, %c0_4] : memref<64x256xbf16, #tpu.memory_space<vmem>>, vector<64x256xbf16>
    %c0_5 = arith.constant 0 : index
    %c0_6 = arith.constant 0 : index
    %3 = vector.load %arg11[%c0_5, %c0_6] : memref<64x256xbf16, #tpu.memory_space<vmem>>, vector<64x256xbf16>
    %c0_7 = arith.constant 0 : index
    %c0_8 = arith.constant 0 : index
    %4 = vector.load %arg4[%c0_7, %c0_8] : memref<64x256xbf16, #tpu.memory_space<vmem>>, vector<64x256xbf16>
    %c0_9 = arith.constant 0 : index
    %c0_10 = arith.constant 0 : index
    %5 = vector.load %arg7[%c0_9, %c0_10] : memref<64x256xbf16, #tpu.memory_space<vmem>>, vector<64x256xbf16>
    %c0_11 = arith.constant 0 : index
    %c0_12 = arith.constant 0 : index
    %6 = vector.load %arg10[%c0_11, %c0_12] : memref<64x256xbf16, #tpu.memory_space<vmem>>, vector<64x256xbf16>
    %c0_13 = arith.constant 0 : index
    %c0_14 = arith.constant 0 : index
    %7 = vector.load %arg6[%c0_13, %c0_14] : memref<1x256xf32, #tpu.memory_space<vmem>>, vector<1x256xf32>
    %8 = vector.shape_cast %7 : vector<1x256xf32> to vector<1x256xf32>
    %9 = vector.broadcast %8 : vector<1x256xf32> to vector<8x256xf32>
    %c0_15 = arith.constant 0 : index
    %c0_16 = arith.constant 0 : index
    %10 = vector.load %arg9[%c0_15, %c0_16] : memref<1x256xf32, #tpu.memory_space<vmem>>, vector<1x256xf32>
    %11 = vector.shape_cast %10 : vector<1x256xf32> to vector<1x256xf32>
    %12 = vector.broadcast %11 : vector<1x256xf32> to vector<8x256xf32>
    %c0_17 = arith.constant 0 : index
    %c0_18 = arith.constant 0 : index
    %13 = vector.load %arg12[%c0_17, %c0_18] : memref<1x256xf32, #tpu.memory_space<vmem>>, vector<1x256xf32>
    %14 = vector.shape_cast %13 : vector<1x256xf32> to vector<1x256xf32>
    %15 = vector.broadcast %14 : vector<1x256xf32> to vector<8x256xf32>
    %c0_19 = arith.constant 0 : index
    %c0_20 = arith.constant 0 : index
    %16 = vector.load %arg0[%c0_19, %c0_20] : memref<64x8xbf16, #tpu.memory_space<vmem>>, vector<64x8xbf16>
    %c0_21 = arith.constant 0 : index
    %c0_22 = arith.constant 0 : index
    %17 = vector.load %arg1[%c0_21, %c0_22] : memref<8x256xbf16, #tpu.memory_space<vmem>>, vector<8x256xbf16>
    %cst = arith.constant dense<0.000000e+00> : vector<64x256xf32>
    %18 = tpu.matmul %16, %17, %cst {dimension_numbers = #tpu.dot_dimension_numbers<[1], [0], [0], [1], [0, 0, 1, 1], [], []>} : vector<64x8xbf16>, vector<8x256xbf16>, vector<64x256xf32> -> vector<64x256xf32>
    %c0_23 = arith.constant 0 : index
    %c0_24 = arith.constant 0 : index
    %19 = vector.load %arg3[%c0_23, %c0_24] : memref<1x256xf32, #tpu.memory_space<vmem>>, vector<1x256xf32>
    %20 = vector.broadcast %19 : vector<1x256xf32> to vector<64x256xf32>
    %21 = arith.addf %18, %20 : vector<64x256xf32>
    %cst_25 = arith.constant 0.000000e+00 : f32
    %22 = vector.broadcast %cst_25 : f32 to vector<8x64xf32>
    %cst_26 = arith.constant 0.000000e+00 : f32
    %23 = vector.broadcast %cst_26 : f32 to vector<8x64xf32>
    %cst_27 = arith.constant 0.000000e+00 : f32
    %24 = vector.broadcast %cst_27 : f32 to vector<8x64xf32>
    %cst_28 = arith.constant 0.000000e+00 : f32
    %25 = vector.broadcast %cst_28 : f32 to vector<8x64xf32>
    %cst_29 = arith.constant 0.000000e+00 : f32
    %26 = vector.broadcast %cst_29 : f32 to vector<8x64xf32>
    %cst_30 = arith.constant 0.000000e+00 : f32
    %27 = vector.broadcast %cst_30 : f32 to vector<8x64xf32>
    %cst_31 = arith.constant 0.000000e+00 : f32
    %28 = vector.broadcast %cst_31 : f32 to vector<8x64xf32>
    %cst_32 = arith.constant 0.000000e+00 : f32
    %29 = vector.broadcast %cst_32 : f32 to vector<8x64xf32>
    %30 = vector.extract_strided_slice %21 {offsets = [0, 0], sizes = [8, 256], strides = [1, 1]} : vector<64x256xf32> to vector<8x256xf32>
    %31 = arith.truncf %22 : vector<8x64xf32> to vector<8x64xbf16>
    %cst_33 = arith.constant dense<0.000000e+00> : vector<8x256xf32>
    %32 = tpu.matmul %31, %0, %cst_33 {dimension_numbers = #tpu.dot_dimension_numbers<[1], [0], [0], [1], [0, 0, 1, 1], [], []>} : vector<8x64xbf16>, vector<64x256xbf16>, vector<8x256xf32> -> vector<8x256xf32>
    %33 = arith.addf %30, %32 : vector<8x256xf32>
    %34 = vector.extract_strided_slice %33 {offsets = [0, 0], sizes = [8, 192], strides = [1, 1]} : vector<8x256xf32> to vector<8x192xf32>
    %35 = arith.negf %34 : vector<8x192xf32>
    %36 = math.exp %35 : vector<8x192xf32>
    %cst_34 = arith.constant 1.000000e+00 : f32
    %37 = vector.broadcast %cst_34 : f32 to vector<8x192xf32>
    %38 = arith.addf %37, %36 : vector<8x192xf32>
    %39 = arith.divf %37, %38 : vector<8x192xf32>
    %40 = vector.extract_strided_slice %33 {offsets = [0, 192], sizes = [8, 64], strides = [1, 1]} : vector<8x256xf32> to vector<8x64xf32>
    %41 = math.tanh %40 : vector<8x64xf32>
    %42 = vector.extract_strided_slice %39 {offsets = [0, 64], sizes = [8, 64], strides = [1, 1]} : vector<8x192xf32> to vector<8x64xf32>
    %43 = arith.mulf %42, %26 : vector<8x64xf32>
    %44 = vector.extract_strided_slice %39 {offsets = [0, 0], sizes = [8, 64], strides = [1, 1]} : vector<8x192xf32> to vector<8x64xf32>
    %45 = arith.mulf %44, %41 : vector<8x64xf32>
    %46 = arith.addf %43, %45 : vector<8x64xf32>
    %47 = vector.extract_strided_slice %39 {offsets = [0, 128], sizes = [8, 64], strides = [1, 1]} : vector<8x192xf32> to vector<8x64xf32>
    %48 = math.tanh %46 : vector<8x64xf32>
    %49 = arith.mulf %47, %48 : vector<8x64xf32>
    %50 = arith.truncf %49 : vector<8x64xf32> to vector<8x64xbf16>
    %cst_35 = arith.constant dense<0.000000e+00> : vector<8x256xf32>
    %51 = tpu.matmul %50, %4, %cst_35 {dimension_numbers = #tpu.dot_dimension_numbers<[1], [0], [0], [1], [0, 0, 1, 1], [], []>} : vector<8x64xbf16>, vector<64x256xbf16>, vector<8x256xf32> -> vector<8x256xf32>
    %52 = arith.addf %51, %9 : vector<8x256xf32>
    %53 = arith.truncf %23 : vector<8x64xf32> to vector<8x64xbf16>
    %cst_36 = arith.constant dense<0.000000e+00> : vector<8x256xf32>
    %54 = tpu.matmul %53, %1, %cst_36 {dimension_numbers = #tpu.dot_dimension_numbers<[1], [0], [0], [1], [0, 0, 1, 1], [], []>} : vector<8x64xbf16>, vector<64x256xbf16>, vector<8x256xf32> -> vector<8x256xf32>
    %55 = arith.addf %52, %54 : vector<8x256xf32>
    %56 = vector.extract_strided_slice %55 {offsets = [0, 0], sizes = [8, 192], strides = [1, 1]} : vector<8x256xf32> to vector<8x192xf32>
    %57 = arith.negf %56 : vector<8x192xf32>
    %58 = math.exp %57 : vector<8x192xf32>
    %cst_37 = arith.constant 1.000000e+00 : f32
    %59 = vector.broadcast %cst_37 : f32 to vector<8x192xf32>
    %60 = arith.addf %59, %58 : vector<8x192xf32>
    %61 = arith.divf %59, %60 : vector<8x192xf32>
    %62 = vector.extract_strided_slice %55 {offsets = [0, 192], sizes = [8, 64], strides = [1, 1]} : vector<8x256xf32> to vector<8x64xf32>
    %63 = math.tanh %62 : vector<8x64xf32>
    %64 = vector.extract_strided_slice %61 {offsets = [0, 64], sizes = [8, 64], strides = [1, 1]} : vector<8x192xf32> to vector<8x64xf32>
    %65 = arith.mulf %64, %27 : vector<8x64xf32>
    %66 = vector.extract_strided_slice %61 {offsets = [0, 0], sizes = [8, 64], strides = [1, 1]} : vector<8x192xf32> to vector<8x64xf32>
    %67 = arith.mulf %66, %63 : vector<8x64xf32>
    %68 = arith.addf %65, %67 : vector<8x64xf32>
    %69 = vector.extract_strided_slice %61 {offsets = [0, 128], sizes = [8, 64], strides = [1, 1]} : vector<8x192xf32> to vector<8x64xf32>
    %70 = math.tanh %68 : vector<8x64xf32>
    %71 = arith.mulf %69, %70 : vector<8x64xf32>
    %72 = arith.truncf %71 : vector<8x64xf32> to vector<8x64xbf16>
    %73 = vector.extract_strided_slice %21 {offsets = [8, 0], sizes = [8, 256], strides = [1, 1]} : vector<64x256xf32> to vector<8x256xf32>
    %74 = arith.truncf %49 : vector<8x64xf32> to vector<8x64xbf16>
    %cst_38 = arith.constant dense<0.000000e+00> : vector<8x256xf32>
    %75 = tpu.matmul %74, %0, %cst_38 {dimension_numbers = #tpu.dot_dimension_numbers<[1], [0], [0], [1], [0, 0, 1, 1], [], []>} : vector<8x64xbf16>, vector<64x256xbf16>, vector<8x256xf32> -> vector<8x256xf32>
    %76 = arith.addf %73, %75 : vector<8x256xf32>
    %77 = vector.extract_strided_slice %76 {offsets = [0, 0], sizes = [8, 192], strides = [1, 1]} : vector<8x256xf32> to vector<8x192xf32>
    %78 = arith.negf %77 : vector<8x192xf32>
    %79 = math.exp %78 : vector<8x192xf32>
    %cst_39 = arith.constant 1.000000e+00 : f32
    %80 = vector.broadcast %cst_39 : f32 to vector<8x192xf32>
    %81 = arith.addf %80, %79 : vector<8x192xf32>
    %82 = arith.divf %80, %81 : vector<8x192xf32>
    %83 = vector.extract_strided_slice %76 {offsets = [0, 192], sizes = [8, 64], strides = [1, 1]} : vector<8x256xf32> to vector<8x64xf32>
    %84 = math.tanh %83 : vector<8x64xf32>
    %85 = vector.extract_strided_slice %82 {offsets = [0, 64], sizes = [8, 64], strides = [1, 1]} : vector<8x192xf32> to vector<8x64xf32>
    %86 = arith.mulf %85, %46 : vector<8x64xf32>
    %87 = vector.extract_strided_slice %82 {offsets = [0, 0], sizes = [8, 64], strides = [1, 1]} : vector<8x192xf32> to vector<8x64xf32>
    %88 = arith.mulf %87, %84 : vector<8x64xf32>
    %89 = arith.addf %86, %88 : vector<8x64xf32>
    %90 = vector.extract_strided_slice %82 {offsets = [0, 128], sizes = [8, 64], strides = [1, 1]} : vector<8x192xf32> to vector<8x64xf32>
    %91 = math.tanh %89 : vector<8x64xf32>
    %92 = arith.mulf %90, %91 : vector<8x64xf32>
    %93 = arith.truncf %92 : vector<8x64xf32> to vector<8x64xbf16>
    %cst_40 = arith.constant dense<0.000000e+00> : vector<8x256xf32>
    %94 = tpu.matmul %72, %5, %cst_40 {dimension_numbers = #tpu.dot_dimension_numbers<[1], [0], [0], [1], [0, 0, 1, 1], [], []>} : vector<8x64xbf16>, vector<64x256xbf16>, vector<8x256xf32> -> vector<8x256xf32>
    %95 = arith.addf %94, %12 : vector<8x256xf32>
    %96 = arith.truncf %24 : vector<8x64xf32> to vector<8x64xbf16>
    %cst_41 = arith.constant dense<0.000000e+00> : vector<8x256xf32>
    %97 = tpu.matmul %96, %2, %cst_41 {dimension_numbers = #tpu.dot_dimension_numbers<[1], [0], [0], [1], [0, 0, 1, 1], [], []>} : vector<8x64xbf16>, vector<64x256xbf16>, vector<8x256xf32> -> vector<8x256xf32>
    %98 = arith.addf %95, %97 : vector<8x256xf32>
    %99 = vector.extract_strided_slice %98 {offsets = [0, 0], sizes = [8, 192], strides = [1, 1]} : vector<8x256xf32> to vector<8x192xf32>
    %100 = arith.negf %99 : vector<8x192xf32>
    %101 = math.exp %100 : vector<8x192xf32>
    %cst_42 = arith.constant 1.000000e+00 : f32
    %102 = vector.broadcast %cst_42 : f32 to vector<8x192xf32>
    %103 = arith.addf %102, %101 : vector<8x192xf32>
    %104 = arith.divf %102, %103 : vector<8x192xf32>
    %105 = vector.extract_strided_slice %98 {offsets = [0, 192], sizes = [8, 64], strides = [1, 1]} : vector<8x256xf32> to vector<8x64xf32>
    %106 = math.tanh %105 : vector<8x64xf32>
    %107 = vector.extract_strided_slice %104 {offsets = [0, 64], sizes = [8, 64], strides = [1, 1]} : vector<8x192xf32> to vector<8x64xf32>
    %108 = arith.mulf %107, %28 : vector<8x64xf32>
    %109 = vector.extract_strided_slice %104 {offsets = [0, 0], sizes = [8, 64], strides = [1, 1]} : vector<8x192xf32> to vector<8x64xf32>
    %110 = arith.mulf %109, %106 : vector<8x64xf32>
    %111 = arith.addf %108, %110 : vector<8x64xf32>
    %112 = vector.extract_strided_slice %104 {offsets = [0, 128], sizes = [8, 64], strides = [1, 1]} : vector<8x192xf32> to vector<8x64xf32>
    %113 = math.tanh %111 : vector<8x64xf32>
    %114 = arith.mulf %112, %113 : vector<8x64xf32>
    %115 = arith.truncf %114 : vector<8x64xf32> to vector<8x64xbf16>
    %cst_43 = arith.constant dense<0.000000e+00> : vector<8x256xf32>
    %116 = tpu.matmul %93, %4, %cst_43 {dimension_numbers = #tpu.dot_dimension_numbers<[1], [0], [0], [1], [0, 0, 1, 1], [], []>} : vector<8x64xbf16>, vector<64x256xbf16>, vector<8x256xf32> -> vector<8x256xf32>
    %117 = arith.addf %116, %9 : vector<8x256xf32>
    %118 = arith.truncf %71 : vector<8x64xf32> to vector<8x64xbf16>
    %cst_44 = arith.constant dense<0.000000e+00> : vector<8x256xf32>
    %119 = tpu.matmul %118, %1, %cst_44 {dimension_numbers = #tpu.dot_dimension_numbers<[1], [0], [0], [1], [0, 0, 1, 1], [], []>} : vector<8x64xbf16>, vector<64x256xbf16>, vector<8x256xf32> -> vector<8x256xf32>
    %120 = arith.addf %117, %119 : vector<8x256xf32>
    %121 = vector.extract_strided_slice %120 {offsets = [0, 0], sizes = [8, 192], strides = [1, 1]} : vector<8x256xf32> to vector<8x192xf32>
    %122 = arith.negf %121 : vector<8x192xf32>
    %123 = math.exp %122 : vector<8x192xf32>
    %cst_45 = arith.constant 1.000000e+00 : f32
    %124 = vector.broadcast %cst_45 : f32 to vector<8x192xf32>
    %125 = arith.addf %124, %123 : vector<8x192xf32>
    %126 = arith.divf %124, %125 : vector<8x192xf32>
    %127 = vector.extract_strided_slice %120 {offsets = [0, 192], sizes = [8, 64], strides = [1, 1]} : vector<8x256xf32> to vector<8x64xf32>
    %128 = math.tanh %127 : vector<8x64xf32>
    %129 = vector.extract_strided_slice %126 {offsets = [0, 64], sizes = [8, 64], strides = [1, 1]} : vector<8x192xf32> to vector<8x64xf32>
    %130 = arith.mulf %129, %68 : vector<8x64xf32>
    %131 = vector.extract_strided_slice %126 {offsets = [0, 0], sizes = [8, 64], strides = [1, 1]} : vector<8x192xf32> to vector<8x64xf32>
    %132 = arith.mulf %131, %128 : vector<8x64xf32>
    %133 = arith.addf %130, %132 : vector<8x64xf32>
    %134 = vector.extract_strided_slice %126 {offsets = [0, 128], sizes = [8, 64], strides = [1, 1]} : vector<8x192xf32> to vector<8x64xf32>
    %135 = math.tanh %133 : vector<8x64xf32>
    %136 = arith.mulf %134, %135 : vector<8x64xf32>
    %137 = arith.truncf %136 : vector<8x64xf32> to vector<8x64xbf16>
    %138 = vector.extract_strided_slice %21 {offsets = [16, 0], sizes = [8, 256], strides = [1, 1]} : vector<64x256xf32> to vector<8x256xf32>
    %139 = arith.truncf %92 : vector<8x64xf32> to vector<8x64xbf16>
    %cst_46 = arith.constant dense<0.000000e+00> : vector<8x256xf32>
    %140 = tpu.matmul %139, %0, %cst_46 {dimension_numbers = #tpu.dot_dimension_numbers<[1], [0], [0], [1], [0, 0, 1, 1], [], []>} : vector<8x64xbf16>, vector<64x256xbf16>, vector<8x256xf32> -> vector<8x256xf32>
    %141 = arith.addf %138, %140 : vector<8x256xf32>
    %142 = vector.extract_strided_slice %141 {offsets = [0, 0], sizes = [8, 192], strides = [1, 1]} : vector<8x256xf32> to vector<8x192xf32>
    %143 = arith.negf %142 : vector<8x192xf32>
    %144 = math.exp %143 : vector<8x192xf32>
    %cst_47 = arith.constant 1.000000e+00 : f32
    %145 = vector.broadcast %cst_47 : f32 to vector<8x192xf32>
    %146 = arith.addf %145, %144 : vector<8x192xf32>
    %147 = arith.divf %145, %146 : vector<8x192xf32>
    %148 = vector.extract_strided_slice %141 {offsets = [0, 192], sizes = [8, 64], strides = [1, 1]} : vector<8x256xf32> to vector<8x64xf32>
    %149 = math.tanh %148 : vector<8x64xf32>
    %150 = vector.extract_strided_slice %147 {offsets = [0, 64], sizes = [8, 64], strides = [1, 1]} : vector<8x192xf32> to vector<8x64xf32>
    %151 = arith.mulf %150, %89 : vector<8x64xf32>
    %152 = vector.extract_strided_slice %147 {offsets = [0, 0], sizes = [8, 64], strides = [1, 1]} : vector<8x192xf32> to vector<8x64xf32>
    %153 = arith.mulf %152, %149 : vector<8x64xf32>
    %154 = arith.addf %151, %153 : vector<8x64xf32>
    %155 = vector.extract_strided_slice %147 {offsets = [0, 128], sizes = [8, 64], strides = [1, 1]} : vector<8x192xf32> to vector<8x64xf32>
    %156 = math.tanh %154 : vector<8x64xf32>
    %157 = arith.mulf %155, %156 : vector<8x64xf32>
    %158 = arith.truncf %157 : vector<8x64xf32> to vector<8x64xbf16>
    %cst_48 = arith.constant dense<0.000000e+00> : vector<8x256xf32>
    %159 = tpu.matmul %115, %6, %cst_48 {dimension_numbers = #tpu.dot_dimension_numbers<[1], [0], [0], [1], [0, 0, 1, 1], [], []>} : vector<8x64xbf16>, vector<64x256xbf16>, vector<8x256xf32> -> vector<8x256xf32>
    %160 = arith.addf %159, %15 : vector<8x256xf32>
    %161 = arith.truncf %25 : vector<8x64xf32> to vector<8x64xbf16>
    %cst_49 = arith.constant dense<0.000000e+00> : vector<8x256xf32>
    %162 = tpu.matmul %161, %3, %cst_49 {dimension_numbers = #tpu.dot_dimension_numbers<[1], [0], [0], [1], [0, 0, 1, 1], [], []>} : vector<8x64xbf16>, vector<64x256xbf16>, vector<8x256xf32> -> vector<8x256xf32>
    %163 = arith.addf %160, %162 : vector<8x256xf32>
    %164 = vector.extract_strided_slice %163 {offsets = [0, 0], sizes = [8, 192], strides = [1, 1]} : vector<8x256xf32> to vector<8x192xf32>
    %165 = arith.negf %164 : vector<8x192xf32>
    %166 = math.exp %165 : vector<8x192xf32>
    %cst_50 = arith.constant 1.000000e+00 : f32
    %167 = vector.broadcast %cst_50 : f32 to vector<8x192xf32>
    %168 = arith.addf %167, %166 : vector<8x192xf32>
    %169 = arith.divf %167, %168 : vector<8x192xf32>
    %170 = vector.extract_strided_slice %163 {offsets = [0, 192], sizes = [8, 64], strides = [1, 1]} : vector<8x256xf32> to vector<8x64xf32>
    %171 = math.tanh %170 : vector<8x64xf32>
    %172 = vector.extract_strided_slice %169 {offsets = [0, 64], sizes = [8, 64], strides = [1, 1]} : vector<8x192xf32> to vector<8x64xf32>
    %173 = arith.mulf %172, %29 : vector<8x64xf32>
    %174 = vector.extract_strided_slice %169 {offsets = [0, 0], sizes = [8, 64], strides = [1, 1]} : vector<8x192xf32> to vector<8x64xf32>
    %175 = arith.mulf %174, %171 : vector<8x64xf32>
    %176 = arith.addf %173, %175 : vector<8x64xf32>
    %177 = vector.extract_strided_slice %169 {offsets = [0, 128], sizes = [8, 64], strides = [1, 1]} : vector<8x192xf32> to vector<8x64xf32>
    %178 = math.tanh %176 : vector<8x64xf32>
    %179 = arith.mulf %177, %178 : vector<8x64xf32>
    %cst_51 = arith.constant dense<0.000000e+00> : vector<8x256xf32>
    %180 = tpu.matmul %137, %5, %cst_51 {dimension_numbers = #tpu.dot_dimension_numbers<[1], [0], [0], [1], [0, 0, 1, 1], [], []>} : vector<8x64xbf16>, vector<64x256xbf16>, vector<8x256xf32> -> vector<8x256xf32>
    %181 = arith.addf %180, %12 : vector<8x256xf32>
    %182 = arith.truncf %114 : vector<8x64xf32> to vector<8x64xbf16>
    %cst_52 = arith.constant dense<0.000000e+00> : vector<8x256xf32>
    %183 = tpu.matmul %182, %2, %cst_52 {dimension_numbers = #tpu.dot_dimension_numbers<[1], [0], [0], [1], [0, 0, 1, 1], [], []>} : vector<8x64xbf16>, vector<64x256xbf16>, vector<8x256xf32> -> vector<8x256xf32>
    %184 = arith.addf %181, %183 : vector<8x256xf32>
    %185 = vector.extract_strided_slice %184 {offsets = [0, 0], sizes = [8, 192], strides = [1, 1]} : vector<8x256xf32> to vector<8x192xf32>
    %186 = arith.negf %185 : vector<8x192xf32>
    %187 = math.exp %186 : vector<8x192xf32>
    %cst_53 = arith.constant 1.000000e+00 : f32
    %188 = vector.broadcast %cst_53 : f32 to vector<8x192xf32>
    %189 = arith.addf %188, %187 : vector<8x192xf32>
    %190 = arith.divf %188, %189 : vector<8x192xf32>
    %191 = vector.extract_strided_slice %184 {offsets = [0, 192], sizes = [8, 64], strides = [1, 1]} : vector<8x256xf32> to vector<8x64xf32>
    %192 = math.tanh %191 : vector<8x64xf32>
    %193 = vector.extract_strided_slice %190 {offsets = [0, 64], sizes = [8, 64], strides = [1, 1]} : vector<8x192xf32> to vector<8x64xf32>
    %194 = arith.mulf %193, %111 : vector<8x64xf32>
    %195 = vector.extract_strided_slice %190 {offsets = [0, 0], sizes = [8, 64], strides = [1, 1]} : vector<8x192xf32> to vector<8x64xf32>
    %196 = arith.mulf %195, %192 : vector<8x64xf32>
    %197 = arith.addf %194, %196 : vector<8x64xf32>
    %198 = vector.extract_strided_slice %190 {offsets = [0, 128], sizes = [8, 64], strides = [1, 1]} : vector<8x192xf32> to vector<8x64xf32>
    %199 = math.tanh %197 : vector<8x64xf32>
    %200 = arith.mulf %198, %199 : vector<8x64xf32>
    %201 = arith.truncf %200 : vector<8x64xf32> to vector<8x64xbf16>
    %cst_54 = arith.constant dense<0.000000e+00> : vector<8x256xf32>
    %202 = tpu.matmul %158, %4, %cst_54 {dimension_numbers = #tpu.dot_dimension_numbers<[1], [0], [0], [1], [0, 0, 1, 1], [], []>} : vector<8x64xbf16>, vector<64x256xbf16>, vector<8x256xf32> -> vector<8x256xf32>
    %203 = arith.addf %202, %9 : vector<8x256xf32>
    %204 = arith.truncf %136 : vector<8x64xf32> to vector<8x64xbf16>
    %cst_55 = arith.constant dense<0.000000e+00> : vector<8x256xf32>
    %205 = tpu.matmul %204, %1, %cst_55 {dimension_numbers = #tpu.dot_dimension_numbers<[1], [0], [0], [1], [0, 0, 1, 1], [], []>} : vector<8x64xbf16>, vector<64x256xbf16>, vector<8x256xf32> -> vector<8x256xf32>
    %206 = arith.addf %203, %205 : vector<8x256xf32>
    %207 = vector.extract_strided_slice %206 {offsets = [0, 0], sizes = [8, 192], strides = [1, 1]} : vector<8x256xf32> to vector<8x192xf32>
    %208 = arith.negf %207 : vector<8x192xf32>
    %209 = math.exp %208 : vector<8x192xf32>
    %cst_56 = arith.constant 1.000000e+00 : f32
    %210 = vector.broadcast %cst_56 : f32 to vector<8x192xf32>
    %211 = arith.addf %210, %209 : vector<8x192xf32>
    %212 = arith.divf %210, %211 : vector<8x192xf32>
    %213 = vector.extract_strided_slice %206 {offsets = [0, 192], sizes = [8, 64], strides = [1, 1]} : vector<8x256xf32> to vector<8x64xf32>
    %214 = math.tanh %213 : vector<8x64xf32>
    %215 = vector.extract_strided_slice %212 {offsets = [0, 64], sizes = [8, 64], strides = [1, 1]} : vector<8x192xf32> to vector<8x64xf32>
    %216 = arith.mulf %215, %133 : vector<8x64xf32>
    %217 = vector.extract_strided_slice %212 {offsets = [0, 0], sizes = [8, 64], strides = [1, 1]} : vector<8x192xf32> to vector<8x64xf32>
    %218 = arith.mulf %217, %214 : vector<8x64xf32>
    %219 = arith.addf %216, %218 : vector<8x64xf32>
    %220 = vector.extract_strided_slice %212 {offsets = [0, 128], sizes = [8, 64], strides = [1, 1]} : vector<8x192xf32> to vector<8x64xf32>
    %221 = math.tanh %219 : vector<8x64xf32>
    %222 = arith.mulf %220, %221 : vector<8x64xf32>
    %223 = arith.truncf %222 : vector<8x64xf32> to vector<8x64xbf16>
    %224 = vector.extract_strided_slice %21 {offsets = [24, 0], sizes = [8, 256], strides = [1, 1]} : vector<64x256xf32> to vector<8x256xf32>
    %225 = arith.truncf %157 : vector<8x64xf32> to vector<8x64xbf16>
    %cst_57 = arith.constant dense<0.000000e+00> : vector<8x256xf32>
    %226 = tpu.matmul %225, %0, %cst_57 {dimension_numbers = #tpu.dot_dimension_numbers<[1], [0], [0], [1], [0, 0, 1, 1], [], []>} : vector<8x64xbf16>, vector<64x256xbf16>, vector<8x256xf32> -> vector<8x256xf32>
    %227 = arith.addf %224, %226 : vector<8x256xf32>
    %228 = vector.extract_strided_slice %227 {offsets = [0, 0], sizes = [8, 192], strides = [1, 1]} : vector<8x256xf32> to vector<8x192xf32>
    %229 = arith.negf %228 : vector<8x192xf32>
    %230 = math.exp %229 : vector<8x192xf32>
    %cst_58 = arith.constant 1.000000e+00 : f32
    %231 = vector.broadcast %cst_58 : f32 to vector<8x192xf32>
    %232 = arith.addf %231, %230 : vector<8x192xf32>
    %233 = arith.divf %231, %232 : vector<8x192xf32>
    %234 = vector.extract_strided_slice %227 {offsets = [0, 192], sizes = [8, 64], strides = [1, 1]} : vector<8x256xf32> to vector<8x64xf32>
    %235 = math.tanh %234 : vector<8x64xf32>
    %236 = vector.extract_strided_slice %233 {offsets = [0, 64], sizes = [8, 64], strides = [1, 1]} : vector<8x192xf32> to vector<8x64xf32>
    %237 = arith.mulf %236, %154 : vector<8x64xf32>
    %238 = vector.extract_strided_slice %233 {offsets = [0, 0], sizes = [8, 64], strides = [1, 1]} : vector<8x192xf32> to vector<8x64xf32>
    %239 = arith.mulf %238, %235 : vector<8x64xf32>
    %240 = arith.addf %237, %239 : vector<8x64xf32>
    %241 = vector.extract_strided_slice %233 {offsets = [0, 128], sizes = [8, 64], strides = [1, 1]} : vector<8x192xf32> to vector<8x64xf32>
    %242 = math.tanh %240 : vector<8x64xf32>
    %243 = arith.mulf %241, %242 : vector<8x64xf32>
    %244 = arith.truncf %243 : vector<8x64xf32> to vector<8x64xbf16>
    %cst_59 = arith.constant dense<0.000000e+00> : vector<8x256xf32>
    %245 = tpu.matmul %201, %6, %cst_59 {dimension_numbers = #tpu.dot_dimension_numbers<[1], [0], [0], [1], [0, 0, 1, 1], [], []>} : vector<8x64xbf16>, vector<64x256xbf16>, vector<8x256xf32> -> vector<8x256xf32>
    %246 = arith.addf %245, %15 : vector<8x256xf32>
    %247 = arith.truncf %179 : vector<8x64xf32> to vector<8x64xbf16>
    %cst_60 = arith.constant dense<0.000000e+00> : vector<8x256xf32>
    %248 = tpu.matmul %247, %3, %cst_60 {dimension_numbers = #tpu.dot_dimension_numbers<[1], [0], [0], [1], [0, 0, 1, 1], [], []>} : vector<8x64xbf16>, vector<64x256xbf16>, vector<8x256xf32> -> vector<8x256xf32>
    %249 = arith.addf %246, %248 : vector<8x256xf32>
    %250 = vector.extract_strided_slice %249 {offsets = [0, 0], sizes = [8, 192], strides = [1, 1]} : vector<8x256xf32> to vector<8x192xf32>
    %251 = arith.negf %250 : vector<8x192xf32>
    %252 = math.exp %251 : vector<8x192xf32>
    %cst_61 = arith.constant 1.000000e+00 : f32
    %253 = vector.broadcast %cst_61 : f32 to vector<8x192xf32>
    %254 = arith.addf %253, %252 : vector<8x192xf32>
    %255 = arith.divf %253, %254 : vector<8x192xf32>
    %256 = vector.extract_strided_slice %249 {offsets = [0, 192], sizes = [8, 64], strides = [1, 1]} : vector<8x256xf32> to vector<8x64xf32>
    %257 = math.tanh %256 : vector<8x64xf32>
    %258 = vector.extract_strided_slice %255 {offsets = [0, 64], sizes = [8, 64], strides = [1, 1]} : vector<8x192xf32> to vector<8x64xf32>
    %259 = arith.mulf %258, %176 : vector<8x64xf32>
    %260 = vector.extract_strided_slice %255 {offsets = [0, 0], sizes = [8, 64], strides = [1, 1]} : vector<8x192xf32> to vector<8x64xf32>
    %261 = arith.mulf %260, %257 : vector<8x64xf32>
    %262 = arith.addf %259, %261 : vector<8x64xf32>
    %263 = vector.extract_strided_slice %255 {offsets = [0, 128], sizes = [8, 64], strides = [1, 1]} : vector<8x192xf32> to vector<8x64xf32>
    %264 = math.tanh %262 : vector<8x64xf32>
    %265 = arith.mulf %263, %264 : vector<8x64xf32>
    %cst_62 = arith.constant dense<0.000000e+00> : vector<8x256xf32>
    %266 = tpu.matmul %223, %5, %cst_62 {dimension_numbers = #tpu.dot_dimension_numbers<[1], [0], [0], [1], [0, 0, 1, 1], [], []>} : vector<8x64xbf16>, vector<64x256xbf16>, vector<8x256xf32> -> vector<8x256xf32>
    %267 = arith.addf %266, %12 : vector<8x256xf32>
    %268 = arith.truncf %200 : vector<8x64xf32> to vector<8x64xbf16>
    %cst_63 = arith.constant dense<0.000000e+00> : vector<8x256xf32>
    %269 = tpu.matmul %268, %2, %cst_63 {dimension_numbers = #tpu.dot_dimension_numbers<[1], [0], [0], [1], [0, 0, 1, 1], [], []>} : vector<8x64xbf16>, vector<64x256xbf16>, vector<8x256xf32> -> vector<8x256xf32>
    %270 = arith.addf %267, %269 : vector<8x256xf32>
    %271 = vector.extract_strided_slice %270 {offsets = [0, 0], sizes = [8, 192], strides = [1, 1]} : vector<8x256xf32> to vector<8x192xf32>
    %272 = arith.negf %271 : vector<8x192xf32>
    %273 = math.exp %272 : vector<8x192xf32>
    %cst_64 = arith.constant 1.000000e+00 : f32
    %274 = vector.broadcast %cst_64 : f32 to vector<8x192xf32>
    %275 = arith.addf %274, %273 : vector<8x192xf32>
    %276 = arith.divf %274, %275 : vector<8x192xf32>
    %277 = vector.extract_strided_slice %270 {offsets = [0, 192], sizes = [8, 64], strides = [1, 1]} : vector<8x256xf32> to vector<8x64xf32>
    %278 = math.tanh %277 : vector<8x64xf32>
    %279 = vector.extract_strided_slice %276 {offsets = [0, 64], sizes = [8, 64], strides = [1, 1]} : vector<8x192xf32> to vector<8x64xf32>
    %280 = arith.mulf %279, %197 : vector<8x64xf32>
    %281 = vector.extract_strided_slice %276 {offsets = [0, 0], sizes = [8, 64], strides = [1, 1]} : vector<8x192xf32> to vector<8x64xf32>
    %282 = arith.mulf %281, %278 : vector<8x64xf32>
    %283 = arith.addf %280, %282 : vector<8x64xf32>
    %284 = vector.extract_strided_slice %276 {offsets = [0, 128], sizes = [8, 64], strides = [1, 1]} : vector<8x192xf32> to vector<8x64xf32>
    %285 = math.tanh %283 : vector<8x64xf32>
    %286 = arith.mulf %284, %285 : vector<8x64xf32>
    %287 = arith.truncf %286 : vector<8x64xf32> to vector<8x64xbf16>
    %cst_65 = arith.constant dense<0.000000e+00> : vector<8x256xf32>
    %288 = tpu.matmul %244, %4, %cst_65 {dimension_numbers = #tpu.dot_dimension_numbers<[1], [0], [0], [1], [0, 0, 1, 1], [], []>} : vector<8x64xbf16>, vector<64x256xbf16>, vector<8x256xf32> -> vector<8x256xf32>
    %289 = arith.addf %288, %9 : vector<8x256xf32>
    %290 = arith.truncf %222 : vector<8x64xf32> to vector<8x64xbf16>
    %cst_66 = arith.constant dense<0.000000e+00> : vector<8x256xf32>
    %291 = tpu.matmul %290, %1, %cst_66 {dimension_numbers = #tpu.dot_dimension_numbers<[1], [0], [0], [1], [0, 0, 1, 1], [], []>} : vector<8x64xbf16>, vector<64x256xbf16>, vector<8x256xf32> -> vector<8x256xf32>
    %292 = arith.addf %289, %291 : vector<8x256xf32>
    %293 = vector.extract_strided_slice %292 {offsets = [0, 0], sizes = [8, 192], strides = [1, 1]} : vector<8x256xf32> to vector<8x192xf32>
    %294 = arith.negf %293 : vector<8x192xf32>
    %295 = math.exp %294 : vector<8x192xf32>
    %cst_67 = arith.constant 1.000000e+00 : f32
    %296 = vector.broadcast %cst_67 : f32 to vector<8x192xf32>
    %297 = arith.addf %296, %295 : vector<8x192xf32>
    %298 = arith.divf %296, %297 : vector<8x192xf32>
    %299 = vector.extract_strided_slice %292 {offsets = [0, 192], sizes = [8, 64], strides = [1, 1]} : vector<8x256xf32> to vector<8x64xf32>
    %300 = math.tanh %299 : vector<8x64xf32>
    %301 = vector.extract_strided_slice %298 {offsets = [0, 64], sizes = [8, 64], strides = [1, 1]} : vector<8x192xf32> to vector<8x64xf32>
    %302 = arith.mulf %301, %219 : vector<8x64xf32>
    %303 = vector.extract_strided_slice %298 {offsets = [0, 0], sizes = [8, 64], strides = [1, 1]} : vector<8x192xf32> to vector<8x64xf32>
    %304 = arith.mulf %303, %300 : vector<8x64xf32>
    %305 = arith.addf %302, %304 : vector<8x64xf32>
    %306 = vector.extract_strided_slice %298 {offsets = [0, 128], sizes = [8, 64], strides = [1, 1]} : vector<8x192xf32> to vector<8x64xf32>
    %307 = math.tanh %305 : vector<8x64xf32>
    %308 = arith.mulf %306, %307 : vector<8x64xf32>
    %309 = arith.truncf %308 : vector<8x64xf32> to vector<8x64xbf16>
    %310 = vector.extract_strided_slice %21 {offsets = [32, 0], sizes = [8, 256], strides = [1, 1]} : vector<64x256xf32> to vector<8x256xf32>
    %311 = arith.truncf %243 : vector<8x64xf32> to vector<8x64xbf16>
    %cst_68 = arith.constant dense<0.000000e+00> : vector<8x256xf32>
    %312 = tpu.matmul %311, %0, %cst_68 {dimension_numbers = #tpu.dot_dimension_numbers<[1], [0], [0], [1], [0, 0, 1, 1], [], []>} : vector<8x64xbf16>, vector<64x256xbf16>, vector<8x256xf32> -> vector<8x256xf32>
    %313 = arith.addf %310, %312 : vector<8x256xf32>
    %314 = vector.extract_strided_slice %313 {offsets = [0, 0], sizes = [8, 192], strides = [1, 1]} : vector<8x256xf32> to vector<8x192xf32>
    %315 = arith.negf %314 : vector<8x192xf32>
    %316 = math.exp %315 : vector<8x192xf32>
    %cst_69 = arith.constant 1.000000e+00 : f32
    %317 = vector.broadcast %cst_69 : f32 to vector<8x192xf32>
    %318 = arith.addf %317, %316 : vector<8x192xf32>
    %319 = arith.divf %317, %318 : vector<8x192xf32>
    %320 = vector.extract_strided_slice %313 {offsets = [0, 192], sizes = [8, 64], strides = [1, 1]} : vector<8x256xf32> to vector<8x64xf32>
    %321 = math.tanh %320 : vector<8x64xf32>
    %322 = vector.extract_strided_slice %319 {offsets = [0, 64], sizes = [8, 64], strides = [1, 1]} : vector<8x192xf32> to vector<8x64xf32>
    %323 = arith.mulf %322, %240 : vector<8x64xf32>
    %324 = vector.extract_strided_slice %319 {offsets = [0, 0], sizes = [8, 64], strides = [1, 1]} : vector<8x192xf32> to vector<8x64xf32>
    %325 = arith.mulf %324, %321 : vector<8x64xf32>
    %326 = arith.addf %323, %325 : vector<8x64xf32>
    %327 = vector.extract_strided_slice %319 {offsets = [0, 128], sizes = [8, 64], strides = [1, 1]} : vector<8x192xf32> to vector<8x64xf32>
    %328 = math.tanh %326 : vector<8x64xf32>
    %329 = arith.mulf %327, %328 : vector<8x64xf32>
    %330 = arith.truncf %329 : vector<8x64xf32> to vector<8x64xbf16>
    %cst_70 = arith.constant dense<0.000000e+00> : vector<8x256xf32>
    %331 = tpu.matmul %287, %6, %cst_70 {dimension_numbers = #tpu.dot_dimension_numbers<[1], [0], [0], [1], [0, 0, 1, 1], [], []>} : vector<8x64xbf16>, vector<64x256xbf16>, vector<8x256xf32> -> vector<8x256xf32>
    %332 = arith.addf %331, %15 : vector<8x256xf32>
    %333 = arith.truncf %265 : vector<8x64xf32> to vector<8x64xbf16>
    %cst_71 = arith.constant dense<0.000000e+00> : vector<8x256xf32>
    %334 = tpu.matmul %333, %3, %cst_71 {dimension_numbers = #tpu.dot_dimension_numbers<[1], [0], [0], [1], [0, 0, 1, 1], [], []>} : vector<8x64xbf16>, vector<64x256xbf16>, vector<8x256xf32> -> vector<8x256xf32>
    %335 = arith.addf %332, %334 : vector<8x256xf32>
    %336 = vector.extract_strided_slice %335 {offsets = [0, 0], sizes = [8, 192], strides = [1, 1]} : vector<8x256xf32> to vector<8x192xf32>
    %337 = arith.negf %336 : vector<8x192xf32>
    %338 = math.exp %337 : vector<8x192xf32>
    %cst_72 = arith.constant 1.000000e+00 : f32
    %339 = vector.broadcast %cst_72 : f32 to vector<8x192xf32>
    %340 = arith.addf %339, %338 : vector<8x192xf32>
    %341 = arith.divf %339, %340 : vector<8x192xf32>
    %342 = vector.extract_strided_slice %335 {offsets = [0, 192], sizes = [8, 64], strides = [1, 1]} : vector<8x256xf32> to vector<8x64xf32>
    %343 = math.tanh %342 : vector<8x64xf32>
    %344 = vector.extract_strided_slice %341 {offsets = [0, 64], sizes = [8, 64], strides = [1, 1]} : vector<8x192xf32> to vector<8x64xf32>
    %345 = arith.mulf %344, %262 : vector<8x64xf32>
    %346 = vector.extract_strided_slice %341 {offsets = [0, 0], sizes = [8, 64], strides = [1, 1]} : vector<8x192xf32> to vector<8x64xf32>
    %347 = arith.mulf %346, %343 : vector<8x64xf32>
    %348 = arith.addf %345, %347 : vector<8x64xf32>
    %349 = vector.extract_strided_slice %341 {offsets = [0, 128], sizes = [8, 64], strides = [1, 1]} : vector<8x192xf32> to vector<8x64xf32>
    %350 = math.tanh %348 : vector<8x64xf32>
    %351 = arith.mulf %349, %350 : vector<8x64xf32>
    %cst_73 = arith.constant dense<0.000000e+00> : vector<8x256xf32>
    %352 = tpu.matmul %309, %5, %cst_73 {dimension_numbers = #tpu.dot_dimension_numbers<[1], [0], [0], [1], [0, 0, 1, 1], [], []>} : vector<8x64xbf16>, vector<64x256xbf16>, vector<8x256xf32> -> vector<8x256xf32>
    %353 = arith.addf %352, %12 : vector<8x256xf32>
    %354 = arith.truncf %286 : vector<8x64xf32> to vector<8x64xbf16>
    %cst_74 = arith.constant dense<0.000000e+00> : vector<8x256xf32>
    %355 = tpu.matmul %354, %2, %cst_74 {dimension_numbers = #tpu.dot_dimension_numbers<[1], [0], [0], [1], [0, 0, 1, 1], [], []>} : vector<8x64xbf16>, vector<64x256xbf16>, vector<8x256xf32> -> vector<8x256xf32>
    %356 = arith.addf %353, %355 : vector<8x256xf32>
    %357 = vector.extract_strided_slice %356 {offsets = [0, 0], sizes = [8, 192], strides = [1, 1]} : vector<8x256xf32> to vector<8x192xf32>
    %358 = arith.negf %357 : vector<8x192xf32>
    %359 = math.exp %358 : vector<8x192xf32>
    %cst_75 = arith.constant 1.000000e+00 : f32
    %360 = vector.broadcast %cst_75 : f32 to vector<8x192xf32>
    %361 = arith.addf %360, %359 : vector<8x192xf32>
    %362 = arith.divf %360, %361 : vector<8x192xf32>
    %363 = vector.extract_strided_slice %356 {offsets = [0, 192], sizes = [8, 64], strides = [1, 1]} : vector<8x256xf32> to vector<8x64xf32>
    %364 = math.tanh %363 : vector<8x64xf32>
    %365 = vector.extract_strided_slice %362 {offsets = [0, 64], sizes = [8, 64], strides = [1, 1]} : vector<8x192xf32> to vector<8x64xf32>
    %366 = arith.mulf %365, %283 : vector<8x64xf32>
    %367 = vector.extract_strided_slice %362 {offsets = [0, 0], sizes = [8, 64], strides = [1, 1]} : vector<8x192xf32> to vector<8x64xf32>
    %368 = arith.mulf %367, %364 : vector<8x64xf32>
    %369 = arith.addf %366, %368 : vector<8x64xf32>
    %370 = vector.extract_strided_slice %362 {offsets = [0, 128], sizes = [8, 64], strides = [1, 1]} : vector<8x192xf32> to vector<8x64xf32>
    %371 = math.tanh %369 : vector<8x64xf32>
    %372 = arith.mulf %370, %371 : vector<8x64xf32>
    %373 = arith.truncf %372 : vector<8x64xf32> to vector<8x64xbf16>
    %cst_76 = arith.constant dense<0.000000e+00> : vector<8x256xf32>
    %374 = tpu.matmul %330, %4, %cst_76 {dimension_numbers = #tpu.dot_dimension_numbers<[1], [0], [0], [1], [0, 0, 1, 1], [], []>} : vector<8x64xbf16>, vector<64x256xbf16>, vector<8x256xf32> -> vector<8x256xf32>
    %375 = arith.addf %374, %9 : vector<8x256xf32>
    %376 = arith.truncf %308 : vector<8x64xf32> to vector<8x64xbf16>
    %cst_77 = arith.constant dense<0.000000e+00> : vector<8x256xf32>
    %377 = tpu.matmul %376, %1, %cst_77 {dimension_numbers = #tpu.dot_dimension_numbers<[1], [0], [0], [1], [0, 0, 1, 1], [], []>} : vector<8x64xbf16>, vector<64x256xbf16>, vector<8x256xf32> -> vector<8x256xf32>
    %378 = arith.addf %375, %377 : vector<8x256xf32>
    %379 = vector.extract_strided_slice %378 {offsets = [0, 0], sizes = [8, 192], strides = [1, 1]} : vector<8x256xf32> to vector<8x192xf32>
    %380 = arith.negf %379 : vector<8x192xf32>
    %381 = math.exp %380 : vector<8x192xf32>
    %cst_78 = arith.constant 1.000000e+00 : f32
    %382 = vector.broadcast %cst_78 : f32 to vector<8x192xf32>
    %383 = arith.addf %382, %381 : vector<8x192xf32>
    %384 = arith.divf %382, %383 : vector<8x192xf32>
    %385 = vector.extract_strided_slice %378 {offsets = [0, 192], sizes = [8, 64], strides = [1, 1]} : vector<8x256xf32> to vector<8x64xf32>
    %386 = math.tanh %385 : vector<8x64xf32>
    %387 = vector.extract_strided_slice %384 {offsets = [0, 64], sizes = [8, 64], strides = [1, 1]} : vector<8x192xf32> to vector<8x64xf32>
    %388 = arith.mulf %387, %305 : vector<8x64xf32>
    %389 = vector.extract_strided_slice %384 {offsets = [0, 0], sizes = [8, 64], strides = [1, 1]} : vector<8x192xf32> to vector<8x64xf32>
    %390 = arith.mulf %389, %386 : vector<8x64xf32>
    %391 = arith.addf %388, %390 : vector<8x64xf32>
    %392 = vector.extract_strided_slice %384 {offsets = [0, 128], sizes = [8, 64], strides = [1, 1]} : vector<8x192xf32> to vector<8x64xf32>
    %393 = math.tanh %391 : vector<8x64xf32>
    %394 = arith.mulf %392, %393 : vector<8x64xf32>
    %395 = arith.truncf %394 : vector<8x64xf32> to vector<8x64xbf16>
    %396 = vector.extract_strided_slice %21 {offsets = [40, 0], sizes = [8, 256], strides = [1, 1]} : vector<64x256xf32> to vector<8x256xf32>
    %397 = arith.truncf %329 : vector<8x64xf32> to vector<8x64xbf16>
    %cst_79 = arith.constant dense<0.000000e+00> : vector<8x256xf32>
    %398 = tpu.matmul %397, %0, %cst_79 {dimension_numbers = #tpu.dot_dimension_numbers<[1], [0], [0], [1], [0, 0, 1, 1], [], []>} : vector<8x64xbf16>, vector<64x256xbf16>, vector<8x256xf32> -> vector<8x256xf32>
    %399 = arith.addf %396, %398 : vector<8x256xf32>
    %400 = vector.extract_strided_slice %399 {offsets = [0, 0], sizes = [8, 192], strides = [1, 1]} : vector<8x256xf32> to vector<8x192xf32>
    %401 = arith.negf %400 : vector<8x192xf32>
    %402 = math.exp %401 : vector<8x192xf32>
    %cst_80 = arith.constant 1.000000e+00 : f32
    %403 = vector.broadcast %cst_80 : f32 to vector<8x192xf32>
    %404 = arith.addf %403, %402 : vector<8x192xf32>
    %405 = arith.divf %403, %404 : vector<8x192xf32>
    %406 = vector.extract_strided_slice %399 {offsets = [0, 192], sizes = [8, 64], strides = [1, 1]} : vector<8x256xf32> to vector<8x64xf32>
    %407 = math.tanh %406 : vector<8x64xf32>
    %408 = vector.extract_strided_slice %405 {offsets = [0, 64], sizes = [8, 64], strides = [1, 1]} : vector<8x192xf32> to vector<8x64xf32>
    %409 = arith.mulf %408, %326 : vector<8x64xf32>
    %410 = vector.extract_strided_slice %405 {offsets = [0, 0], sizes = [8, 64], strides = [1, 1]} : vector<8x192xf32> to vector<8x64xf32>
    %411 = arith.mulf %410, %407 : vector<8x64xf32>
    %412 = arith.addf %409, %411 : vector<8x64xf32>
    %413 = vector.extract_strided_slice %405 {offsets = [0, 128], sizes = [8, 64], strides = [1, 1]} : vector<8x192xf32> to vector<8x64xf32>
    %414 = math.tanh %412 : vector<8x64xf32>
    %415 = arith.mulf %413, %414 : vector<8x64xf32>
    %416 = arith.truncf %415 : vector<8x64xf32> to vector<8x64xbf16>
    %cst_81 = arith.constant dense<0.000000e+00> : vector<8x256xf32>
    %417 = tpu.matmul %373, %6, %cst_81 {dimension_numbers = #tpu.dot_dimension_numbers<[1], [0], [0], [1], [0, 0, 1, 1], [], []>} : vector<8x64xbf16>, vector<64x256xbf16>, vector<8x256xf32> -> vector<8x256xf32>
    %418 = arith.addf %417, %15 : vector<8x256xf32>
    %419 = arith.truncf %351 : vector<8x64xf32> to vector<8x64xbf16>
    %cst_82 = arith.constant dense<0.000000e+00> : vector<8x256xf32>
    %420 = tpu.matmul %419, %3, %cst_82 {dimension_numbers = #tpu.dot_dimension_numbers<[1], [0], [0], [1], [0, 0, 1, 1], [], []>} : vector<8x64xbf16>, vector<64x256xbf16>, vector<8x256xf32> -> vector<8x256xf32>
    %421 = arith.addf %418, %420 : vector<8x256xf32>
    %422 = vector.extract_strided_slice %421 {offsets = [0, 0], sizes = [8, 192], strides = [1, 1]} : vector<8x256xf32> to vector<8x192xf32>
    %423 = arith.negf %422 : vector<8x192xf32>
    %424 = math.exp %423 : vector<8x192xf32>
    %cst_83 = arith.constant 1.000000e+00 : f32
    %425 = vector.broadcast %cst_83 : f32 to vector<8x192xf32>
    %426 = arith.addf %425, %424 : vector<8x192xf32>
    %427 = arith.divf %425, %426 : vector<8x192xf32>
    %428 = vector.extract_strided_slice %421 {offsets = [0, 192], sizes = [8, 64], strides = [1, 1]} : vector<8x256xf32> to vector<8x64xf32>
    %429 = math.tanh %428 : vector<8x64xf32>
    %430 = vector.extract_strided_slice %427 {offsets = [0, 64], sizes = [8, 64], strides = [1, 1]} : vector<8x192xf32> to vector<8x64xf32>
    %431 = arith.mulf %430, %348 : vector<8x64xf32>
    %432 = vector.extract_strided_slice %427 {offsets = [0, 0], sizes = [8, 64], strides = [1, 1]} : vector<8x192xf32> to vector<8x64xf32>
    %433 = arith.mulf %432, %429 : vector<8x64xf32>
    %434 = arith.addf %431, %433 : vector<8x64xf32>
    %435 = vector.extract_strided_slice %427 {offsets = [0, 128], sizes = [8, 64], strides = [1, 1]} : vector<8x192xf32> to vector<8x64xf32>
    %436 = math.tanh %434 : vector<8x64xf32>
    %437 = arith.mulf %435, %436 : vector<8x64xf32>
    %cst_84 = arith.constant dense<0.000000e+00> : vector<8x256xf32>
    %438 = tpu.matmul %395, %5, %cst_84 {dimension_numbers = #tpu.dot_dimension_numbers<[1], [0], [0], [1], [0, 0, 1, 1], [], []>} : vector<8x64xbf16>, vector<64x256xbf16>, vector<8x256xf32> -> vector<8x256xf32>
    %439 = arith.addf %438, %12 : vector<8x256xf32>
    %440 = arith.truncf %372 : vector<8x64xf32> to vector<8x64xbf16>
    %cst_85 = arith.constant dense<0.000000e+00> : vector<8x256xf32>
    %441 = tpu.matmul %440, %2, %cst_85 {dimension_numbers = #tpu.dot_dimension_numbers<[1], [0], [0], [1], [0, 0, 1, 1], [], []>} : vector<8x64xbf16>, vector<64x256xbf16>, vector<8x256xf32> -> vector<8x256xf32>
    %442 = arith.addf %439, %441 : vector<8x256xf32>
    %443 = vector.extract_strided_slice %442 {offsets = [0, 0], sizes = [8, 192], strides = [1, 1]} : vector<8x256xf32> to vector<8x192xf32>
    %444 = arith.negf %443 : vector<8x192xf32>
    %445 = math.exp %444 : vector<8x192xf32>
    %cst_86 = arith.constant 1.000000e+00 : f32
    %446 = vector.broadcast %cst_86 : f32 to vector<8x192xf32>
    %447 = arith.addf %446, %445 : vector<8x192xf32>
    %448 = arith.divf %446, %447 : vector<8x192xf32>
    %449 = vector.extract_strided_slice %442 {offsets = [0, 192], sizes = [8, 64], strides = [1, 1]} : vector<8x256xf32> to vector<8x64xf32>
    %450 = math.tanh %449 : vector<8x64xf32>
    %451 = vector.extract_strided_slice %448 {offsets = [0, 64], sizes = [8, 64], strides = [1, 1]} : vector<8x192xf32> to vector<8x64xf32>
    %452 = arith.mulf %451, %369 : vector<8x64xf32>
    %453 = vector.extract_strided_slice %448 {offsets = [0, 0], sizes = [8, 64], strides = [1, 1]} : vector<8x192xf32> to vector<8x64xf32>
    %454 = arith.mulf %453, %450 : vector<8x64xf32>
    %455 = arith.addf %452, %454 : vector<8x64xf32>
    %456 = vector.extract_strided_slice %448 {offsets = [0, 128], sizes = [8, 64], strides = [1, 1]} : vector<8x192xf32> to vector<8x64xf32>
    %457 = math.tanh %455 : vector<8x64xf32>
    %458 = arith.mulf %456, %457 : vector<8x64xf32>
    %459 = arith.truncf %458 : vector<8x64xf32> to vector<8x64xbf16>
    %cst_87 = arith.constant dense<0.000000e+00> : vector<8x256xf32>
    %460 = tpu.matmul %416, %4, %cst_87 {dimension_numbers = #tpu.dot_dimension_numbers<[1], [0], [0], [1], [0, 0, 1, 1], [], []>} : vector<8x64xbf16>, vector<64x256xbf16>, vector<8x256xf32> -> vector<8x256xf32>
    %461 = arith.addf %460, %9 : vector<8x256xf32>
    %462 = arith.truncf %394 : vector<8x64xf32> to vector<8x64xbf16>
    %cst_88 = arith.constant dense<0.000000e+00> : vector<8x256xf32>
    %463 = tpu.matmul %462, %1, %cst_88 {dimension_numbers = #tpu.dot_dimension_numbers<[1], [0], [0], [1], [0, 0, 1, 1], [], []>} : vector<8x64xbf16>, vector<64x256xbf16>, vector<8x256xf32> -> vector<8x256xf32>
    %464 = arith.addf %461, %463 : vector<8x256xf32>
    %465 = vector.extract_strided_slice %464 {offsets = [0, 0], sizes = [8, 192], strides = [1, 1]} : vector<8x256xf32> to vector<8x192xf32>
    %466 = arith.negf %465 : vector<8x192xf32>
    %467 = math.exp %466 : vector<8x192xf32>
    %cst_89 = arith.constant 1.000000e+00 : f32
    %468 = vector.broadcast %cst_89 : f32 to vector<8x192xf32>
    %469 = arith.addf %468, %467 : vector<8x192xf32>
    %470 = arith.divf %468, %469 : vector<8x192xf32>
    %471 = vector.extract_strided_slice %464 {offsets = [0, 192], sizes = [8, 64], strides = [1, 1]} : vector<8x256xf32> to vector<8x64xf32>
    %472 = math.tanh %471 : vector<8x64xf32>
    %473 = vector.extract_strided_slice %470 {offsets = [0, 64], sizes = [8, 64], strides = [1, 1]} : vector<8x192xf32> to vector<8x64xf32>
    %474 = arith.mulf %473, %391 : vector<8x64xf32>
    %475 = vector.extract_strided_slice %470 {offsets = [0, 0], sizes = [8, 64], strides = [1, 1]} : vector<8x192xf32> to vector<8x64xf32>
    %476 = arith.mulf %475, %472 : vector<8x64xf32>
    %477 = arith.addf %474, %476 : vector<8x64xf32>
    %478 = vector.extract_strided_slice %470 {offsets = [0, 128], sizes = [8, 64], strides = [1, 1]} : vector<8x192xf32> to vector<8x64xf32>
    %479 = math.tanh %477 : vector<8x64xf32>
    %480 = arith.mulf %478, %479 : vector<8x64xf32>
    %481 = arith.truncf %480 : vector<8x64xf32> to vector<8x64xbf16>
    %482 = vector.extract_strided_slice %21 {offsets = [48, 0], sizes = [8, 256], strides = [1, 1]} : vector<64x256xf32> to vector<8x256xf32>
    %483 = arith.truncf %415 : vector<8x64xf32> to vector<8x64xbf16>
    %cst_90 = arith.constant dense<0.000000e+00> : vector<8x256xf32>
    %484 = tpu.matmul %483, %0, %cst_90 {dimension_numbers = #tpu.dot_dimension_numbers<[1], [0], [0], [1], [0, 0, 1, 1], [], []>} : vector<8x64xbf16>, vector<64x256xbf16>, vector<8x256xf32> -> vector<8x256xf32>
    %485 = arith.addf %482, %484 : vector<8x256xf32>
    %486 = vector.extract_strided_slice %485 {offsets = [0, 0], sizes = [8, 192], strides = [1, 1]} : vector<8x256xf32> to vector<8x192xf32>
    %487 = arith.negf %486 : vector<8x192xf32>
    %488 = math.exp %487 : vector<8x192xf32>
    %cst_91 = arith.constant 1.000000e+00 : f32
    %489 = vector.broadcast %cst_91 : f32 to vector<8x192xf32>
    %490 = arith.addf %489, %488 : vector<8x192xf32>
    %491 = arith.divf %489, %490 : vector<8x192xf32>
    %492 = vector.extract_strided_slice %485 {offsets = [0, 192], sizes = [8, 64], strides = [1, 1]} : vector<8x256xf32> to vector<8x64xf32>
    %493 = math.tanh %492 : vector<8x64xf32>
    %494 = vector.extract_strided_slice %491 {offsets = [0, 64], sizes = [8, 64], strides = [1, 1]} : vector<8x192xf32> to vector<8x64xf32>
    %495 = arith.mulf %494, %412 : vector<8x64xf32>
    %496 = vector.extract_strided_slice %491 {offsets = [0, 0], sizes = [8, 64], strides = [1, 1]} : vector<8x192xf32> to vector<8x64xf32>
    %497 = arith.mulf %496, %493 : vector<8x64xf32>
    %498 = arith.addf %495, %497 : vector<8x64xf32>
    %499 = vector.extract_strided_slice %491 {offsets = [0, 128], sizes = [8, 64], strides = [1, 1]} : vector<8x192xf32> to vector<8x64xf32>
    %500 = math.tanh %498 : vector<8x64xf32>
    %501 = arith.mulf %499, %500 : vector<8x64xf32>
    %502 = arith.truncf %501 : vector<8x64xf32> to vector<8x64xbf16>
    %cst_92 = arith.constant dense<0.000000e+00> : vector<8x256xf32>
    %503 = tpu.matmul %459, %6, %cst_92 {dimension_numbers = #tpu.dot_dimension_numbers<[1], [0], [0], [1], [0, 0, 1, 1], [], []>} : vector<8x64xbf16>, vector<64x256xbf16>, vector<8x256xf32> -> vector<8x256xf32>
    %504 = arith.addf %503, %15 : vector<8x256xf32>
    %505 = arith.truncf %437 : vector<8x64xf32> to vector<8x64xbf16>
    %cst_93 = arith.constant dense<0.000000e+00> : vector<8x256xf32>
    %506 = tpu.matmul %505, %3, %cst_93 {dimension_numbers = #tpu.dot_dimension_numbers<[1], [0], [0], [1], [0, 0, 1, 1], [], []>} : vector<8x64xbf16>, vector<64x256xbf16>, vector<8x256xf32> -> vector<8x256xf32>
    %507 = arith.addf %504, %506 : vector<8x256xf32>
    %508 = vector.extract_strided_slice %507 {offsets = [0, 0], sizes = [8, 192], strides = [1, 1]} : vector<8x256xf32> to vector<8x192xf32>
    %509 = arith.negf %508 : vector<8x192xf32>
    %510 = math.exp %509 : vector<8x192xf32>
    %cst_94 = arith.constant 1.000000e+00 : f32
    %511 = vector.broadcast %cst_94 : f32 to vector<8x192xf32>
    %512 = arith.addf %511, %510 : vector<8x192xf32>
    %513 = arith.divf %511, %512 : vector<8x192xf32>
    %514 = vector.extract_strided_slice %507 {offsets = [0, 192], sizes = [8, 64], strides = [1, 1]} : vector<8x256xf32> to vector<8x64xf32>
    %515 = math.tanh %514 : vector<8x64xf32>
    %516 = vector.extract_strided_slice %513 {offsets = [0, 64], sizes = [8, 64], strides = [1, 1]} : vector<8x192xf32> to vector<8x64xf32>
    %517 = arith.mulf %516, %434 : vector<8x64xf32>
    %518 = vector.extract_strided_slice %513 {offsets = [0, 0], sizes = [8, 64], strides = [1, 1]} : vector<8x192xf32> to vector<8x64xf32>
    %519 = arith.mulf %518, %515 : vector<8x64xf32>
    %520 = arith.addf %517, %519 : vector<8x64xf32>
    %521 = vector.extract_strided_slice %513 {offsets = [0, 128], sizes = [8, 64], strides = [1, 1]} : vector<8x192xf32> to vector<8x64xf32>
    %522 = math.tanh %520 : vector<8x64xf32>
    %523 = arith.mulf %521, %522 : vector<8x64xf32>
    %cst_95 = arith.constant dense<0.000000e+00> : vector<8x256xf32>
    %524 = tpu.matmul %481, %5, %cst_95 {dimension_numbers = #tpu.dot_dimension_numbers<[1], [0], [0], [1], [0, 0, 1, 1], [], []>} : vector<8x64xbf16>, vector<64x256xbf16>, vector<8x256xf32> -> vector<8x256xf32>
    %525 = arith.addf %524, %12 : vector<8x256xf32>
    %526 = arith.truncf %458 : vector<8x64xf32> to vector<8x64xbf16>
    %cst_96 = arith.constant dense<0.000000e+00> : vector<8x256xf32>
    %527 = tpu.matmul %526, %2, %cst_96 {dimension_numbers = #tpu.dot_dimension_numbers<[1], [0], [0], [1], [0, 0, 1, 1], [], []>} : vector<8x64xbf16>, vector<64x256xbf16>, vector<8x256xf32> -> vector<8x256xf32>
    %528 = arith.addf %525, %527 : vector<8x256xf32>
    %529 = vector.extract_strided_slice %528 {offsets = [0, 0], sizes = [8, 192], strides = [1, 1]} : vector<8x256xf32> to vector<8x192xf32>
    %530 = arith.negf %529 : vector<8x192xf32>
    %531 = math.exp %530 : vector<8x192xf32>
    %cst_97 = arith.constant 1.000000e+00 : f32
    %532 = vector.broadcast %cst_97 : f32 to vector<8x192xf32>
    %533 = arith.addf %532, %531 : vector<8x192xf32>
    %534 = arith.divf %532, %533 : vector<8x192xf32>
    %535 = vector.extract_strided_slice %528 {offsets = [0, 192], sizes = [8, 64], strides = [1, 1]} : vector<8x256xf32> to vector<8x64xf32>
    %536 = math.tanh %535 : vector<8x64xf32>
    %537 = vector.extract_strided_slice %534 {offsets = [0, 64], sizes = [8, 64], strides = [1, 1]} : vector<8x192xf32> to vector<8x64xf32>
    %538 = arith.mulf %537, %455 : vector<8x64xf32>
    %539 = vector.extract_strided_slice %534 {offsets = [0, 0], sizes = [8, 64], strides = [1, 1]} : vector<8x192xf32> to vector<8x64xf32>
    %540 = arith.mulf %539, %536 : vector<8x64xf32>
    %541 = arith.addf %538, %540 : vector<8x64xf32>
    %542 = vector.extract_strided_slice %534 {offsets = [0, 128], sizes = [8, 64], strides = [1, 1]} : vector<8x192xf32> to vector<8x64xf32>
    %543 = math.tanh %541 : vector<8x64xf32>
    %544 = arith.mulf %542, %543 : vector<8x64xf32>
    %545 = arith.truncf %544 : vector<8x64xf32> to vector<8x64xbf16>
    %cst_98 = arith.constant dense<0.000000e+00> : vector<8x256xf32>
    %546 = tpu.matmul %502, %4, %cst_98 {dimension_numbers = #tpu.dot_dimension_numbers<[1], [0], [0], [1], [0, 0, 1, 1], [], []>} : vector<8x64xbf16>, vector<64x256xbf16>, vector<8x256xf32> -> vector<8x256xf32>
    %547 = arith.addf %546, %9 : vector<8x256xf32>
    %548 = arith.truncf %480 : vector<8x64xf32> to vector<8x64xbf16>
    %cst_99 = arith.constant dense<0.000000e+00> : vector<8x256xf32>
    %549 = tpu.matmul %548, %1, %cst_99 {dimension_numbers = #tpu.dot_dimension_numbers<[1], [0], [0], [1], [0, 0, 1, 1], [], []>} : vector<8x64xbf16>, vector<64x256xbf16>, vector<8x256xf32> -> vector<8x256xf32>
    %550 = arith.addf %547, %549 : vector<8x256xf32>
    %551 = vector.extract_strided_slice %550 {offsets = [0, 0], sizes = [8, 192], strides = [1, 1]} : vector<8x256xf32> to vector<8x192xf32>
    %552 = arith.negf %551 : vector<8x192xf32>
    %553 = math.exp %552 : vector<8x192xf32>
    %cst_100 = arith.constant 1.000000e+00 : f32
    %554 = vector.broadcast %cst_100 : f32 to vector<8x192xf32>
    %555 = arith.addf %554, %553 : vector<8x192xf32>
    %556 = arith.divf %554, %555 : vector<8x192xf32>
    %557 = vector.extract_strided_slice %550 {offsets = [0, 192], sizes = [8, 64], strides = [1, 1]} : vector<8x256xf32> to vector<8x64xf32>
    %558 = math.tanh %557 : vector<8x64xf32>
    %559 = vector.extract_strided_slice %556 {offsets = [0, 64], sizes = [8, 64], strides = [1, 1]} : vector<8x192xf32> to vector<8x64xf32>
    %560 = arith.mulf %559, %477 : vector<8x64xf32>
    %561 = vector.extract_strided_slice %556 {offsets = [0, 0], sizes = [8, 64], strides = [1, 1]} : vector<8x192xf32> to vector<8x64xf32>
    %562 = arith.mulf %561, %558 : vector<8x64xf32>
    %563 = arith.addf %560, %562 : vector<8x64xf32>
    %564 = vector.extract_strided_slice %556 {offsets = [0, 128], sizes = [8, 64], strides = [1, 1]} : vector<8x192xf32> to vector<8x64xf32>
    %565 = math.tanh %563 : vector<8x64xf32>
    %566 = arith.mulf %564, %565 : vector<8x64xf32>
    %567 = arith.truncf %566 : vector<8x64xf32> to vector<8x64xbf16>
    %568 = vector.extract_strided_slice %21 {offsets = [56, 0], sizes = [8, 256], strides = [1, 1]} : vector<64x256xf32> to vector<8x256xf32>
    %569 = arith.truncf %501 : vector<8x64xf32> to vector<8x64xbf16>
    %cst_101 = arith.constant dense<0.000000e+00> : vector<8x256xf32>
    %570 = tpu.matmul %569, %0, %cst_101 {dimension_numbers = #tpu.dot_dimension_numbers<[1], [0], [0], [1], [0, 0, 1, 1], [], []>} : vector<8x64xbf16>, vector<64x256xbf16>, vector<8x256xf32> -> vector<8x256xf32>
    %571 = arith.addf %568, %570 : vector<8x256xf32>
    %572 = vector.extract_strided_slice %571 {offsets = [0, 0], sizes = [8, 192], strides = [1, 1]} : vector<8x256xf32> to vector<8x192xf32>
    %573 = arith.negf %572 : vector<8x192xf32>
    %574 = math.exp %573 : vector<8x192xf32>
    %cst_102 = arith.constant 1.000000e+00 : f32
    %575 = vector.broadcast %cst_102 : f32 to vector<8x192xf32>
    %576 = arith.addf %575, %574 : vector<8x192xf32>
    %577 = arith.divf %575, %576 : vector<8x192xf32>
    %578 = vector.extract_strided_slice %571 {offsets = [0, 192], sizes = [8, 64], strides = [1, 1]} : vector<8x256xf32> to vector<8x64xf32>
    %579 = math.tanh %578 : vector<8x64xf32>
    %580 = vector.extract_strided_slice %577 {offsets = [0, 64], sizes = [8, 64], strides = [1, 1]} : vector<8x192xf32> to vector<8x64xf32>
    %581 = arith.mulf %580, %498 : vector<8x64xf32>
    %582 = vector.extract_strided_slice %577 {offsets = [0, 0], sizes = [8, 64], strides = [1, 1]} : vector<8x192xf32> to vector<8x64xf32>
    %583 = arith.mulf %582, %579 : vector<8x64xf32>
    %584 = arith.addf %581, %583 : vector<8x64xf32>
    %585 = vector.extract_strided_slice %577 {offsets = [0, 128], sizes = [8, 64], strides = [1, 1]} : vector<8x192xf32> to vector<8x64xf32>
    %586 = math.tanh %584 : vector<8x64xf32>
    %587 = arith.mulf %585, %586 : vector<8x64xf32>
    %588 = arith.truncf %587 : vector<8x64xf32> to vector<8x64xbf16>
    %cst_103 = arith.constant dense<0.000000e+00> : vector<8x256xf32>
    %589 = tpu.matmul %545, %6, %cst_103 {dimension_numbers = #tpu.dot_dimension_numbers<[1], [0], [0], [1], [0, 0, 1, 1], [], []>} : vector<8x64xbf16>, vector<64x256xbf16>, vector<8x256xf32> -> vector<8x256xf32>
    %590 = arith.addf %589, %15 : vector<8x256xf32>
    %591 = arith.truncf %523 : vector<8x64xf32> to vector<8x64xbf16>
    %cst_104 = arith.constant dense<0.000000e+00> : vector<8x256xf32>
    %592 = tpu.matmul %591, %3, %cst_104 {dimension_numbers = #tpu.dot_dimension_numbers<[1], [0], [0], [1], [0, 0, 1, 1], [], []>} : vector<8x64xbf16>, vector<64x256xbf16>, vector<8x256xf32> -> vector<8x256xf32>
    %593 = arith.addf %590, %592 : vector<8x256xf32>
    %594 = vector.extract_strided_slice %593 {offsets = [0, 0], sizes = [8, 192], strides = [1, 1]} : vector<8x256xf32> to vector<8x192xf32>
    %595 = arith.negf %594 : vector<8x192xf32>
    %596 = math.exp %595 : vector<8x192xf32>
    %cst_105 = arith.constant 1.000000e+00 : f32
    %597 = vector.broadcast %cst_105 : f32 to vector<8x192xf32>
    %598 = arith.addf %597, %596 : vector<8x192xf32>
    %599 = arith.divf %597, %598 : vector<8x192xf32>
    %600 = vector.extract_strided_slice %593 {offsets = [0, 192], sizes = [8, 64], strides = [1, 1]} : vector<8x256xf32> to vector<8x64xf32>
    %601 = math.tanh %600 : vector<8x64xf32>
    %602 = vector.extract_strided_slice %599 {offsets = [0, 64], sizes = [8, 64], strides = [1, 1]} : vector<8x192xf32> to vector<8x64xf32>
    %603 = arith.mulf %602, %520 : vector<8x64xf32>
    %604 = vector.extract_strided_slice %599 {offsets = [0, 0], sizes = [8, 64], strides = [1, 1]} : vector<8x192xf32> to vector<8x64xf32>
    %605 = arith.mulf %604, %601 : vector<8x64xf32>
    %606 = arith.addf %603, %605 : vector<8x64xf32>
    %607 = vector.extract_strided_slice %599 {offsets = [0, 128], sizes = [8, 64], strides = [1, 1]} : vector<8x192xf32> to vector<8x64xf32>
    %608 = math.tanh %606 : vector<8x64xf32>
    %609 = arith.mulf %607, %608 : vector<8x64xf32>
    %cst_106 = arith.constant dense<0.000000e+00> : vector<8x256xf32>
    %610 = tpu.matmul %567, %5, %cst_106 {dimension_numbers = #tpu.dot_dimension_numbers<[1], [0], [0], [1], [0, 0, 1, 1], [], []>} : vector<8x64xbf16>, vector<64x256xbf16>, vector<8x256xf32> -> vector<8x256xf32>
    %611 = arith.addf %610, %12 : vector<8x256xf32>
    %612 = arith.truncf %544 : vector<8x64xf32> to vector<8x64xbf16>
    %cst_107 = arith.constant dense<0.000000e+00> : vector<8x256xf32>
    %613 = tpu.matmul %612, %2, %cst_107 {dimension_numbers = #tpu.dot_dimension_numbers<[1], [0], [0], [1], [0, 0, 1, 1], [], []>} : vector<8x64xbf16>, vector<64x256xbf16>, vector<8x256xf32> -> vector<8x256xf32>
    %614 = arith.addf %611, %613 : vector<8x256xf32>
    %615 = vector.extract_strided_slice %614 {offsets = [0, 0], sizes = [8, 192], strides = [1, 1]} : vector<8x256xf32> to vector<8x192xf32>
    %616 = arith.negf %615 : vector<8x192xf32>
    %617 = math.exp %616 : vector<8x192xf32>
    %cst_108 = arith.constant 1.000000e+00 : f32
    %618 = vector.broadcast %cst_108 : f32 to vector<8x192xf32>
    %619 = arith.addf %618, %617 : vector<8x192xf32>
    %620 = arith.divf %618, %619 : vector<8x192xf32>
    %621 = vector.extract_strided_slice %614 {offsets = [0, 192], sizes = [8, 64], strides = [1, 1]} : vector<8x256xf32> to vector<8x64xf32>
    %622 = math.tanh %621 : vector<8x64xf32>
    %623 = vector.extract_strided_slice %620 {offsets = [0, 64], sizes = [8, 64], strides = [1, 1]} : vector<8x192xf32> to vector<8x64xf32>
    %624 = arith.mulf %623, %541 : vector<8x64xf32>
    %625 = vector.extract_strided_slice %620 {offsets = [0, 0], sizes = [8, 64], strides = [1, 1]} : vector<8x192xf32> to vector<8x64xf32>
    %626 = arith.mulf %625, %622 : vector<8x64xf32>
    %627 = arith.addf %624, %626 : vector<8x64xf32>
    %628 = vector.extract_strided_slice %620 {offsets = [0, 128], sizes = [8, 64], strides = [1, 1]} : vector<8x192xf32> to vector<8x64xf32>
    %629 = math.tanh %627 : vector<8x64xf32>
    %630 = arith.mulf %628, %629 : vector<8x64xf32>
    %631 = arith.truncf %630 : vector<8x64xf32> to vector<8x64xbf16>
    %cst_109 = arith.constant dense<0.000000e+00> : vector<8x256xf32>
    %632 = tpu.matmul %588, %4, %cst_109 {dimension_numbers = #tpu.dot_dimension_numbers<[1], [0], [0], [1], [0, 0, 1, 1], [], []>} : vector<8x64xbf16>, vector<64x256xbf16>, vector<8x256xf32> -> vector<8x256xf32>
    %633 = arith.addf %632, %9 : vector<8x256xf32>
    %634 = arith.truncf %566 : vector<8x64xf32> to vector<8x64xbf16>
    %cst_110 = arith.constant dense<0.000000e+00> : vector<8x256xf32>
    %635 = tpu.matmul %634, %1, %cst_110 {dimension_numbers = #tpu.dot_dimension_numbers<[1], [0], [0], [1], [0, 0, 1, 1], [], []>} : vector<8x64xbf16>, vector<64x256xbf16>, vector<8x256xf32> -> vector<8x256xf32>
    %636 = arith.addf %633, %635 : vector<8x256xf32>
    %637 = vector.extract_strided_slice %636 {offsets = [0, 0], sizes = [8, 192], strides = [1, 1]} : vector<8x256xf32> to vector<8x192xf32>
    %638 = arith.negf %637 : vector<8x192xf32>
    %639 = math.exp %638 : vector<8x192xf32>
    %cst_111 = arith.constant 1.000000e+00 : f32
    %640 = vector.broadcast %cst_111 : f32 to vector<8x192xf32>
    %641 = arith.addf %640, %639 : vector<8x192xf32>
    %642 = arith.divf %640, %641 : vector<8x192xf32>
    %643 = vector.extract_strided_slice %636 {offsets = [0, 192], sizes = [8, 64], strides = [1, 1]} : vector<8x256xf32> to vector<8x64xf32>
    %644 = math.tanh %643 : vector<8x64xf32>
    %645 = vector.extract_strided_slice %642 {offsets = [0, 64], sizes = [8, 64], strides = [1, 1]} : vector<8x192xf32> to vector<8x64xf32>
    %646 = arith.mulf %645, %563 : vector<8x64xf32>
    %647 = vector.extract_strided_slice %642 {offsets = [0, 0], sizes = [8, 64], strides = [1, 1]} : vector<8x192xf32> to vector<8x64xf32>
    %648 = arith.mulf %647, %644 : vector<8x64xf32>
    %649 = arith.addf %646, %648 : vector<8x64xf32>
    %650 = vector.extract_strided_slice %642 {offsets = [0, 128], sizes = [8, 64], strides = [1, 1]} : vector<8x192xf32> to vector<8x64xf32>
    %651 = math.tanh %649 : vector<8x64xf32>
    %652 = arith.mulf %650, %651 : vector<8x64xf32>
    %653 = arith.truncf %652 : vector<8x64xf32> to vector<8x64xbf16>
    %cst_112 = arith.constant dense<0.000000e+00> : vector<8x256xf32>
    %654 = tpu.matmul %631, %6, %cst_112 {dimension_numbers = #tpu.dot_dimension_numbers<[1], [0], [0], [1], [0, 0, 1, 1], [], []>} : vector<8x64xbf16>, vector<64x256xbf16>, vector<8x256xf32> -> vector<8x256xf32>
    %655 = arith.addf %654, %15 : vector<8x256xf32>
    %656 = arith.truncf %609 : vector<8x64xf32> to vector<8x64xbf16>
    %cst_113 = arith.constant dense<0.000000e+00> : vector<8x256xf32>
    %657 = tpu.matmul %656, %3, %cst_113 {dimension_numbers = #tpu.dot_dimension_numbers<[1], [0], [0], [1], [0, 0, 1, 1], [], []>} : vector<8x64xbf16>, vector<64x256xbf16>, vector<8x256xf32> -> vector<8x256xf32>
    %658 = arith.addf %655, %657 : vector<8x256xf32>
    %659 = vector.extract_strided_slice %658 {offsets = [0, 0], sizes = [8, 192], strides = [1, 1]} : vector<8x256xf32> to vector<8x192xf32>
    %660 = arith.negf %659 : vector<8x192xf32>
    %661 = math.exp %660 : vector<8x192xf32>
    %cst_114 = arith.constant 1.000000e+00 : f32
    %662 = vector.broadcast %cst_114 : f32 to vector<8x192xf32>
    %663 = arith.addf %662, %661 : vector<8x192xf32>
    %664 = arith.divf %662, %663 : vector<8x192xf32>
    %665 = vector.extract_strided_slice %658 {offsets = [0, 192], sizes = [8, 64], strides = [1, 1]} : vector<8x256xf32> to vector<8x64xf32>
    %666 = math.tanh %665 : vector<8x64xf32>
    %667 = vector.extract_strided_slice %664 {offsets = [0, 64], sizes = [8, 64], strides = [1, 1]} : vector<8x192xf32> to vector<8x64xf32>
    %668 = arith.mulf %667, %606 : vector<8x64xf32>
    %669 = vector.extract_strided_slice %664 {offsets = [0, 0], sizes = [8, 64], strides = [1, 1]} : vector<8x192xf32> to vector<8x64xf32>
    %670 = arith.mulf %669, %666 : vector<8x64xf32>
    %671 = arith.addf %668, %670 : vector<8x64xf32>
    %672 = vector.extract_strided_slice %664 {offsets = [0, 128], sizes = [8, 64], strides = [1, 1]} : vector<8x192xf32> to vector<8x64xf32>
    %673 = math.tanh %671 : vector<8x64xf32>
    %674 = arith.mulf %672, %673 : vector<8x64xf32>
    %cst_115 = arith.constant dense<0.000000e+00> : vector<8x256xf32>
    %675 = tpu.matmul %653, %5, %cst_115 {dimension_numbers = #tpu.dot_dimension_numbers<[1], [0], [0], [1], [0, 0, 1, 1], [], []>} : vector<8x64xbf16>, vector<64x256xbf16>, vector<8x256xf32> -> vector<8x256xf32>
    %676 = arith.addf %675, %12 : vector<8x256xf32>
    %677 = arith.truncf %630 : vector<8x64xf32> to vector<8x64xbf16>
    %cst_116 = arith.constant dense<0.000000e+00> : vector<8x256xf32>
    %678 = tpu.matmul %677, %2, %cst_116 {dimension_numbers = #tpu.dot_dimension_numbers<[1], [0], [0], [1], [0, 0, 1, 1], [], []>} : vector<8x64xbf16>, vector<64x256xbf16>, vector<8x256xf32> -> vector<8x256xf32>
    %679 = arith.addf %676, %678 : vector<8x256xf32>
    %680 = vector.extract_strided_slice %679 {offsets = [0, 0], sizes = [8, 192], strides = [1, 1]} : vector<8x256xf32> to vector<8x192xf32>
    %681 = arith.negf %680 : vector<8x192xf32>
    %682 = math.exp %681 : vector<8x192xf32>
    %cst_117 = arith.constant 1.000000e+00 : f32
    %683 = vector.broadcast %cst_117 : f32 to vector<8x192xf32>
    %684 = arith.addf %683, %682 : vector<8x192xf32>
    %685 = arith.divf %683, %684 : vector<8x192xf32>
    %686 = vector.extract_strided_slice %679 {offsets = [0, 192], sizes = [8, 64], strides = [1, 1]} : vector<8x256xf32> to vector<8x64xf32>
    %687 = math.tanh %686 : vector<8x64xf32>
    %688 = vector.extract_strided_slice %685 {offsets = [0, 64], sizes = [8, 64], strides = [1, 1]} : vector<8x192xf32> to vector<8x64xf32>
    %689 = arith.mulf %688, %627 : vector<8x64xf32>
    %690 = vector.extract_strided_slice %685 {offsets = [0, 0], sizes = [8, 64], strides = [1, 1]} : vector<8x192xf32> to vector<8x64xf32>
    %691 = arith.mulf %690, %687 : vector<8x64xf32>
    %692 = arith.addf %689, %691 : vector<8x64xf32>
    %693 = vector.extract_strided_slice %685 {offsets = [0, 128], sizes = [8, 64], strides = [1, 1]} : vector<8x192xf32> to vector<8x64xf32>
    %694 = math.tanh %692 : vector<8x64xf32>
    %695 = arith.mulf %693, %694 : vector<8x64xf32>
    %696 = arith.truncf %695 : vector<8x64xf32> to vector<8x64xbf16>
    %cst_118 = arith.constant dense<0.000000e+00> : vector<8x256xf32>
    %697 = tpu.matmul %696, %6, %cst_118 {dimension_numbers = #tpu.dot_dimension_numbers<[1], [0], [0], [1], [0, 0, 1, 1], [], []>} : vector<8x64xbf16>, vector<64x256xbf16>, vector<8x256xf32> -> vector<8x256xf32>
    %698 = arith.addf %697, %15 : vector<8x256xf32>
    %699 = arith.truncf %674 : vector<8x64xf32> to vector<8x64xbf16>
    %cst_119 = arith.constant dense<0.000000e+00> : vector<8x256xf32>
    %700 = tpu.matmul %699, %3, %cst_119 {dimension_numbers = #tpu.dot_dimension_numbers<[1], [0], [0], [1], [0, 0, 1, 1], [], []>} : vector<8x64xbf16>, vector<64x256xbf16>, vector<8x256xf32> -> vector<8x256xf32>
    %701 = arith.addf %698, %700 : vector<8x256xf32>
    %702 = vector.extract_strided_slice %701 {offsets = [0, 0], sizes = [8, 192], strides = [1, 1]} : vector<8x256xf32> to vector<8x192xf32>
    %703 = arith.negf %702 : vector<8x192xf32>
    %704 = math.exp %703 : vector<8x192xf32>
    %cst_120 = arith.constant 1.000000e+00 : f32
    %705 = vector.broadcast %cst_120 : f32 to vector<8x192xf32>
    %706 = arith.addf %705, %704 : vector<8x192xf32>
    %707 = arith.divf %705, %706 : vector<8x192xf32>
    %708 = vector.extract_strided_slice %701 {offsets = [0, 192], sizes = [8, 64], strides = [1, 1]} : vector<8x256xf32> to vector<8x64xf32>
    %709 = math.tanh %708 : vector<8x64xf32>
    %710 = vector.extract_strided_slice %707 {offsets = [0, 64], sizes = [8, 64], strides = [1, 1]} : vector<8x192xf32> to vector<8x64xf32>
    %711 = arith.mulf %710, %671 : vector<8x64xf32>
    %712 = vector.extract_strided_slice %707 {offsets = [0, 0], sizes = [8, 64], strides = [1, 1]} : vector<8x192xf32> to vector<8x64xf32>
    %713 = arith.mulf %712, %709 : vector<8x64xf32>
    %714 = arith.addf %711, %713 : vector<8x64xf32>
    %715 = vector.extract_strided_slice %707 {offsets = [0, 128], sizes = [8, 64], strides = [1, 1]} : vector<8x192xf32> to vector<8x64xf32>
    %716 = math.tanh %714 : vector<8x64xf32>
    %717 = arith.mulf %715, %716 : vector<8x64xf32>
    %c0_121 = arith.constant 0 : index
    %c0_122 = arith.constant 0 : index
    %718 = vector.load %arg13[%c0_121, %c0_122] : memref<64x32xf32, #tpu.memory_space<vmem>>, vector<64x32xf32>
    %cst_123 = arith.constant dense<0.000000e+00> : vector<8x32xf32>
    %719 = tpu.matmul %717, %718, %cst_123 {dimension_numbers = #tpu.dot_dimension_numbers<[1], [0], [0], [1], [0, 0, 1, 1], [], []>} : vector<8x64xf32>, vector<64x32xf32>, vector<8x32xf32> -> vector<8x32xf32>
    %c0_124 = arith.constant 0 : index
    %c0_125 = arith.constant 0 : index
    %720 = vector.load %arg14[%c0_124, %c0_125] : memref<1x32xf32, #tpu.memory_space<vmem>>, vector<1x32xf32>
    %721 = vector.broadcast %720 : vector<1x32xf32> to vector<8x32xf32>
    %722 = arith.addf %719, %721 : vector<8x32xf32>
    %cst_126 = arith.constant 0.000000e+00 : f32
    %723 = vector.broadcast %cst_126 : f32 to vector<8x32xf32>
    %724 = arith.maximumf %722, %723 : vector<8x32xf32>
    %c0_127 = arith.constant 0 : index
    %c0_128 = arith.constant 0 : index
    %725 = vector.load %arg15[%c0_127, %c0_128] : memref<32x1xf32, #tpu.memory_space<vmem>>, vector<32x1xf32>
    %cst_129 = arith.constant dense<0.000000e+00> : vector<8x1xf32>
    %726 = tpu.matmul %724, %725, %cst_129 {dimension_numbers = #tpu.dot_dimension_numbers<[1], [0], [0], [1], [0, 0, 1, 1], [], []>} : vector<8x32xf32>, vector<32x1xf32>, vector<8x1xf32> -> vector<8x1xf32>
    %c0_130 = arith.constant 0 : index
    %c0_131 = arith.constant 0 : index
    %727 = vector.load %arg16[%c0_130, %c0_131] : memref<1x1xf32, #tpu.memory_space<vmem>>, vector<1x1xf32>
    %728 = vector.broadcast %727 : vector<1x1xf32> to vector<8x1xf32>
    %729 = arith.addf %726, %728 : vector<8x1xf32>
    %c0_132 = arith.constant 0 : index
    %c0_133 = arith.constant 0 : index
    %730 = vector.load %arg17[%c0_132, %c0_133] : memref<8x1xf32, #tpu.memory_space<vmem>>, vector<8x1xf32>
    tpu.vector_store %arg17[%c0_132, %c0_133], %729 {strides = array<i32>} : memref<8x1xf32, #tpu.memory_space<vmem>>, vector<8x1xf32>,
    return
  }
}

</mosaic_0001>

<bundles_post_ra>
// kernel: tpu_custom_call.1
= control target key start
LH: loop header
LB: loop body
LE: loop exit
PB: predicated region body
PF: predicated region fallthrough
CT: control target
= control target key end

     0   :  { %s6636_s0 = inlined_call_operand.vmem [shape: bf16[64,8], index: 0, kind: input, shape index: {}]   ;;  %s6637_s1 = inlined_call_operand.hbm [shape: bf16[8,256], index: 1, kind: input, shape index: {}]   ;;  %s6638_s2 = inlined_call_operand.vmem [shape: bf16[64,256], index: 2, kind: input, shape index: {}]   ;;  %s6639_s3 = inlined_call_operand.vmem [shape: f32[1,256], index: 3, kind: input, shape index: {}]   ;;  %s6640_s4 = inlined_call_operand.vmem [shape: bf16[64,256], index: 4, kind: input, shape index: {}]   ;;  %s6641_s5 = inlined_call_operand.hbm [shape: bf16[64,256], index: 5, kind: input, shape index: {}]   ;;  %s6642_s6 = inlined_call_operand.vmem [shape: f32[1,256], index: 6, kind: input, shape index: {}]   ;;  %s6643_s7 = inlined_call_operand.hbm [shape: bf16[64,256], index: 7, kind: input, shape index: {}]   ;;  %s6644_s8 = inlined_call_operand.hbm [shape: bf16[64,256], index: 8, kind: input, shape index: {}]   ;;  %s6645_s9 = inlined_call_operand.vmem [shape: f32[1,256], index: 9, kind: input, shape index: {}]   ;;  %s6646_s10 = inlined_call_operand.hbm [shape: bf16[64,256], index: 10, kind: input, shape index: {}]   ;;  %s6647_s11 = inlined_call_operand.hbm [shape: bf16[64,256], index: 11, kind: input, shape index: {}]   ;;  %s6648_s12 = inlined_call_operand.vmem [shape: f32[1,256], index: 12, kind: input, shape index: {}]   ;;  %s6649_s13 = inlined_call_operand.vmem [shape: f32[64,32], index: 13, kind: input, shape index: {}]   ;;  %s6650_s14 = inlined_call_operand.vmem [shape: f32[1,32], index: 14, kind: input, shape index: {}]   ;;  %s6651_s15 = inlined_call_operand.vmem [shape: f32[32,1], index: 15, kind: input, shape index: {}]   ;;  %s6652_s16 = inlined_call_operand.<no memory space> [shape: f32[1,1], index: 16, kind: input, shape index: {}]   ;;  %s6653_s17 = inlined_call_operand.vmem [shape: f32[8,1], index: 17, kind: output, shape index: {}]  }
   0x1   :  { %6762 = sst [smem:[#allocation78_spill]] %s6636_s0  ;;  %v22_v0 = vstv %s6652_s16 }
   0x2   :  { %6763 = sst [smem:[#allocation79_spill]] %s6637_s1  ;;  %23 = vst [vmem:[#allocation2] sm:$0x1] %v22_v0 }
   0x3   :  { %24 = vsyncpa [#allocation4], 0 }
   0x4   :  { %25 = vsyncpa [#allocation6], 0 }
   0x5   :  { %26 = vsyncpa [#allocation9], 0  ;;  %s51_s28 = sshll.u32 %s6641_s5, 4  ;;  %s52_s28 = int_to_ptr.hbm [resolvable:$true] %s51_s28 }
   0x6   :  { %27 = vsyncpa [#allocation12], 0  ;;  %s5167_s29 = smov [#allocation5]   ;;  %s79_s19 = sshll.u32 %s6644_s8, 4  ;;  %s80_s19 = int_to_ptr.hbm [resolvable:$true] %s79_s19 }
   0x7   :  { %s53_s0 = sshll.u32 %s5167_s29, 4  ;;  %s5168_s1 = smov 128   ;;  %s54_s0 = int_to_ptr.vmem [resolvable:$true] %s53_s0 }
   0x8   :  { %s5169_s20 = smov 8   ;;  %s5170_s16 = smov [#allocation8]  }
   0x9   :  { %59 = dma.hbm_to_vmem [thread:$0]  %s52_s28, 1024, %s54_s0, [#allocation6], %s5168_s1, %s5168_s1, %s5169_s20  }
   0xa   :  { %s81_s21 = sshll.u32 %s5170_s16, 4  ;;  %s6764_s23 = sld [smem:[#allocation79_spill]]  ;;  %s82_s21 = int_to_ptr.vmem [resolvable:$true] %s81_s21 }
   0xb   :  { %87 = dma.hbm_to_vmem [thread:$0]  %s80_s19, 1024, %s82_s21, [#allocation9], %s5168_s1, %s5168_s1, %s5169_s20  }
   0xc   :  { %s66_s26 = sshll.u32 %s6643_s7, 4  ;;  %s5171_s27 = smov [#allocation3]   ;;  %s67_s26 = int_to_ptr.hbm [resolvable:$true] %s66_s26 }
   0xd   :  { %s37_s29 = sshll.u32 %s5171_s27, 4  ;;  %s5172_s28 = smov [#allocation7]   ;;  %s38_s29 = int_to_ptr.vmem [resolvable:$true] %s37_s29 }
   0xe   :  { %s68_s0 = sshll.u32 %s5172_s28, 4  ;;  %s94_s16 = sshll.u32 %s6646_s10, 4  ;;  %s69_s0 = int_to_ptr.vmem [resolvable:$true] %s68_s0  ;;  %s95_s16 = int_to_ptr.hbm [resolvable:$true] %s94_s16 }
   0xf   :  { %74 = dma.hbm_to_vmem [thread:$0]  %s67_s26, 1024, %s69_s0, [#allocation6], %s5168_s1, %s5168_s1, %s5169_s20  }
  0x10   :  { %s35_s24 = sshll.u32 %s6764_s23, 4  ;;  %s107_s7 = sshll.u32 %s6647_s11, 4  ;;  %s36_s24 = int_to_ptr.hbm [resolvable:$true] %s35_s24  ;;  %s108_s7 = int_to_ptr.hbm [resolvable:$true] %s107_s7 }
  0x11   :  { %40 = dma.hbm_to_vmem [thread:$0]  %s36_s24, 128, %s38_s29, [#allocation4]  }
  0x12   :  { %s5173_s22 = smov [#allocation10]   ;;  %s5174_s23 = smov [#allocation11]  }
  0x13   :  { %s96_s5 = sshll.u32 %s5173_s22, 4  ;;  %s109_s10 = sshll.u32 %s5174_s23, 4  ;;  %s97_s5 = int_to_ptr.vmem [resolvable:$true] %s96_s5  ;;  %s110_s10 = int_to_ptr.vmem [resolvable:$true] %s109_s10 }
  0x14   :  { %102 = dma.hbm_to_vmem [thread:$0]  %s95_s16, 1024, %s97_s5, [#allocation9], %s5168_s1, %s5168_s1, %s5169_s20  }
  0x15   :  { %115 = dma.hbm_to_vmem [thread:$0]  %s108_s7, 1024, %s110_s10, [#allocation12], %s5168_s1, %s5168_s1, %s5169_s20  }
  0x16   :  { %5159 = dma.done.wait [#allocation4], 128  }
  0x17   :  { %5160 = vsyncadd [#allocation4], 4294967168 }
  0x18   :  { %5161 = dma.done.wait [#allocation6], 2048  }
  0x19   :  { %5162 = vsyncadd [#allocation6], 4294965248 }
  0x1a   :  { %5163 = dma.done.wait [#allocation9], 2048  }
  0x1b   :  { %5164 = vsyncadd [#allocation9], 4294965248 }
  0x1c   :  { %5165 = dma.done.wait [#allocation12], 1024  }
  0x1d   :  { %5166 = vsyncadd [#allocation12], 4294966272  ;;  %v4565_v1 = vld [vmem:[%s6638_s2 + $0x34] sm:$0xf]  ;;  %v4193_v2 = vld [vmem:[%s6638_s2 + $0x38] sm:$0xf0] }
  0x1e   :  { %v4563_v3 = vld [vmem:[%s6638_s2 + $0x24] sm:$0xf]  ;;  %v5312_v4 = vor.u32 %v4565_v1, %v4193_v2  ;;  %v4185_v5 = vld [vmem:[%s6638_s2 + $0x28] sm:$0xf0]  ;;  %vm278_vm0 = vcmask 1043456   ;;  %s6765_s24 = sld [smem:[#allocation78_spill]] }
  0x1f   :  { %v233_v6 = vld [vmem:[#allocation3] sm:$0xff]  ;;  %v5318_v9 = vor.u32 %v4563_v3, %v4185_v5  ;;  %v4561_v10 = vld [vmem:[%s6638_s2 + $0x14] sm:$0xf]  ;;  %v4191_v11 = vld [vmem:[%s6638_s2 + $0x30] sm:$0xf]  ;;  %vm265_vm1 = vcmask 64512  }
  0x20   :  { %v262_v7 = vunpack.c.h.b16 %v233_v6  ;;  %v261_v8 = vunpack.c.l.b16 %v233_v6  ;;  %404 = vmatpush.bf16.msra.mxu3 %v5312_v4  ;;  %v4566_v12 = vld [vmem:[%s6638_s2 + $0x34] sm:$0xf0]  ;;  %v4177_v14 = vld [vmem:[%s6638_s2 + $0x18] sm:$0xf0]  ;;  %v4183_v16 = vld [vmem:[%s6638_s2 + $0x20] sm:$0xf] }
  0x21   :  { %v5332_v15 = vor.u32 %v4566_v12, %v4191_v11  ;;  %v4564_v17 = vld [vmem:[%s6638_s2 + $0x24] sm:$0xf0]  ;;  %v5349_v23 = vor.u32 %v4561_v10, %v4177_v14  ;;  %v4175_v24 = vld [vmem:[%s6638_s2 + $0x10] sm:$0xf]  ;;  %v4562_v25 = vld [vmem:[%s6638_s2 + $0x14] sm:$0xf0] }
  0x22   :  { %v264_v13 = vpack.c.b16 %v262_v7, %v262_v7  ;;  %v263_v18 = vpack.c.b16 %v261_v8, %v261_v8  ;;  %v5345_v21 = vor.u32 %v4564_v17, %v4183_v16  ;;  %v4559_v26 = vld [vmem:[%s6638_s2 + $0x4] sm:$0xf]  ;;  %v4169_v27 = vld [vmem:[%s6638_s2 + $0x8] sm:$0xf0]  ;;  %v5365_v28 = vor.u32 %v4562_v25, %v4175_v24  ;;  %v4167_v30 = vld [vmem:[%s6638_s2] sm:$0xf] }
  0x23   :  { %391 = vmatpush.bf16.msra.mxu2 %v5332_v15  ;;  %6766 = vst [vmem:[#allocation17_spill] sm:$0xff] %v5349_v23  ;;  %v5368_v29 = vor.u32 %v4559_v26, %v4169_v27  ;;  %v4560_v31 = vld [vmem:[%s6638_s2 + $0x4] sm:$0xf0]  ;;  %v6655_v33 = vmov 0   ;;  %v234_v34 = vld [vmem:[%s6639_s3] sm:$0x3] }
  0x24   :  { %v283_v19 = vsel %vm278_vm0, %v264_v13, 0  ;;  %v4615_v20 = vld [vmem:[%s6765_s24] sm:$0xff]  ;;  %v280_v22 = vsel %vm278_vm0, %v263_v18, 0  ;;  %405 = vmatpush.bf16.msra.mxu3 %v5318_v9  ;;  %6767 = vst [vmem:[#allocation18_spill] sm:$0xff] %v5365_v28  ;;  %v5378_v32 = vor.u32 %v4560_v31, %v4167_v30  ;;  %v5387_v35 = vperm.slane %v234_v34, 1  ;;  %s5176_s2 = smov 64  }
  0x25   :  { %321 = vmatpush.bf16.msra.mxu1 %v283_v19  ;;  %292 = vmatpush.bf16.msra.mxu0 %v280_v22  ;;  %6768 = vst [vmem:[#allocation19_spill] sm:$0xff] %v5368_v29  ;;  %v5394_v44 = vperm.slane %v234_v34, 0  ;;  %v4597_v63 = vld [vmem:[%s6640_s4 + $0x34] sm:$0xf]  ;;  %v4227_v0 = vld [vmem:[%s6640_s4 + $0x38] sm:$0xf0] }
  0x26   :  { %6769 = vst [vmem:[#allocation20_spill] sm:$0xff] %v5378_v32  ;;  %v4225_v1 = vld [vmem:[%s6640_s4 + $0x30] sm:$0xf]  ;;  %v5407_v2 = vor.u32 %v4597_v63, %v4227_v0  ;;  %v4598_v3 = vld [vmem:[%s6640_s4 + $0x34] sm:$0xf0]  ;;  %vm383_vm10 = vcmask 523264  }
  0x27   :  { %392 = vmatpush.bf16.msra.mxu2 %v5345_v21  ;;  %6770 = vst [vmem:[#allocation21_spill] sm:$0xff] %v5387_v35  ;;  %v4595_v5 = vld [vmem:[%s6640_s4 + $0x24] sm:$0xf]  ;;  %v4219_v6 = vld [vmem:[%s6640_s4 + $0x28] sm:$0xf0]  ;;  %v5418_v7 = vor.u32 %v4598_v3, %v4225_v1 }
  0x28   :  { %4161 = vmatmul.msk.bf16.vlgmr.msra.gmra.mxu1 %vm265_vm1, %v4615_v20  ;;  %406 = vmatpush.bf16.msra.mxu3 %v5349_v23  ;;  %6771 = vst [vmem:[#allocation22_spill] sm:$0xff] %v5394_v44  ;;  %v4217_v8 = vld [vmem:[%s6640_s4 + $0x20] sm:$0xf]  ;;  %v4596_v10 = vld [vmem:[%s6640_s4 + $0x24] sm:$0xf0]  ;;  %v5427_v11 = vor.u32 %v4595_v5, %v4219_v6 }
  0x29   :  { %4157 = vmatmul.msk.bf16.vlgmr.msra.gmra.mxu0 %vm265_vm1, %v4615_v20  ;;  %v5430_v12 = vor.u32 %v4596_v10, %v4217_v8  ;;  %v4593_v13 = vld [vmem:[%s6640_s4 + $0x14] sm:$0xf]  ;;  %v4211_v14 = vld [vmem:[%s6640_s4 + $0x18] sm:$0xf0]  ;;  %v4209_v16 = vld [vmem:[%s6640_s4 + $0x10] sm:$0xf] }
  0x2a   :  { %v4594_v17 = vld [vmem:[%s6640_s4 + $0x14] sm:$0xf0]  ;;  %v5445_v18 = vor.u32 %v4593_v13, %v4211_v14  ;;  %v4591_v30 = vld [vmem:[%s6640_s4 + $0x4] sm:$0xf]  ;;  %v4203_v31 = vld [vmem:[%s6640_s4 + $0x8] sm:$0xf0] }
  0x2b   :  { %393 = vmatpush.bf16.msra.mxu2 %v5365_v28  ;;  %v5448_v19 = vor.u32 %v4594_v17, %v4209_v16  ;;  %v4201_v34 = vld [vmem:[%s6640_s4] sm:$0xf]  ;;  %v4568_v63 = vld [vmem:[#allocation5 + $0x4] sm:$0xf0] }
  0x2c   :  { %407 = vmatpush.bf16.msra.mxu3 %v5368_v29 }
  0x2f   :  { %408 = vmatmul.bf16.vlgmr.msra.gmra.mxu3 %v6655_v33  ;;  %394 = vmatpush.bf16.msra.mxu2 %v5378_v32 }
  0x30   :  { %532 = vmatpush.bf16.msrb.mxu3 %v5407_v2 }
  0x32   :  { %395 = vmatmul.bf16.vlgmr.msra.gmra.mxu2 %v6655_v33 }
  0x33   :  { %519 = vmatpush.bf16.msrb.mxu2 %v5418_v7 }
  0x34   :  { %533 = vmatpush.bf16.msrb.mxu3 %v5427_v11 }
  0x37   :  { %520 = vmatpush.bf16.msrb.mxu2 %v5430_v12 }
  0x38   :  { %534 = vmatpush.bf16.msrb.mxu3 %v5445_v18 }
  0x3b   :  { %521 = vmatpush.bf16.msrb.mxu2 %v5448_v19 }
  0xa5   :  { %v323_v36 = vpop.f32.mrf.mxu1 }
  0xa6   :  { %v324_v37 = vadd.f32 %v323_v36, %v5387_v35  ;;  %v294_v45 = vpop.f32.mrf.mxu0 }
  0xa7   :  { %v295_v46 = vadd.f32 %v294_v45, %v5394_v44  ;;  %v4574_v45 = vld [vmem:[#allocation5 + $0x34] sm:$0xf0] }
  0xb2   :  { %v409_v38 = vpop.f32.mrf.mxu3 }
  0xb3   :  { %v5390_v39 = vadd.f32 %v409_v38, %v324_v37  ;;  %v5466_v37 = vor.u32 %v4591_v30, %v4203_v31  ;;  %v4592_v38 = vld [vmem:[%s6640_s4 + $0x4] sm:$0xf0]  ;;  %v207_v30 = vld [vmem:[%s6642_s6] sm:$0x3] }
  0xb5   :  { %4631 = vtanh.f32 %v5390_v39  ;;  %v396_v40 = vpop.f32.mrf.mxu2  ;;  %v4198_v26 = vmul.f32 -1.442695, %v5390_v39  ;;  %v5471_v39 = vor.u32 %v4592_v38, %v4201_v34  ;;  %535 = vmatpush.bf16.msrb.mxu3 %v5466_v37  ;;  %v5518_v38 = vperm.slane %v207_v30, 1 }
  0xb6   :  { %v413_v47 = vadd.f32 %v396_v40, %v295_v46  ;;  %v4573_v40 = vld [vmem:[#allocation5 + $0x34] sm:$0xf] }
  0xb7   :  { %522 = vmatpush.bf16.msrb.mxu2 %v5471_v39  ;;  %6781 = vst [vmem:[#allocation32_spill] sm:$0xff] %v5518_v38 }
  0xb8   :  { %v4197_v48 = vmul.f32 -1.442695, %v413_v47  ;;  %v4571_v47 = vld [vmem:[#allocation5 + $0x24] sm:$0xf] }
  0xba   :  { %v411_v41 = vpop.f32.mrf.mxu3  ;;  %4633 = vpow2.f32 %v4197_v48  ;;  %v4253_v48 = vld [vmem:[#allocation5 + $0x28] sm:$0xf0] }
  0xbb   :  { %v4632_v42 = vpop.eup %4631  ;;  %v4261_v41 = vld [vmem:[#allocation5 + $0x38] sm:$0xf0] }
  0xbc   :  { %456 = vrot.lane.b32.xlu0 %v4632_v42, %s5176_s2  ;;  %v5475_v42 = vor.u32 %v4573_v40, %v4261_v41 }
  0xbd   :  { %v398_v43 = vpop.f32.mrf.mxu2 }
  0xbe   :  { %6772 = vst [vmem:[#allocation23_spill] sm:$0xff] %v5475_v42  ;;  %v4259_v43 = vld [vmem:[#allocation5 + $0x30] sm:$0xf]  ;;  %598 = vmatpush.bf16.msra.mxu3 %v5475_v42 }
  0xbf   :  { %v5477_v46 = vor.u32 %v4574_v45, %v4259_v43 }
  0xc0   :  { %v4634_v49 = vpop.eup %4633 }
  0xc1   :  { %v421_v50 = vadd.f32 1.0, %v4634_v49  ;;  %6773 = vst [vmem:[#allocation24_spill] sm:$0xff] %v5477_v46  ;;  %v4251_v49 = vld [vmem:[#allocation5 + $0x20] sm:$0xf]  ;;  %585 = vmatpush.bf16.msra.mxu2 %v5477_v46 }
  0xc3   :  { %4635 = vrcp.f32 %v421_v50  ;;  %vm428_vm2 = vweird.f32 %v421_v50  ;;  %v434_v55 = vand.u32 2147483648, %v421_v50  ;;  %v432_v57 = vand.u32 2147483647, %v421_v50 }
  0xc5   :  { %v435_v58 = vor.u32 1.1754944e-38, %v434_v55  ;;  %vm433_vm5 = vcmp.eq.f32.partialorder %v432_v57, 8.507059e+37  ;;  %v4243_v55 = vld [vmem:[#allocation5 + $0x10] sm:$0xf] }
  0xc9   :  { %v4636_v51 = vpop.eup %4635 }
  0xca   :  { %v424_v52 = vmul.f32 %v4636_v51, %v421_v50  ;;  %vm429_vm3 = vweird.f32 %v4636_v51  ;;  %v5480_v50 = vor.u32 %v4571_v47, %v4253_v48 }
  0xcb   :  { %vm430_vm4 = vmor %vm428_vm2, %vm429_vm3 }
  0xcc   :  { %v425_v53 = vsub.f32 1.0, %v424_v52  ;;  %6774 = vst [vmem:[#allocation25_spill] sm:$0xff] %v5480_v50  ;;  %599 = vmatpush.bf16.msra.mxu3 %v5480_v50 }
  0xce   :  { %v426_v54 = vmul.f32 %v4636_v51, %v425_v53  ;;  %v4569_v53 = vld [vmem:[#allocation5 + $0x14] sm:$0xf] }
  0xd0   :  { %v427_v56 = vadd.f32 %v4636_v51, %v426_v54  ;;  %v4245_v54 = vld [vmem:[#allocation5 + $0x18] sm:$0xf0] }
  0xd2   :  { %v431_v59 = vsel %vm430_vm4, %v4636_v51, %v427_v56  ;;  %v4572_v51 = vld [vmem:[#allocation5 + $0x24] sm:$0xf0]  ;;  %v4570_v56 = vld [vmem:[#allocation5 + $0x14] sm:$0xf0] }
  0xd3   :  { %v436_v60 = vsel %vm433_vm5, %v435_v58, %v431_v59  ;;  %v5483_v52 = vor.u32 %v4572_v51, %v4251_v49  ;;  %v5486_v58 = vor.u32 %v4569_v53, %v4245_v54  ;;  %v5489_v59 = vor.u32 %v4570_v56, %v4243_v55  ;;  %v325_v54 = vpop.f32.mrf.mxu1 }
  0xd4   :  { %v454_v20 = vmul.f32 0.0, %v436_v60  ;;  %v326_v55 = vadd.f32 %v325_v54, %v5387_v35 }
  0xd5   :  { %6775 = vst [vmem:[#allocation26_spill] sm:$0xff] %v5483_v52  ;;  %586 = vmatpush.bf16.msra.mxu2 %v5483_v52  ;;  %600 = vmatpush.bf16.msra.mxu3 %v5486_v58 }
  0xd6   :  { %6776 = vst [vmem:[#allocation27_spill] sm:$0xff] %v5486_v58 }
  0xd7   :  { %6777 = vst [vmem:[#allocation28_spill] sm:$0xff] %v5489_v59 }
  0xd9   :  { %587 = vmatpush.bf16.msra.mxu2 %v5489_v59 }
 0x12e   :  { %v457_v61 = vpop.permute.xlu0 %456 }
 0x12f   :  { %v459_v62 = vmul.f32 %v457_v61, %v436_v60  ;;  %v4567_v60 = vld [vmem:[#allocation5 + $0x4] sm:$0xf]  ;;  %v4237_v61 = vld [vmem:[#allocation5 + $0x8] sm:$0xf0] }
 0x130   :  { %v5492_v1 = vor.u32 %v4567_v60, %v4237_v61 }
 0x131   :  { %461 = vrot.lane.b32.xlu0 %v459_v62, %s5176_s2  ;;  %v4235_v62 = vld [vmem:[#allocation5] sm:$0xf] }
 0x132   :  { %6778 = vst [vmem:[#allocation29_spill] sm:$0xff] %v5492_v1  ;;  %v5495_v3 = vor.u32 %v4568_v63, %v4235_v62  ;;  %601 = vmatpush.bf16.msra.mxu3 %v5492_v1 }
 0x134   :  { %6779 = vst [vmem:[#allocation30_spill] sm:$0xff] %v5495_v3  ;;  %588 = vmatpush.bf16.msra.mxu2 %v5495_v3 }
 0x1a3   :  { %v462_v22 = vpop.permute.xlu0 %461 }
 0x1a4   :  { %v5452_v24 = vadd.f32 %v462_v22, %v454_v20 }
 0x1a6   :  { %4637 = vtanh.f32 %v5452_v24 }
 0x1a7   :  { %4639 = vpow2.f32 %v4198_v26 }
 0x1ac   :  { %v4638_v25 = vpop.eup %4637 }
 0x1ad   :  { %467 = vrot.lane.b32.xlu1 %v4638_v25, %s5176_s2  ;;  %v4640_v27 = vpop.eup %4639 }
 0x1ae   :  { %v422_v36 = vadd.f32 1.0, %v4640_v27 }
 0x1b0   :  { %4641 = vrcp.f32 %v422_v36  ;;  %v449_v10 = vand.u32 2147483648, %v422_v36  ;;  %vm443_vm7 = vweird.f32 %v422_v36  ;;  %v447_v13 = vand.u32 2147483647, %v422_v36 }
 0x1b2   :  { %v450_v16 = vor.u32 1.1754944e-38, %v449_v10  ;;  %vm448_vm9 = vcmp.eq.f32.partialorder %v447_v13, 8.507059e+37 }
 0x1b6   :  { %v4642_v57 = vpop.eup %4641 }
 0x1b7   :  { %v439_v0 = vmul.f32 %v4642_v57, %v422_v36  ;;  %vm444_vm6 = vweird.f32 %v4642_v57  ;;  %v5516_v36 = vperm.slane %v207_v30, 0 }
 0x1b8   :  { %vm445_vm8 = vmor %vm443_vm7, %vm444_vm6 }
 0x1b9   :  { %v440_v5 = vsub.f32 1.0, %v439_v0  ;;  %6780 = vst [vmem:[#allocation31_spill] sm:$0xff] %v5516_v36  ;;  %v296_v0 = vpop.f32.mrf.mxu0 }
 0x1bb   :  { %v441_v6 = vmul.f32 %v4642_v57, %v440_v5  ;;  %v297_v5 = vadd.f32 %v296_v0, %v5394_v44 }
 0x1bd   :  { %v442_v8 = vadd.f32 %v4642_v57, %v441_v6 }
 0x1bf   :  { %v446_v14 = vsel %vm445_vm8, %v4642_v57, %v442_v8 }
 0x1c0   :  { %v451_v20 = vsel %vm448_vm9, %v450_v16, %v446_v14 }
 0x21f   :  { %v468_v17 = vpop.permute.xlu1 %467 }
 0x220   :  { %v470_v22 = vmul.f32 %v468_v17, %v451_v20 }
 0x222   :  { %v471_v25 = vpack.c.bf16 %v470_v22, %v470_v22 }
 0x224   :  { %4231 = vmatmul.msk.bf16.vlgmr.msrb.gmra.mxu2 %vm383_vm10, %v471_v25  ;;  %4232 = vmatmul.msk.bf16.vlgmr.msrb.gmra.mxu3 %vm383_vm10, %v471_v25 }
 0x225   :  { %670 = vmatpush.bf16.msrb.mxu2 %v5332_v15  ;;  %683 = vmatpush.bf16.msrb.mxu3 %v5312_v4 }
 0x229   :  { %671 = vmatpush.bf16.msrb.mxu2 %v5345_v21  ;;  %684 = vmatpush.bf16.msrb.mxu3 %v5318_v9 }
 0x22d   :  { %672 = vmatpush.bf16.msrb.mxu2 %v5365_v28  ;;  %685 = vmatpush.bf16.msrb.mxu3 %v5349_v23 }
 0x231   :  { %673 = vmatpush.bf16.msrb.mxu2 %v5378_v32  ;;  %686 = vmatpush.bf16.msrb.mxu3 %v5368_v29 }
 0x234   :  { %589 = vmatmul.bf16.vlgmr.msra.gmra.mxu2 %v6655_v33  ;;  %602 = vmatmul.bf16.vlgmr.msra.gmra.mxu3 %v6655_v33 }
 0x244   :  { %4267 = vmatmul.msk.bf16.vlgmr.msrb.gmra.mxu2 %vm383_vm10, %v471_v25  ;;  %4268 = vmatmul.msk.bf16.vlgmr.msrb.gmra.mxu3 %vm383_vm10, %v471_v25 }
 0x2a7   :  { %v524_v26 = vpop.f32.mrf.mxu2  ;;  %v537_v27 = vpop.f32.mrf.mxu3 }
 0x2a8   :  { %v525_v40 = vadd.f32 %v524_v26, %v5516_v36  ;;  %v538_v41 = vadd.f32 %v537_v27, %v5518_v38 }
 0x2af   :  { %v526_v31 = vpop.f32.mrf.mxu2  ;;  %v539_v34 = vpop.f32.mrf.mxu3 }
 0x2b7   :  { %v590_v43 = vpop.f32.mrf.mxu2  ;;  %v603_v45 = vpop.f32.mrf.mxu3 }
 0x2b8   :  { %v607_v47 = vadd.f32 %v590_v43, %v525_v40  ;;  %v5522_v48 = vadd.f32 %v603_v45, %v538_v41 }
 0x2ba   :  { %4643 = vtanh.f32 %v5522_v48  ;;  %v4265_v10 = vmul.f32 -1.442695, %v607_v47 }
 0x2bf   :  { %v592_v49 = vpop.f32.mrf.mxu2  ;;  %v605_v51 = vpop.f32.mrf.mxu3 }
 0x2c0   :  { %v4644_v53 = vpop.eup %4643 }
 0x2c1   :  { %650 = vrot.lane.b32.xlu1 %v4644_v53, %s5176_s2 }
 0x2c7   :  { %v675_v56 = vpop.f32.mrf.mxu2  ;;  %v688_v57 = vpop.f32.mrf.mxu3 }
 0x2c8   :  { %v5527_v60 = vadd.f32 %v688_v57, %v326_v55  ;;  %v692_v6 = vadd.f32 %v675_v56, %v297_v5  ;;  %v4605_v5 = vld [vmem:[#allocation7 + $0x34] sm:$0xf] }
 0x2ca   :  { %4645 = vtanh.f32 %v5527_v60  ;;  %v4269_v8 = vmul.f32 -1.442695, %v692_v6  ;;  %v4299_v6 = vld [vmem:[#allocation7 + $0x38] sm:$0xf0] }
 0x2cc   :  { %4647 = vpow2.f32 %v4269_v8  ;;  %v4616_v8 = vld [vmem:[%s6765_s24 + $0x8] sm:$0xff] }
 0x2cd   :  { %4649 = vpow2.f32 %v4265_v10  ;;  %v5540_v10 = vor.u32 %v4605_v5, %v4299_v6  ;;  %4162 = vmatmul.msk.bf16.gmra.mxu1 %vm265_vm1, %v4616_v8  ;;  %4158 = vmatmul.msk.bf16.gmra.mxu0 %vm265_vm1, %v4616_v8  ;;  %v4297_v5 = vld [vmem:[#allocation7 + $0x30] sm:$0xf]  ;;  %v4606_v6 = vld [vmem:[#allocation7 + $0x34] sm:$0xf0] }
 0x2cf   :  { %v677_v61 = vpop.f32.mrf.mxu2  ;;  %v690_v62 = vpop.f32.mrf.mxu3  ;;  %6782 = vst [vmem:[#allocation33_spill] sm:$0xff] %v5540_v10  ;;  %811 = vmatpush.bf16.msrb.mxu1 %v5540_v10 }
 0x2d0   :  { %v4646_v63 = vpop.eup %4645 }
 0x2d1   :  { %735 = vrot.lane.b32.xlu2 %v4646_v63, %s5176_s2 }
 0x2d2   :  { %v4648_v13 = vpop.eup %4647 }
 0x2d3   :  { %v700_v14 = vadd.f32 1.0, %v4648_v13  ;;  %v4650_v16 = vpop.eup %4649  ;;  %v4603_v13 = vld [vmem:[#allocation7 + $0x24] sm:$0xf] }
 0x2d4   :  { %v615_v17 = vadd.f32 1.0, %v4650_v16  ;;  %v4601_v16 = vld [vmem:[#allocation7 + $0x14] sm:$0xf] }
 0x2d5   :  { %4651 = vrcp.f32 %v700_v14  ;;  %v713_v40 = vand.u32 2147483648, %v700_v14  ;;  %vm707_vm12 = vweird.f32 %v700_v14  ;;  %v711_v41 = vand.u32 2147483647, %v700_v14 }
 0x2d6   :  { %4653 = vrcp.f32 %v615_v17  ;;  %v628_v55 = vand.u32 2147483648, %v615_v17  ;;  %vm622_vm0 = vweird.f32 %v615_v17  ;;  %v626_v56 = vand.u32 2147483647, %v615_v17 }
 0x2d7   :  { %v714_v47 = vor.u32 1.1754944e-38, %v713_v40  ;;  %vm712_vm14 = vcmp.eq.f32.partialorder %v711_v41, 8.507059e+37  ;;  %v4580_v40 = vld [vmem:[#allocation8 + $0x24] sm:$0xf0]  ;;  %v4579_v41 = vld [vmem:[#allocation8 + $0x24] sm:$0xf] }
 0x2d8   :  { %v629_v61 = vor.u32 1.1754944e-38, %v628_v55  ;;  %vm627_vm3 = vcmp.eq.f32.partialorder %v626_v56, 8.507059e+37 }
 0x2db   :  { %v4652_v20 = vpop.eup %4651 }
 0x2dc   :  { %v703_v22 = vmul.f32 %v4652_v20, %v700_v14  ;;  %v4654_v26 = vpop.eup %4653  ;;  %vm708_vm11 = vweird.f32 %v4652_v20  ;;  %v4291_v14 = vld [vmem:[#allocation7 + $0x28] sm:$0xf0] }
 0x2dd   :  { %v618_v30 = vmul.f32 %v4654_v26, %v615_v17  ;;  %vm709_vm13 = vmor %vm707_vm12, %vm708_vm11  ;;  %vm623_vm15 = vweird.f32 %v4654_v26  ;;  %v4283_v17 = vld [vmem:[#allocation7 + $0x18] sm:$0xf0] }
 0x2de   :  { %v704_v25 = vsub.f32 1.0, %v703_v22  ;;  %vm624_vm2 = vmor %vm622_vm0, %vm623_vm15  ;;  %v5545_v22 = vor.u32 %v4603_v13, %v4291_v14  ;;  %v5560_v56 = vor.u32 %v4601_v16, %v4283_v17  ;;  %v5569_v14 = vor.u32 %v4606_v6, %v4297_v5  ;;  %v4307_v16 = vld [vmem:[#allocation8] sm:$0xf] }
 0x2df   :  { %v619_v34 = vsub.f32 1.0, %v618_v30 }
 0x2e0   :  { %v705_v27 = vmul.f32 %v4652_v20, %v704_v25  ;;  %6783 = vst [vmem:[#allocation34_spill] sm:$0xff] %v5545_v22  ;;  %v4582_v25 = vld [vmem:[#allocation8 + $0x34] sm:$0xf0]  ;;  %812 = vmatpush.bf16.msrb.mxu1 %v5545_v22  ;;  %798 = vmatpush.bf16.msrb.mxu0 %v5569_v14 }
 0x2e1   :  { %v620_v45 = vmul.f32 %v4654_v26, %v619_v34  ;;  %v4323_v34 = vld [vmem:[#allocation8 + $0x20] sm:$0xf]  ;;  %6788 = vst [vmem:[#allocation39_spill] sm:$0xff] %v5560_v56 }
 0x2e2   :  { %v706_v31 = vadd.f32 %v4652_v20, %v705_v27  ;;  %v4333_v27 = vld [vmem:[#allocation8 + $0x38] sm:$0xf0]  ;;  %6791 = vst [vmem:[#allocation42_spill] sm:$0xff] %v5569_v14 }
 0x2e3   :  { %v621_v54 = vadd.f32 %v4654_v26, %v620_v45  ;;  %v4325_v45 = vld [vmem:[#allocation8 + $0x28] sm:$0xf0] }
 0x2e4   :  { %v710_v43 = vsel %vm709_vm13, %v4652_v20, %v706_v31  ;;  %v4331_v20 = vld [vmem:[#allocation8 + $0x30] sm:$0xf]  ;;  %813 = vmatpush.bf16.msrb.mxu1 %v5560_v56 }
 0x2e5   :  { %v5532_v49 = vsel %vm712_vm14, %v714_v47, %v710_v43  ;;  %v625_v57 = vsel %vm624_vm2, %v4654_v26, %v621_v54  ;;  %v4581_v26 = vld [vmem:[#allocation8 + $0x34] sm:$0xf]  ;;  %v5547_v30 = vor.u32 %v4582_v25, %v4331_v20  ;;  %v4315_v54 = vld [vmem:[#allocation8 + $0x10] sm:$0xf]  ;;  %v4576_v20 = vld [vmem:[#allocation8 + $0x4] sm:$0xf0] }
 0x2e6   :  { %v630_v62 = vsel %vm627_vm3, %v629_v61, %v625_v57  ;;  %v5549_v31 = vor.u32 %v4581_v26, %v4333_v27  ;;  %v4578_v57 = vld [vmem:[#allocation8 + $0x14] sm:$0xf0]  ;;  %v4577_v61 = vld [vmem:[#allocation8 + $0x14] sm:$0xf]  ;;  %v4575_v25 = vld [vmem:[#allocation8 + $0x4] sm:$0xf] }
 0x2e7   :  { %6784 = vst [vmem:[#allocation35_spill] sm:$0xff] %v5547_v30  ;;  %v648_v43 = vmul.f32 0.0, %v630_v62  ;;  %864 = vmatpush.bf16.msra.mxu2 %v5547_v30  ;;  %v5565_v8 = vor.u32 %v4578_v57, %v4315_v54  ;;  %v4309_v26 = vld [vmem:[#allocation8 + $0x8] sm:$0xf0]  ;;  %v4266_v54 = vmul.f32 -1.442695, %v5522_v48 }
 0x2e8   :  { %6785 = vst [vmem:[#allocation36_spill] sm:$0xff] %v5549_v31  ;;  %877 = vmatpush.bf16.msra.mxu3 %v5549_v31  ;;  %v4617_v27 = vld [vmem:[%s6765_s24 + $0x10] sm:$0xff]  ;;  %v4289_v57 = vld [vmem:[#allocation7 + $0x20] sm:$0xf] }
 0x2e9   :  { %6789 = vst [vmem:[#allocation40_spill] sm:$0xff] %v5565_v8  ;;  %4163 = vmatmul.msk.bf16.gmra.mxu1 %vm265_vm1, %v4617_v27  ;;  %4159 = vmatmul.msk.bf16.gmra.mxu0 %vm265_vm1, %v4617_v27 }
 0x32b   :  { %v736_v51 = vpop.permute.xlu2 %735 }
 0x32c   :  { %v738_v53 = vmul.f32 %v736_v51, %v5532_v49  ;;  %v5553_v51 = vor.u32 %v4580_v40, %v4323_v34  ;;  %v5580_v40 = vor.u32 %v4576_v20, %v4307_v16  ;;  %v4270_v20 = vmul.f32 -1.442695, %v5527_v60 }
 0x32e   :  { %740 = vrot.lane.b32.xlu0 %v738_v53, %s5176_s2  ;;  %6786 = vst [vmem:[#allocation37_spill] sm:$0xff] %v5553_v51  ;;  %v5555_v53 = vor.u32 %v4579_v41, %v4325_v45  ;;  %865 = vmatpush.bf16.msra.mxu2 %v5553_v51  ;;  %v5582_v41 = vor.u32 %v4575_v25, %v4309_v26  ;;  %v4273_v25 = vld [vmem:[#allocation7] sm:$0xf]  ;;  %v4600_v26 = vld [vmem:[#allocation7 + $0x4] sm:$0xf0] }
 0x32f   :  { %6793 = vst [vmem:[#allocation44_spill] sm:$0xff] %v5580_v40  ;;  %v5623_v48 = vor.u32 %v4600_v26, %v4273_v25 }
 0x330   :  { %6787 = vst [vmem:[#allocation38_spill] sm:$0xff] %v5555_v53  ;;  %878 = vmatpush.bf16.msra.mxu3 %v5555_v53 }
 0x331   :  { %6794 = vst [vmem:[#allocation45_spill] sm:$0xff] %v5582_v41 }
 0x332   :  { %866 = vmatpush.bf16.msra.mxu2 %v5565_v8  ;;  %6797 = vst [vmem:[#allocation48_spill] sm:$0xff] %v5623_v48 }
 0x333   :  { %v651_v63 = vpop.permute.xlu1 %650 }
 0x334   :  { %v653_v0 = vmul.f32 %v651_v63, %v630_v62  ;;  %v4317_v62 = vld [vmem:[#allocation8 + $0x18] sm:$0xf0]  ;;  %v4599_v63 = vld [vmem:[#allocation7 + $0x4] sm:$0xf] }
 0x335   :  { %v5567_v13 = vor.u32 %v4577_v61, %v4317_v62  ;;  %v4604_v61 = vld [vmem:[#allocation7 + $0x24] sm:$0xf0] }
 0x336   :  { %655 = vrot.lane.b32.xlu2 %v653_v0, %s5176_s2  ;;  %v4275_v0 = vld [vmem:[#allocation7 + $0x8] sm:$0xf0]  ;;  %867 = vmatpush.bf16.msra.mxu2 %v5580_v40  ;;  %v5616_v62 = vor.u32 %v4604_v61, %v4289_v57 }
 0x337   :  { %6790 = vst [vmem:[#allocation41_spill] sm:$0xff] %v5567_v13  ;;  %v5572_v17 = vor.u32 %v4599_v63, %v4275_v0  ;;  %879 = vmatpush.bf16.msra.mxu3 %v5567_v13  ;;  %v4281_v63 = vld [vmem:[#allocation7 + $0x10] sm:$0xf]  ;;  %v4602_v0 = vld [vmem:[#allocation7 + $0x14] sm:$0xf0] }
 0x338   :  { %6795 = vst [vmem:[#allocation46_spill] sm:$0xff] %v5616_v62  ;;  %799 = vmatpush.bf16.msrb.mxu0 %v5616_v62  ;;  %v5619_v5 = vor.u32 %v4602_v0, %v4281_v63 }
 0x339   :  { %6792 = vst [vmem:[#allocation43_spill] sm:$0xff] %v5572_v17  ;;  %814 = vmatpush.bf16.msrb.mxu1 %v5572_v17  ;;  %868 = vmatmul.bf16.vlgmr.msra.gmra.mxu2 %v6655_v33 }
 0x33a   :  { %978 = vmatpush.bf16.msrb.mxu2 %v5477_v46  ;;  %6796 = vst [vmem:[#allocation47_spill] sm:$0xff] %v5619_v5 }
 0x33b   :  { %880 = vmatpush.bf16.msra.mxu3 %v5582_v41 }
 0x33c   :  { %800 = vmatpush.bf16.msrb.mxu0 %v5619_v5 }
 0x33d   :  { %965 = vmatpush.bf16.msra.mxu1 %v5407_v2 }
 0x33e   :  { %881 = vmatmul.bf16.vlgmr.msra.gmra.mxu3 %v6655_v33  ;;  %979 = vmatpush.bf16.msrb.mxu2 %v5483_v52 }
 0x33f   :  { %991 = vmatpush.bf16.msrb.mxu3 %v5475_v42 }
 0x340   :  { %801 = vmatpush.bf16.msrb.mxu0 %v5623_v48 }
 0x341   :  { %966 = vmatpush.bf16.msra.mxu1 %v5427_v11 }
 0x342   :  { %980 = vmatpush.bf16.msrb.mxu2 %v5489_v59 }
 0x343   :  { %992 = vmatpush.bf16.msrb.mxu3 %v5480_v50 }
 0x344   :  { %952 = vmatpush.bf16.msra.mxu0 %v5418_v7 }
 0x345   :  { %967 = vmatpush.bf16.msra.mxu1 %v5445_v18 }
 0x346   :  { %981 = vmatpush.bf16.msrb.mxu2 %v5495_v3 }
 0x347   :  { %993 = vmatpush.bf16.msrb.mxu3 %v5486_v58 }
 0x348   :  { %953 = vmatpush.bf16.msra.mxu0 %v5430_v12 }
 0x349   :  { %968 = vmatpush.bf16.msra.mxu1 %v5466_v37 }
 0x34b   :  { %994 = vmatpush.bf16.msrb.mxu3 %v5492_v1 }
 0x34c   :  { %954 = vmatpush.bf16.msra.mxu0 %v5448_v19 }
 0x350   :  { %955 = vmatpush.bf16.msra.mxu0 %v5471_v39 }
 0x390   :  { %v656_v47 = vpop.permute.xlu2 %655 }
 0x391   :  { %v5557_v55 = vadd.f32 %v656_v47, %v648_v43  ;;  %v733_v43 = vmul.f32 %v5532_v49, %v5452_v24  ;;  %v4618_v24 = vld [vmem:[%s6765_s24 + $0x18] sm:$0xff] }
 0x392   :  { %4164 = vmatmul.msk.bf16.gmra.mxu1 %vm265_vm1, %v4618_v24  ;;  %4160 = vmatmul.msk.bf16.gmra.mxu0 %vm265_vm1, %v4618_v24 }
 0x393   :  { %4655 = vtanh.f32 %v5557_v55 }
 0x399   :  { %v4656_v34 = vpop.eup %4655 }
 0x39a   :  { %661 = vrot.lane.b32.xlu1 %v4656_v34, %s5176_s2 }
 0x3a0   :  { %v741_v45 = vpop.permute.xlu0 %740 }
 0x3a1   :  { %v5598_v47 = vadd.f32 %v741_v45, %v733_v43 }
 0x3a3   :  { %4657 = vtanh.f32 %v5598_v47 }
 0x3a4   :  { %4659 = vpow2.f32 %v4266_v54 }
 0x3a9   :  { %v4658_v49 = vpop.eup %4657 }
 0x3aa   :  { %746 = vrot.lane.b32.xlu2 %v4658_v49, %s5176_s2  ;;  %v4660_v6 = vpop.eup %4659 }
 0x3ab   :  { %v616_v16 = vadd.f32 1.0, %v4660_v6 }
 0x3ad   :  { %4661 = vrcp.f32 %v616_v16  ;;  %v643_v57 = vand.u32 2147483648, %v616_v16  ;;  %vm637_vm4 = vweird.f32 %v616_v16  ;;  %v641_v63 = vand.u32 2147483647, %v616_v16 }
 0x3ae   :  { %4663 = vpow2.f32 %v4270_v20 }
 0x3af   :  { %v644_v6 = vor.u32 1.1754944e-38, %v643_v57  ;;  %vm642_vm6 = vcmp.eq.f32.partialorder %v641_v63, 8.507059e+37 }
 0x3b3   :  { %v4662_v27 = vpop.eup %4661 }
 0x3b4   :  { %v4664_v34 = vpop.eup %4663  ;;  %v633_v43 = vmul.f32 %v4662_v27, %v616_v16  ;;  %vm638_vm1 = vweird.f32 %v4662_v27 }
 0x3b5   :  { %v701_v45 = vadd.f32 1.0, %v4664_v34  ;;  %vm639_vm5 = vmor %vm637_vm4, %vm638_vm1 }
 0x3b6   :  { %v634_v24 = vsub.f32 1.0, %v633_v43 }
 0x3b7   :  { %4665 = vrcp.f32 %v701_v45  ;;  %v728_v16 = vand.u32 2147483648, %v701_v45  ;;  %vm722_vm8 = vweird.f32 %v701_v45 }
 0x3b8   :  { %v635_v60 = vmul.f32 %v4662_v27, %v634_v24 }
 0x3ba   :  { %v636_v54 = vadd.f32 %v4662_v27, %v635_v60 }
 0x3bc   :  { %v640_v0 = vsel %vm639_vm5, %v4662_v27, %v636_v54  ;;  %v726_v27 = vand.u32 2147483647, %v701_v45  ;;  %v729_v54 = vor.u32 1.1754944e-38, %v728_v16 }
 0x3bd   :  { %v4666_v49 = vpop.eup %4665  ;;  %v645_v26 = vsel %vm642_vm6, %v644_v6, %v640_v0 }
 0x3be   :  { %v718_v61 = vmul.f32 %v4666_v49, %v701_v45  ;;  %vm723_vm7 = vweird.f32 %v4666_v49  ;;  %vm727_vm11 = vcmp.eq.f32.partialorder %v726_v27, 8.507059e+37  ;;  %v869_v45 = vpop.f32.mrf.mxu2 }
 0x3bf   :  { %vm724_vm9 = vmor %vm722_vm8, %vm723_vm7 }
 0x3c0   :  { %v719_v20 = vsub.f32 1.0, %v718_v61 }
 0x3c2   :  { %v720_v43 = vmul.f32 %v4666_v49, %v719_v20  ;;  %v299_v20 = vpop.f32.mrf.mxu0 }
 0x3c4   :  { %v721_v24 = vadd.f32 %v4666_v49, %v720_v43 }
 0x3c6   :  { %v725_v60 = vsel %vm724_vm9, %v4666_v49, %v721_v24  ;;  %v882_v49 = vpop.f32.mrf.mxu3  ;;  %v871_v0 = vpop.f32.mrf.mxu2 }
 0x3c7   :  { %v730_v61 = vsel %vm727_vm11, %v729_v54, %v725_v60 }
 0x3ce   :  { %v884_v6 = vpop.f32.mrf.mxu3 }
 0x404   :  { %v747_v57 = vpop.permute.xlu2 %746 }
 0x40c   :  { %v662_v25 = vpop.permute.xlu1 %661 }
 0x40d   :  { %v664_v34 = vmul.f32 %v662_v25, %v645_v26  ;;  %v328_v25 = vpop.f32.mrf.mxu1  ;;  %v5646_v26 = vpop.f32.mrf.mxu0 }
 0x40e   :  { %6798 = vst [vmem:[#allocation49_spill] sm:$0xff] %v5646_v26 }
 0x40f   :  { %v665_v33 = vpack.c.bf16 %v664_v34, %v664_v34 }
 0x411   :  { %4303 = vmatmul.msk.bf16.vlgmr.msrb.gmra.mxu0 %vm383_vm10, %v665_v33  ;;  %4304 = vmatmul.msk.bf16.vlgmr.msrb.gmra.mxu1 %vm383_vm10, %v665_v33 }
 0x412   :  { %4341 = vmatmul.msk.bf16.vlgmr.msrb.gmra.mxu2 %vm383_vm10, %v665_v33  ;;  %4342 = vmatmul.msk.bf16.vlgmr.msrb.gmra.mxu3 %vm383_vm10, %v665_v33  ;;  %v749_v33 = vmul.f32 %v747_v57, %v730_v61 }
 0x413   :  { %1063 = vmatpush.bf16.msrb.mxu0 %v5332_v15  ;;  %1076 = vmatpush.bf16.msrb.mxu1 %v5312_v4 }
 0x414   :  { %v750_v63 = vpack.c.bf16 %v749_v33, %v749_v33  ;;  %v213_v33 = vld [vmem:[%s6645_s9] sm:$0x3] }
 0x415   :  { %v5648_v34 = vpop.f32.mrf.mxu1  ;;  %v5650_v43 = vpop.f32.mrf.mxu0 }
 0x416   :  { %6799 = vst [vmem:[#allocation50_spill] sm:$0xff] %v5648_v34 }
 0x417   :  { %1064 = vmatpush.bf16.msrb.mxu0 %v5345_v21  ;;  %1077 = vmatpush.bf16.msrb.mxu1 %v5318_v9  ;;  %6800 = vst [vmem:[#allocation51_spill] sm:$0xff] %v5650_v43 }
 0x41b   :  { %1065 = vmatpush.bf16.msrb.mxu0 %v5365_v28  ;;  %1078 = vmatpush.bf16.msrb.mxu1 %v5349_v23 }
 0x41d   :  { %v5652_v24 = vpop.f32.mrf.mxu1  ;;  %v5654_v16 = vpop.f32.mrf.mxu0 }
 0x41e   :  { %6801 = vst [vmem:[#allocation52_spill] sm:$0xff] %v5652_v24 }
 0x41f   :  { %1066 = vmatpush.bf16.msrb.mxu0 %v5378_v32  ;;  %1079 = vmatpush.bf16.msrb.mxu1 %v5368_v29  ;;  %6802 = vst [vmem:[#allocation53_spill] sm:$0xff] %v5654_v16 }
 0x421   :  { %4339 = vmatmul.msk.bf16.vlgmr.msra.gmra.mxu0 %vm383_vm10, %v750_v63  ;;  %4340 = vmatmul.msk.bf16.vlgmr.msra.gmra.mxu1 %vm383_vm10, %v750_v63 }
 0x425   :  { %v5656_v27 = vpop.f32.mrf.mxu1  ;;  %v5658_v60 = vpop.f32.mrf.mxu0 }
 0x426   :  { %6803 = vst [vmem:[#allocation54_spill] sm:$0xff] %v5656_v27 }
 0x427   :  { %6804 = vst [vmem:[#allocation55_spill] sm:$0xff] %v5658_v60 }
 0x42d   :  { %v5660_v54 = vpop.f32.mrf.mxu1  ;;  %v5662_v57 = vpop.f32.mrf.mxu0 }
 0x42e   :  { %6805 = vst [vmem:[#allocation56_spill] sm:$0xff] %v5660_v54 }
 0x42f   :  { %6806 = vst [vmem:[#allocation57_spill] sm:$0xff] %v5662_v57 }
 0x431   :  { %4345 = vmatmul.msk.bf16.vlgmr.msrb.gmra.mxu0 %vm383_vm10, %v750_v63  ;;  %4346 = vmatmul.msk.bf16.vlgmr.msrb.gmra.mxu1 %vm383_vm10, %v750_v63  ;;  %v5669_v63 = vperm.slane %v213_v33, 1 }
 0x433   :  { %6808 = vst [vmem:[#allocation59_spill] sm:$0xff] %v5669_v63 }
 0x435   :  { %v5664_v61 = vpop.f32.mrf.mxu1 }
 0x436   :  { %6807 = vst [vmem:[#allocation58_spill] sm:$0xff] %v5664_v61 }
 0x48e   :  { %v803_v0 = vpop.f32.mrf.mxu0  ;;  %v816_v6 = vpop.f32.mrf.mxu1 }
 0x48f   :  { %v817_v16 = vadd.f32 %v816_v6, %v5669_v63 }
 0x491   :  { %v5672_v43 = vadd.f32 %v882_v49, %v817_v16 }
 0x493   :  { %4667 = vtanh.f32 %v5672_v43 }
 0x495   :  { %v983_v60 = vpop.f32.mrf.mxu2  ;;  %v996_v54 = vpop.f32.mrf.mxu3 }
 0x496   :  { %v805_v27 = vpop.f32.mrf.mxu0  ;;  %v818_v57 = vpop.f32.mrf.mxu1 }
 0x499   :  { %v4668_v24 = vpop.eup %4667 }
 0x49a   :  { %929 = vrot.lane.b32.xlu0 %v4668_v24, %s5176_s2  ;;  %v300_v24 = vadd.f32 %v299_v20, %v5394_v44 }
 0x49d   :  { %v985_v61 = vpop.f32.mrf.mxu2  ;;  %v998_v26 = vpop.f32.mrf.mxu3 }
 0x49e   :  { %v957_v34 = vpop.f32.mrf.mxu0  ;;  %v970_v29 = vpop.f32.mrf.mxu1  ;;  %v329_v26 = vadd.f32 %v328_v25, %v5387_v35 }
 0x49f   :  { %v958_v32 = vadd.f32 %v957_v34, %v5516_v36  ;;  %v971_v23 = vadd.f32 %v970_v29, %v5518_v38 }
 0x4a1   :  { %v1000_v6 = vadd.f32 %v983_v60, %v958_v32  ;;  %v5678_v49 = vadd.f32 %v996_v54, %v971_v23  ;;  %v5688_v60 = vperm.slane %v213_v33, 0 }
 0x4a3   :  { %4669 = vtanh.f32 %v5678_v49  ;;  %6809 = vst [vmem:[#allocation60_spill] sm:$0xff] %v5688_v60  ;;  %v804_v54 = vadd.f32 %v803_v0, %v5688_v60 }
 0x4a6   :  { %v959_v16 = vpop.f32.mrf.mxu0  ;;  %v972_v63 = vpop.f32.mrf.mxu1 }
 0x4a7   :  { %v886_v63 = vadd.f32 %v869_v45, %v804_v54 }
 0x4a9   :  { %v4670_v27 = vpop.eup %4669  ;;  %v4337_v20 = vmul.f32 -1.442695, %v886_v63 }
 0x4aa   :  { %1043 = vrot.lane.b32.xlu1 %v4670_v27, %s5176_s2 }
 0x4ae   :  { %v1068_v57 = vpop.f32.mrf.mxu0  ;;  %v1081_v61 = vpop.f32.mrf.mxu1 }
 0x4af   :  { %v1085_v28 = vadd.f32 %v1068_v57, %v300_v24  ;;  %v5684_v34 = vadd.f32 %v1081_v61, %v329_v26  ;;  %v4343_v26 = vmul.f32 -1.442695, %v1000_v6 }
 0x4b1   :  { %4671 = vtanh.f32 %v5684_v34  ;;  %v4347_v25 = vmul.f32 -1.442695, %v1085_v28 }
 0x4b2   :  { %4673 = vpow2.f32 %v4337_v20 }
 0x4b3   :  { %4675 = vpow2.f32 %v4347_v25 }
 0x4b6   :  { %v1070_v23 = vpop.f32.mrf.mxu0  ;;  %v1083_v29 = vpop.f32.mrf.mxu1 }
 0x4b7   :  { %v4672_v32 = vpop.eup %4671 }
 0x4b8   :  { %1128 = vrot.lane.b32.xlu2 %v4672_v32, %s5176_s2  ;;  %v4674_v16 = vpop.eup %4673 }
 0x4b9   :  { %v894_v27 = vadd.f32 1.0, %v4674_v16  ;;  %v4676_v24 = vpop.eup %4675 }
 0x4ba   :  { %v1093_v57 = vadd.f32 1.0, %v4676_v24 }
 0x4bb   :  { %4677 = vrcp.f32 %v894_v27  ;;  %v907_v20 = vand.u32 2147483648, %v894_v27  ;;  %vm901_vm13 = vweird.f32 %v894_v27  ;;  %v905_v6 = vand.u32 2147483647, %v894_v27 }
 0x4bc   :  { %4679 = vpow2.f32 %v4343_v26  ;;  %v1106_v38 = vand.u32 2147483648, %v1093_v57  ;;  %vm1100_vm2 = vweird.f32 %v1093_v57 }
 0x4bd   :  { %4681 = vrcp.f32 %v1093_v57  ;;  %v908_v26 = vor.u32 1.1754944e-38, %v907_v20  ;;  %vm906_vm15 = vcmp.eq.f32.partialorder %v905_v6, 8.507059e+37 }
 0x4c1   :  { %v4678_v61 = vpop.eup %4677 }
 0x4c2   :  { %v4680_v23 = vpop.eup %4679  ;;  %v897_v29 = vmul.f32 %v4678_v61, %v894_v27  ;;  %vm902_vm12 = vweird.f32 %v4678_v61  ;;  %v1107_v27 = vor.u32 1.1754944e-38, %v1106_v38 }
 0x4c3   :  { %v4682_v33 = vpop.eup %4681  ;;  %v1008_v32 = vadd.f32 1.0, %v4680_v23  ;;  %vm903_vm14 = vmor %vm901_vm13, %vm902_vm12 }
 0x4c4   :  { %v898_v44 = vsub.f32 1.0, %v897_v29  ;;  %v1096_v0 = vmul.f32 %v4682_v33, %v1093_v57  ;;  %vm1101_vm0 = vweird.f32 %v4682_v33 }
 0x4c5   :  { %4683 = vrcp.f32 %v1008_v32  ;;  %vm1102_vm3 = vmor %vm1100_vm2, %vm1101_vm0  ;;  %vm1015_vm5 = vweird.f32 %v1008_v32 }
 0x4c6   :  { %v899_v45 = vmul.f32 %v4678_v61, %v898_v44  ;;  %v1097_v54 = vsub.f32 1.0, %v1096_v0  ;;  %v1104_v44 = vand.u32 2147483647, %v1093_v57 }
 0x4c8   :  { %v900_v28 = vadd.f32 %v4678_v61, %v899_v45  ;;  %v1098_v25 = vmul.f32 %v4682_v33, %v1097_v54  ;;  %vm1105_vm1 = vcmp.eq.f32.partialorder %v1104_v44, 8.507059e+37 }
 0x4ca   :  { %v904_v16 = vsel %vm903_vm14, %v4678_v61, %v900_v28  ;;  %v1099_v35 = vadd.f32 %v4682_v33, %v1098_v25  ;;  %v1021_v25 = vand.u32 2147483648, %v1008_v32 }
 0x4cb   :  { %v4684_v63 = vpop.eup %4683  ;;  %v909_v29 = vsel %vm906_vm15, %v908_v26, %v904_v16  ;;  %v1019_v16 = vand.u32 2147483647, %v1008_v32 }
 0x4cc   :  { %v1011_v24 = vmul.f32 %v4684_v63, %v1008_v32  ;;  %v1103_v45 = vsel %vm1102_vm3, %v4682_v33, %v1099_v35  ;;  %vm1016_vm4 = vweird.f32 %v4684_v63  ;;  %v927_v32 = vmul.f32 0.0, %v909_v29 }
 0x4cd   :  { %v1108_v28 = vsel %vm1105_vm1, %v1107_v27, %v1103_v45  ;;  %vm1017_vm6 = vmor %vm1015_vm5, %vm1016_vm4  ;;  %vm1020_vm7 = vcmp.eq.f32.partialorder %v1019_v16, 8.507059e+37  ;;  %v4401_v16 = vld [vmem:[#allocation11 + $0x20] sm:$0xf] }
 0x4ce   :  { %v1012_v0 = vsub.f32 1.0, %v1011_v24  ;;  %v1022_v24 = vor.u32 1.1754944e-38, %v1021_v25  ;;  %v1126_v38 = vmul.f32 %v1108_v28, %v5598_v47  ;;  %v4411_v25 = vld [vmem:[#allocation11 + $0x38] sm:$0xf0] }
 0x4d0   :  { %v1013_v54 = vmul.f32 %v4684_v63, %v1012_v0 }
 0x4d2   :  { %v1014_v6 = vadd.f32 %v4684_v63, %v1013_v54 }
 0x4d4   :  { %v1018_v57 = vsel %vm1017_vm6, %v4684_v63, %v1014_v6 }
 0x50c   :  { %v930_v23 = vpop.permute.xlu0 %929 }
 0x50d   :  { %v932_v36 = vmul.f32 %v930_v23, %v909_v29  ;;  %v4590_v29 = vld [vmem:[#allocation11 + $0x34] sm:$0xf0] }
 0x50f   :  { %934 = vrot.lane.b32.xlu0 %v932_v36, %s5176_s2  ;;  %v1023_v36 = vsel %vm1020_vm7, %v1022_v24, %v1018_v57  ;;  %v4588_v57 = vld [vmem:[#allocation11 + $0x24] sm:$0xf0] }
 0x510   :  { %v1041_v27 = vmul.f32 %v1023_v36, %v5557_v55  ;;  %v4403_v55 = vld [vmem:[#allocation11 + $0x28] sm:$0xf0] }
 0x512   :  { %v1129_v61 = vpop.permute.xlu2 %1128 }
 0x513   :  { %v1131_v20 = vmul.f32 %v1129_v61, %v1108_v28  ;;  %v4409_v28 = vld [vmem:[#allocation11 + $0x30] sm:$0xf] }
 0x514   :  { %v5708_v6 = vor.u32 %v4590_v29, %v4409_v28  ;;  %v4611_v28 = vld [vmem:[#allocation10 + $0x24] sm:$0xf] }
 0x515   :  { %1133 = vrot.lane.b32.xlu2 %v1131_v20, %s5176_s2  ;;  %v4589_v20 = vld [vmem:[#allocation11 + $0x34] sm:$0xf] }
 0x516   :  { %6813 = vst [vmem:[#allocation64_spill] sm:$0xff] %v5708_v6  ;;  %v5710_v24 = vor.u32 %v4589_v20, %v4411_v25  ;;  %1257 = vmatpush.bf16.msra.mxu0 %v5708_v6  ;;  %v4369_v25 = vld [vmem:[#allocation10 + $0x28] sm:$0xf0] }
 0x518   :  { %6814 = vst [vmem:[#allocation65_spill] sm:$0xff] %v5710_v24  ;;  %1270 = vmatpush.bf16.msra.mxu1 %v5710_v24 }
 0x51c   :  { %v1044_v26 = vpop.permute.xlu1 %1043 }
 0x51d   :  { %v1046_v35 = vmul.f32 %v1044_v26, %v1023_v36  ;;  %v4587_v26 = vld [vmem:[#allocation11 + $0x24] sm:$0xf]  ;;  %v5713_v36 = vor.u32 %v4588_v57, %v4401_v16  ;;  %v4367_v16 = vld [vmem:[#allocation10 + $0x20] sm:$0xf]  ;;  %v4612_v57 = vld [vmem:[#allocation10 + $0x24] sm:$0xf0] }
 0x51f   :  { %1048 = vrot.lane.b32.xlu1 %v1046_v35, %s5176_s2  ;;  %6815 = vst [vmem:[#allocation66_spill] sm:$0xff] %v5713_v36  ;;  %v5716_v35 = vor.u32 %v4587_v26, %v4403_v55  ;;  %1258 = vmatpush.bf16.msra.mxu0 %v5713_v36  ;;  %v4385_v55 = vld [vmem:[#allocation11] sm:$0xf] }
 0x521   :  { %6816 = vst [vmem:[#allocation67_spill] sm:$0xff] %v5716_v35  ;;  %1271 = vmatpush.bf16.msra.mxu1 %v5716_v35 }
 0x56f   :  { %v1134_v33 = vpop.permute.xlu2 %1133 }
 0x570   :  { %v5695_v23 = vadd.f32 %v1134_v33, %v1126_v38  ;;  %v4393_v38 = vld [vmem:[#allocation11 + $0x10] sm:$0xf]  ;;  %v4586_v33 = vld [vmem:[#allocation11 + $0x14] sm:$0xf0] }
 0x571   :  { %v5721_v29 = vor.u32 %v4586_v33, %v4393_v38  ;;  %v5732_v38 = vor.u32 %v4612_v57, %v4367_v16  ;;  %v4609_v33 = vld [vmem:[#allocation10 + $0x14] sm:$0xf] }
 0x572   :  { %6810 = vst [vmem:[#allocation61_spill] sm:$0xff] %v5695_v23  ;;  %4685 = vtanh.f32 %v5695_v23  ;;  %v4584_v23 = vld [vmem:[#allocation11 + $0x4] sm:$0xf0] }
 0x573   :  { %6817 = vst [vmem:[#allocation68_spill] sm:$0xff] %v5721_v29  ;;  %1259 = vmatpush.bf16.msra.mxu0 %v5721_v29 }
 0x578   :  { %v4686_v44 = vpop.eup %4685 }
 0x579   :  { %1139 = vrot.lane.b32.xlu2 %v4686_v44, %s5176_s2  ;;  %v4585_v44 = vld [vmem:[#allocation11 + $0x14] sm:$0xf] }
 0x581   :  { %v935_v0 = vpop.permute.xlu0 %934 }
 0x582   :  { %v5699_v63 = vadd.f32 %v935_v0, %v927_v32  ;;  %v4395_v32 = vld [vmem:[#allocation11 + $0x18] sm:$0xf0]  ;;  %v4613_v0 = vld [vmem:[#allocation10 + $0x34] sm:$0xf] }
 0x583   :  { %v5726_v26 = vor.u32 %v4585_v44, %v4395_v32  ;;  %v4359_v44 = vld [vmem:[#allocation10 + $0x10] sm:$0xf]  ;;  %v4610_v32 = vld [vmem:[#allocation10 + $0x14] sm:$0xf0] }
 0x584   :  { %6811 = vst [vmem:[#allocation62_spill] sm:$0xff] %v5699_v63  ;;  %4687 = vtanh.f32 %v5699_v63 }
 0x585   :  { %6818 = vst [vmem:[#allocation69_spill] sm:$0xff] %v5726_v26  ;;  %1272 = vmatpush.bf16.msra.mxu1 %v5726_v26 }
 0x58a   :  { %v4688_v45 = vpop.eup %4687 }
 0x58b   :  { %940 = vrot.lane.b32.xlu0 %v4688_v45, %s5176_s2  ;;  %v4377_v45 = vld [vmem:[#allocation10 + $0x38] sm:$0xf0] }
 0x591   :  { %v1049_v47 = vpop.permute.xlu1 %1048 }
 0x592   :  { %v5704_v54 = vadd.f32 %v1049_v47, %v1041_v27  ;;  %v5718_v27 = vor.u32 %v4613_v0, %v4377_v45  ;;  %v4375_v47 = vld [vmem:[#allocation10 + $0x30] sm:$0xf]  ;;  %v5729_v0 = vor.u32 %v4611_v28, %v4369_v25  ;;  %v4583_v45 = vld [vmem:[#allocation11 + $0x4] sm:$0xf]  ;;  %v5744_v25 = vor.u32 %v4610_v32, %v4359_v44  ;;  %v4608_v44 = vld [vmem:[#allocation10 + $0x4] sm:$0xf0] }
 0x594   :  { %6812 = vst [vmem:[#allocation63_spill] sm:$0xff] %v5704_v54  ;;  %4689 = vtanh.f32 %v5704_v54  ;;  %1204 = vmatpush.bf16.msra.mxu3 %v5718_v27  ;;  %v4387_v54 = vld [vmem:[#allocation11 + $0x8] sm:$0xf0] }
 0x595   :  { %v5738_v63 = vor.u32 %v4583_v45, %v4387_v54  ;;  %6822 = vst [vmem:[#allocation73_spill] sm:$0xff] %v5744_v25  ;;  %v4338_v54 = vmul.f32 -1.442695, %v5672_v43  ;;  %v4344_v43 = vmul.f32 -1.442695, %v5678_v49 }
 0x596   :  { %v4353_v45 = vld [vmem:[#allocation10 + $0x8] sm:$0xf0] }
 0x597   :  { %6820 = vst [vmem:[#allocation71_spill] sm:$0xff] %v5738_v63  ;;  %1273 = vmatpush.bf16.msra.mxu1 %v5738_v63  ;;  %4691 = vpow2.f32 %v4338_v54 }
 0x598   :  { %1205 = vmatpush.bf16.msra.mxu3 %v5729_v0 }
 0x59a   :  { %v4690_v61 = vpop.eup %4689 }
 0x59b   :  { %1054 = vrot.lane.b32.xlu1 %v4690_v61, %s5176_s2  ;;  %v4614_v61 = vld [vmem:[#allocation10 + $0x34] sm:$0xf0]  ;;  %1383 = vmatpush.bf16.msrb.mxu1 %v5549_v31 }
 0x59c   :  { %v5723_v20 = vor.u32 %v4614_v61, %v4375_v47  ;;  %v4361_v47 = vld [vmem:[#allocation10 + $0x18] sm:$0xf0]  ;;  %v5735_v61 = vor.u32 %v4584_v23, %v4385_v55  ;;  %v6823_v23 = vmov 0   ;;  %v4607_v55 = vld [vmem:[#allocation10 + $0x4] sm:$0xf] }
 0x59d   :  { %v5742_v28 = vor.u32 %v4609_v33, %v4361_v47  ;;  %1274 = vmatmul.bf16.vlgmr.msra.gmra.mxu1 %v6823_v23  ;;  %v4692_v16 = vpop.eup %4691  ;;  %v4351_v33 = vld [vmem:[#allocation10] sm:$0xf]  ;;  %v5770_v47 = vor.u32 %v4607_v55, %v4353_v45 }
 0x59e   :  { %1191 = vmatpush.bf16.msra.mxu2 %v5723_v20  ;;  %6819 = vst [vmem:[#allocation70_spill] sm:$0xff] %v5735_v61  ;;  %1260 = vmatpush.bf16.msra.mxu0 %v5735_v61  ;;  %v895_v57 = vadd.f32 1.0, %v4692_v16  ;;  %v5772_v32 = vor.u32 %v4608_v44, %v4351_v33 }
 0x59f   :  { %6821 = vst [vmem:[#allocation72_spill] sm:$0xff] %v5742_v28  ;;  %1206 = vmatpush.bf16.msra.mxu3 %v5742_v28  ;;  %1384 = vmatpush.bf16.msrb.mxu1 %v5555_v53 }
 0x5a0   :  { %4693 = vrcp.f32 %v895_v57  ;;  %6824 = vst [vmem:[#allocation74_spill] sm:$0xff] %v5770_v47  ;;  %vm916_vm9 = vweird.f32 %v895_v57 }
 0x5a1   :  { %1261 = vmatmul.bf16.vlgmr.msra.gmra.mxu0 %v6823_v23  ;;  %6825 = vst [vmem:[#allocation75_spill] sm:$0xff] %v5772_v32  ;;  %4695 = vpow2.f32 %v4344_v43  ;;  %v4348_v43 = vmul.f32 -1.442695, %v5684_v34 }
 0x5a2   :  { %1192 = vmatpush.bf16.msra.mxu2 %v5732_v38  ;;  %1370 = vmatpush.bf16.msrb.mxu0 %v5547_v30 }
 0x5a3   :  { %1385 = vmatpush.bf16.msrb.mxu1 %v5567_v13  ;;  %1207 = vmatpush.bf16.msra.mxu3 %v5770_v47 }
 0x5a6   :  { %1193 = vmatpush.bf16.msra.mxu2 %v5744_v25  ;;  %1371 = vmatpush.bf16.msrb.mxu0 %v5553_v51  ;;  %v4694_v49 = vpop.eup %4693 }
 0x5a7   :  { %1386 = vmatpush.bf16.msrb.mxu1 %v5582_v41  ;;  %1357 = vmatpush.bf16.msrb.mxu3 %v5540_v10  ;;  %v4696_v23 = vpop.eup %4695  ;;  %v912_v54 = vmul.f32 %v4694_v49, %v895_v57  ;;  %vm917_vm8 = vweird.f32 %v4694_v49 }
 0x5a8   :  { %v1009_v16 = vadd.f32 1.0, %v4696_v23  ;;  %vm918_vm11 = vmor %vm916_vm9, %vm917_vm8 }
 0x5a9   :  { %v913_v55 = vsub.f32 1.0, %v912_v54 }
 0x5aa   :  { %1372 = vmatpush.bf16.msrb.mxu0 %v5565_v8  ;;  %1194 = vmatpush.bf16.msra.mxu2 %v5772_v32  ;;  %4697 = vrcp.f32 %v1009_v16  ;;  %vm1030_vm14 = vweird.f32 %v1009_v16 }
 0x5ab   :  { %1497 = vmatpush.bf16.msra.mxu1 %v5475_v42  ;;  %1358 = vmatpush.bf16.msrb.mxu3 %v5545_v22  ;;  %4699 = vpow2.f32 %v4348_v43  ;;  %v914_v45 = vmul.f32 %v4694_v49, %v913_v55 }
 0x5ad   :  { %v915_v33 = vadd.f32 %v4694_v49, %v914_v45 }
 0x5ae   :  { %1373 = vmatpush.bf16.msrb.mxu0 %v5580_v40  ;;  %1344 = vmatpush.bf16.msrb.mxu2 %v5569_v14 }
 0x5af   :  { %1498 = vmatpush.bf16.msra.mxu1 %v5480_v50  ;;  %1359 = vmatpush.bf16.msrb.mxu3 %v5560_v56  ;;  %v919_v23 = vsel %vm918_vm11, %v4694_v49, %v915_v33 }
 0x5b0   :  { %v4698_v44 = vpop.eup %4697 }
 0x5b1   :  { %vm1031_vm13 = vweird.f32 %v4698_v44 }
 0x5b2   :  { %1484 = vmatpush.bf16.msra.mxu0 %v5477_v46  ;;  %1345 = vmatpush.bf16.msrb.mxu2 %v5616_v62  ;;  %vm1032_vm15 = vmor %vm1030_vm14, %vm1031_vm13 }
 0x5b3   :  { %1499 = vmatpush.bf16.msra.mxu1 %v5486_v58  ;;  %1360 = vmatpush.bf16.msrb.mxu3 %v5572_v17  ;;  %v920_v58 = vand.u32 2147483647, %v895_v57 }
 0x5b5   :  { %vm921_vm12 = vcmp.eq.f32.partialorder %v920_v58, 8.507059e+37 }
 0x5b6   :  { %1485 = vmatpush.bf16.msra.mxu0 %v5483_v52  ;;  %1346 = vmatpush.bf16.msrb.mxu2 %v5619_v5 }
 0x5b7   :  { %1500 = vmatpush.bf16.msra.mxu1 %v5492_v1  ;;  %v922_v1 = vand.u32 2147483648, %v895_v57 }
 0x5b9   :  { %v923_v34 = vor.u32 1.1754944e-38, %v922_v1 }
 0x5ba   :  { %1486 = vmatpush.bf16.msra.mxu0 %v5489_v59  ;;  %1347 = vmatpush.bf16.msrb.mxu2 %v5623_v48  ;;  %v1026_v59 = vmul.f32 %v4698_v44, %v1009_v16 }
 0x5bb   :  { %v924_v54 = vsel %vm921_vm12, %v923_v34, %v919_v23 }
 0x5bc   :  { %v1027_v46 = vsub.f32 1.0, %v1026_v59 }
 0x5be   :  { %1487 = vmatpush.bf16.msra.mxu0 %v5495_v3  ;;  %v4700_v3 = vpop.eup %4699  ;;  %v1028_v55 = vmul.f32 %v4698_v44, %v1027_v46  ;;  %v1034_v46 = vand.u32 2147483647, %v1009_v16 }
 0x5bf   :  { %v5785_v50 = vadd.f32 1.0, %v4700_v3 }
 0x5c0   :  { %vm1035_vm0 = vcmp.eq.f32.partialorder %v1034_v46, 8.507059e+37  ;;  %v6826_v46 = vld [vmem:[#allocation18_spill] sm:$0xff] }
 0x5c1   :  { %4701 = vrcp.f32 %v5785_v50  ;;  %v1121_v34 = vand.u32 2147483648, %v5785_v50  ;;  %vm1115_vm3 = vweird.f32 %v5785_v50 }
 0x5c7   :  { %v4702_v58 = vpop.eup %4701 }
 0x5c8   :  { %v1111_v59 = vmul.f32 %v4702_v58, %v5785_v50  ;;  %vm1116_vm2 = vweird.f32 %v4702_v58 }
 0x5c9   :  { %vm1117_vm1 = vmor %vm1115_vm3, %vm1116_vm2 }
 0x5ca   :  { %v1112_v57 = vsub.f32 1.0, %v1111_v59 }
 0x5cc   :  { %v1113_v33 = vmul.f32 %v4702_v58, %v1112_v57 }
 0x5fd   :  { %v941_v52 = vpop.permute.xlu0 %940 }
 0x5fe   :  { %v943_v42 = vmul.f32 %v941_v52, %v924_v54  ;;  %v1029_v52 = vadd.f32 %v4698_v44, %v1028_v55  ;;  %v1119_v54 = vand.u32 2147483647, %v5785_v50  ;;  %v1122_v55 = vor.u32 1.1754944e-38, %v1121_v34 }
 0x600   :  { %v944_v43 = vpack.c.bf16 %v943_v42, %v943_v42  ;;  %v1036_v42 = vand.u32 2147483648, %v1009_v16  ;;  %v1033_v1 = vsel %vm1032_vm15, %v4698_v44, %v1029_v52  ;;  %v1114_v44 = vadd.f32 %v4702_v58, %v1113_v33  ;;  %v1140_v52 = vpop.permute.xlu2 %1139  ;;  %v219_v33 = vld [vmem:[%s6648_s12] sm:$0x3] }
 0x601   :  { %vm1120_vm4 = vcmp.eq.f32.partialorder %v1119_v54, 8.507059e+37  ;;  %v5855_v34 = vperm.slane %v219_v33, 0  ;;  %v5857_v54 = vperm.slane %v219_v33, 1 }
 0x602   :  { %4381 = vmatmul.msk.bf16.vlgmr.msra.gmra.mxu2 %vm383_vm10, %v944_v43  ;;  %4382 = vmatmul.msk.bf16.vlgmr.msra.gmra.mxu3 %vm383_vm10, %v944_v43  ;;  %v1037_v3 = vor.u32 1.1754944e-38, %v1036_v42 }
 0x603   :  { %4419 = vmatmul.msk.bf16.vlgmr.msrb.gmra.mxu0 %vm383_vm10, %v944_v43  ;;  %4420 = vmatmul.msk.bf16.vlgmr.msrb.gmra.mxu1 %vm383_vm10, %v944_v43  ;;  %v1118_v43 = vsel %vm1117_vm1, %v4702_v58, %v1114_v44  ;;  %v6828_v58 = vld [vmem:[#allocation20_spill] sm:$0xff]  ;;  %6830 = vst [vmem:[#allocation76_spill] sm:$0xff] %v5855_v34 }
 0x604   :  { %1471 = vmatpush.bf16.msra.mxu3 %v5407_v2  ;;  %1458 = vmatpush.bf16.msra.mxu2 %v5418_v7  ;;  %v1038_v49 = vsel %vm1035_vm0, %v1037_v3, %v1033_v1  ;;  %v1123_v42 = vsel %vm1120_vm4, %v1122_v55, %v1118_v43  ;;  %v6827_v1 = vld [vmem:[#allocation17_spill] sm:$0xff]  ;;  %v6829_v3 = vld [vmem:[#allocation19_spill] sm:$0xff]  ;;  %6831 = vst [vmem:[#allocation77_spill] sm:$0xff] %v5857_v54 }
 0x605   :  { %1670 = vmatpush.bf16.msrb.mxu1 %v5718_v27  ;;  %1657 = vmatpush.bf16.msrb.mxu0 %v5723_v20  ;;  %v1142_v59 = vmul.f32 %v1140_v52, %v1123_v42 }
 0x607   :  { %v1143_v50 = vpack.c.bf16 %v1142_v59, %v1142_v59 }
 0x608   :  { %1472 = vmatpush.bf16.msra.mxu3 %v5427_v11  ;;  %1459 = vmatpush.bf16.msra.mxu2 %v5430_v12 }
 0x609   :  { %1671 = vmatpush.bf16.msrb.mxu1 %v5729_v0  ;;  %1658 = vmatpush.bf16.msrb.mxu0 %v5732_v38 }
 0x60c   :  { %1473 = vmatpush.bf16.msra.mxu3 %v5445_v18  ;;  %1460 = vmatpush.bf16.msra.mxu2 %v5448_v19 }
 0x60d   :  { %v1055_v45 = vpop.permute.xlu1 %1054  ;;  %1672 = vmatpush.bf16.msrb.mxu1 %v5742_v28  ;;  %1659 = vmatpush.bf16.msrb.mxu0 %v5744_v25 }
 0x60e   :  { %v1057_v16 = vmul.f32 %v1055_v45, %v1038_v49 }
 0x610   :  { %v1058_v23 = vpack.c.bf16 %v1057_v16, %v1057_v16  ;;  %1474 = vmatpush.bf16.msra.mxu3 %v5466_v37  ;;  %1461 = vmatpush.bf16.msra.mxu2 %v5471_v39 }
 0x611   :  { %1673 = vmatpush.bf16.msrb.mxu1 %v5770_v47  ;;  %1660 = vmatpush.bf16.msrb.mxu0 %v5772_v32 }
 0x612   :  { %4417 = vmatmul.msk.bf16.vlgmr.msrb.gmra.mxu2 %vm383_vm10, %v1058_v23  ;;  %4418 = vmatmul.msk.bf16.vlgmr.msrb.gmra.mxu3 %vm383_vm10, %v1058_v23 }
 0x613   :  { %4425 = vmatmul.msk.bf16.vlgmr.msra.gmra.mxu0 %vm383_vm10, %v1058_v23  ;;  %4426 = vmatmul.msk.bf16.vlgmr.msra.gmra.mxu1 %vm383_vm10, %v1058_v23 }
 0x614   :  { %1569 = vmatpush.bf16.msrb.mxu2 %v5332_v15  ;;  %1582 = vmatpush.bf16.msrb.mxu3 %v5312_v4 }
 0x615   :  { %1787 = vmatpush.bf16.msra.mxu1 %v5540_v10  ;;  %1774 = vmatpush.bf16.msra.mxu0 %v5569_v14 }
 0x618   :  { %1570 = vmatpush.bf16.msrb.mxu2 %v5345_v21  ;;  %1583 = vmatpush.bf16.msrb.mxu3 %v5318_v9 }
 0x619   :  { %1788 = vmatpush.bf16.msra.mxu1 %v5545_v22  ;;  %1775 = vmatpush.bf16.msra.mxu0 %v5616_v62 }
 0x61a   :  { %v1275_v49 = vpop.f32.mrf.mxu1 }
 0x61c   :  { %1571 = vmatpush.bf16.msrb.mxu2 %v6826_v46  ;;  %1584 = vmatpush.bf16.msrb.mxu3 %v6827_v1 }
 0x61d   :  { %1789 = vmatpush.bf16.msra.mxu1 %v5560_v56  ;;  %1776 = vmatpush.bf16.msra.mxu0 %v5619_v5 }
 0x61e   :  { %v1262_v57 = vpop.f32.mrf.mxu0 }
 0x620   :  { %1572 = vmatpush.bf16.msrb.mxu2 %v6828_v58  ;;  %1585 = vmatpush.bf16.msrb.mxu3 %v6829_v3 }
 0x621   :  { %1790 = vmatpush.bf16.msra.mxu1 %v5572_v17  ;;  %1777 = vmatpush.bf16.msra.mxu0 %v5623_v48 }
 0x622   :  { %4423 = vmatmul.msk.bf16.vlgmr.msra.gmra.mxu2 %vm383_vm10, %v1143_v50  ;;  %4424 = vmatmul.msk.bf16.vlgmr.msra.gmra.mxu3 %vm383_vm10, %v1143_v50  ;;  %v1277_v16 = vpop.f32.mrf.mxu1 }
 0x624   :  { %1687 = vmatpush.bf16.msra.mxu2 %v5708_v6  ;;  %1700 = vmatpush.bf16.msra.mxu3 %v5710_v24 }
 0x626   :  { %v1264_v45 = vpop.f32.mrf.mxu0 }
 0x628   :  { %1688 = vmatpush.bf16.msra.mxu2 %v5713_v36  ;;  %1701 = vmatpush.bf16.msra.mxu3 %v5716_v35 }
 0x62c   :  { %1689 = vmatpush.bf16.msra.mxu2 %v5721_v29  ;;  %1702 = vmatpush.bf16.msra.mxu3 %v5726_v26 }
 0x630   :  { %1690 = vmatpush.bf16.msra.mxu2 %v5735_v61  ;;  %1703 = vmatpush.bf16.msra.mxu3 %v5738_v63 }
 0x632   :  { %4429 = vmatmul.msk.bf16.vlgmr.msrb.gmra.mxu2 %vm383_vm10, %v1143_v50  ;;  %4430 = vmatmul.msk.bf16.vlgmr.msrb.gmra.mxu3 %vm383_vm10, %v1143_v50 }
 0x634   :  { %1800 = vmatpush.bf16.msrb.mxu2 %v5547_v30  ;;  %1813 = vmatpush.bf16.msrb.mxu3 %v5549_v31  ;;  %v6834_v30 = vld [vmem:[#allocation32_spill] sm:$0xff] }
 0x638   :  { %1801 = vmatpush.bf16.msrb.mxu2 %v5553_v51  ;;  %1814 = vmatpush.bf16.msrb.mxu3 %v5555_v53 }
 0x63c   :  { %1802 = vmatpush.bf16.msrb.mxu2 %v5565_v8  ;;  %1815 = vmatpush.bf16.msrb.mxu3 %v5567_v13 }
 0x640   :  { %1803 = vmatpush.bf16.msrb.mxu2 %v5580_v40  ;;  %1816 = vmatpush.bf16.msrb.mxu3 %v5582_v41 }
 0x680   :  { %v1375_v23 = vpop.f32.mrf.mxu0  ;;  %v1388_v44 = vpop.f32.mrf.mxu1 }
 0x685   :  { %v1196_v43 = vpop.f32.mrf.mxu2  ;;  %v1209_v55 = vpop.f32.mrf.mxu3 }
 0x686   :  { %v1197_v52 = vadd.f32 %v1196_v43, %v5855_v34  ;;  %v1210_v42 = vadd.f32 %v1209_v55, %v5857_v54  ;;  %v6832_v34 = vld [vmem:[#allocation59_spill] sm:$0xff] }
 0x687   :  { %v6833_v54 = vld [vmem:[#allocation31_spill] sm:$0xff] }
 0x688   :  { %v1279_v59 = vadd.f32 %v1262_v57, %v1197_v52  ;;  %v5861_v50 = vadd.f32 %v1275_v49, %v1210_v42  ;;  %v1377_v45 = vpop.f32.mrf.mxu0  ;;  %v1390_v16 = vpop.f32.mrf.mxu1 }
 0x68a   :  { %4703 = vtanh.f32 %v5861_v50 }
 0x68d   :  { %v1198_v41 = vpop.f32.mrf.mxu2  ;;  %v1211_v40 = vpop.f32.mrf.mxu3 }
 0x690   :  { %v4704_v13 = vpop.eup %4703  ;;  %v1489_v8 = vpop.f32.mrf.mxu0 }
 0x691   :  { %v1502_v53 = vpop.f32.mrf.mxu1  ;;  %1322 = vrot.lane.b32.xlu0 %v4704_v13, %s5176_s2 }
 0x695   :  { %v1349_v33 = vpop.f32.mrf.mxu2  ;;  %v1362_v51 = vpop.f32.mrf.mxu3 }
 0x696   :  { %v1350_v43 = vadd.f32 %v1349_v33, %v5688_v60  ;;  %v1363_v55 = vadd.f32 %v1362_v51, %v6832_v34 }
 0x698   :  { %v1392_v57 = vadd.f32 %v1375_v23, %v1350_v43  ;;  %v5867_v49 = vadd.f32 %v1388_v44, %v1363_v55  ;;  %v1491_v52 = vpop.f32.mrf.mxu0  ;;  %v6835_v55 = vld [vmem:[#allocation21_spill] sm:$0xff] }
 0x699   :  { %v1504_v42 = vpop.f32.mrf.mxu1  ;;  %v6836_v52 = vld [vmem:[#allocation50_spill] sm:$0xff] }
 0x69a   :  { %4705 = vtanh.f32 %v5867_v49  ;;  %v331_v42 = vadd.f32 %v6836_v52, %v6835_v55 }
 0x69d   :  { %v1351_v41 = vpop.f32.mrf.mxu2  ;;  %v1364_v40 = vpop.f32.mrf.mxu3 }
 0x6a0   :  { %v4706_v45 = vpop.eup %4705 }
 0x6a1   :  { %1435 = vrot.lane.b32.xlu1 %v4706_v45, %s5176_s2 }
 0x6a5   :  { %v1463_v16 = vpop.f32.mrf.mxu2  ;;  %v1476_v13 = vpop.f32.mrf.mxu3 }
 0x6a6   :  { %v1464_v31 = vadd.f32 %v1463_v16, %v6833_v54  ;;  %v1477_v33 = vadd.f32 %v1476_v13, %v6834_v30  ;;  %v6838_v54 = vld [vmem:[#allocation49_spill] sm:$0xff] }
 0x6a8   :  { %v1506_v60 = vadd.f32 %v1489_v8, %v1464_v31  ;;  %v5873_v51 = vadd.f32 %v1502_v53, %v1477_v33  ;;  %v4415_v8 = vmul.f32 -1.442695, %v1279_v59 }
 0x6aa   :  { %4707 = vtanh.f32 %v5873_v51  ;;  %v4427_v13 = vmul.f32 -1.442695, %v1506_v60 }
 0x6ad   :  { %v1465_v23 = vpop.f32.mrf.mxu2  ;;  %v1478_v44 = vpop.f32.mrf.mxu3 }
 0x6ae   :  { %v4421_v44 = vmul.f32 -1.442695, %v1392_v57  ;;  %v6837_v57 = vld [vmem:[#allocation22_spill] sm:$0xff] }
 0x6af   :  { %v302_v34 = vadd.f32 %v6838_v54, %v6837_v57 }
 0x6b0   :  { %v4708_v43 = vpop.eup %4707 }
 0x6b1   :  { %1549 = vrot.lane.b32.xlu2 %v4708_v43, %s5176_s2 }
 0x6b5   :  { %v1574_v41 = vpop.f32.mrf.mxu2  ;;  %v1587_v40 = vpop.f32.mrf.mxu3 }
 0x6b6   :  { %v5879_v45 = vadd.f32 %v1587_v40, %v331_v42  ;;  %v1591_v63 = vadd.f32 %v1574_v41, %v302_v34 }
 0x6b8   :  { %4709 = vtanh.f32 %v5879_v45  ;;  %v4431_v35 = vmul.f32 -1.442695, %v1591_v63 }
 0x6b9   :  { %4711 = vpow2.f32 %v4415_v8 }
 0x6ba   :  { %4713 = vpow2.f32 %v4427_v13 }
 0x6bd   :  { %v1576_v16 = vpop.f32.mrf.mxu2  ;;  %v1589_v31 = vpop.f32.mrf.mxu3 }
 0x6be   :  { %v4710_v53 = vpop.eup %4709 }
 0x6bf   :  { %1634 = vrot.lane.b32.xlu0 %v4710_v53, %s5176_s2  ;;  %v4712_v33 = vpop.eup %4711 }
 0x6c0   :  { %v1287_v23 = vadd.f32 1.0, %v4712_v33  ;;  %v4714_v43 = vpop.eup %4713 }
 0x6c1   :  { %v1514_v52 = vadd.f32 1.0, %v4714_v43 }
 0x6c2   :  { %4715 = vrcp.f32 %v1287_v23  ;;  %v1300_v33 = vand.u32 2147483648, %v1287_v23  ;;  %vm1294_vm6 = vweird.f32 %v1287_v23 }
 0x6c3   :  { %4717 = vpow2.f32 %v4421_v44  ;;  %v1298_v44 = vand.u32 2147483647, %v1287_v23  ;;  %vm1521_vm11 = vweird.f32 %v1514_v52  ;;  %v1525_v54 = vand.u32 2147483647, %v1514_v52 }
 0x6c4   :  { %4719 = vrcp.f32 %v1514_v52 }
 0x6c5   :  { %vm1299_vm8 = vcmp.eq.f32.partialorder %v1298_v44, 8.507059e+37  ;;  %vm1526_vm13 = vcmp.eq.f32.partialorder %v1525_v54, 8.507059e+37 }
 0x6c8   :  { %v4716_v42 = vpop.eup %4715 }
 0x6c9   :  { %v4718_v40 = vpop.eup %4717  ;;  %v1290_v55 = vmul.f32 %v4716_v42, %v1287_v23  ;;  %vm1295_vm5 = vweird.f32 %v4716_v42 }
 0x6ca   :  { %v1400_v16 = vadd.f32 1.0, %v4718_v40  ;;  %v4720_v30 = vpop.eup %4719  ;;  %vm1296_vm7 = vmor %vm1294_vm6, %vm1295_vm5 }
 0x6cb   :  { %v1291_v31 = vsub.f32 1.0, %v1290_v55  ;;  %v1517_v59 = vmul.f32 %v4720_v30, %v1514_v52  ;;  %v1301_v55 = vor.u32 1.1754944e-38, %v1300_v33  ;;  %vm1522_vm9 = vweird.f32 %v4720_v30 }
 0x6cc   :  { %4721 = vrcp.f32 %v1400_v16  ;;  %vm1523_vm12 = vmor %vm1521_vm11, %vm1522_vm9  ;;  %v1413_v63 = vand.u32 2147483648, %v1400_v16  ;;  %vm1407_vm15 = vweird.f32 %v1400_v16  ;;  %v1411_v33 = vand.u32 2147483647, %v1400_v16 }
 0x6cd   :  { %v1292_v53 = vmul.f32 %v4716_v42, %v1291_v31  ;;  %v1518_v13 = vsub.f32 1.0, %v1517_v59  ;;  %v1527_v59 = vand.u32 2147483648, %v1514_v52  ;;  %4723 = vpow2.f32 %v4431_v35 }
 0x6ce   :  { %vm1412_vm2 = vcmp.eq.f32.partialorder %v1411_v33, 8.507059e+37 }
 0x6cf   :  { %v1293_v60 = vadd.f32 %v4716_v42, %v1292_v53  ;;  %v1519_v40 = vmul.f32 %v4720_v30, %v1518_v13  ;;  %v1528_v41 = vor.u32 1.1754944e-38, %v1527_v59 }
 0x6d1   :  { %v1297_v61 = vsel %vm1296_vm7, %v4716_v42, %v1293_v60  ;;  %v1520_v36 = vadd.f32 %v4720_v30, %v1519_v40 }
 0x6d2   :  { %v4722_v8 = vpop.eup %4721  ;;  %v1302_v31 = vsel %vm1299_vm8, %v1301_v55, %v1297_v61 }
 0x6d3   :  { %v1403_v43 = vmul.f32 %v4722_v8, %v1400_v16  ;;  %v1524_v23 = vsel %vm1523_vm12, %v4720_v30, %v1520_v36  ;;  %vm1408_vm14 = vweird.f32 %v4722_v8  ;;  %v1320_v33 = vmul.f32 0.0, %v1302_v31 }
 0x6d4   :  { %v1529_v60 = vsel %vm1526_vm13, %v1528_v41, %v1524_v23  ;;  %vm1409_vm0 = vmor %vm1407_vm15, %vm1408_vm14 }
 0x6d5   :  { %v1404_v29 = vsub.f32 1.0, %v1403_v43  ;;  %v1414_v43 = vor.u32 1.1754944e-38, %v1413_v63 }
 0x6d7   :  { %v1405_v34 = vmul.f32 %v4722_v8, %v1404_v29 }
 0x6d9   :  { %v1406_v61 = vadd.f32 %v4722_v8, %v1405_v34 }
 0x6db   :  { %v1410_v44 = vsel %vm1409_vm0, %v4722_v8, %v1406_v61 }
 0x6dc   :  { %v1415_v36 = vsel %vm1412_vm2, %v1414_v43, %v1410_v44 }
 0x703   :  { %v1323_v26 = vpop.permute.xlu0 %1322 }
 0x704   :  { %v1325_v53 = vmul.f32 %v1323_v26, %v1302_v31  ;;  %v4724_v26 = vpop.eup %4723  ;;  %v6841_v31 = vld [vmem:[#allocation61_spill] sm:$0xff] }
 0x705   :  { %v1599_v52 = vadd.f32 1.0, %v4724_v26 }
 0x706   :  { %1327 = vrot.lane.b32.xlu1 %v1325_v53, %s5176_s2 }
 0x707   :  { %4725 = vrcp.f32 %v1599_v52  ;;  %v1612_v54 = vand.u32 2147483648, %v1599_v52  ;;  %vm1606_vm1 = vweird.f32 %v1599_v52  ;;  %v1610_v16 = vand.u32 2147483647, %v1599_v52 }
 0x709   :  { %v1613_v23 = vor.u32 1.1754944e-38, %v1612_v54  ;;  %vm1611_vm5 = vcmp.eq.f32.partialorder %v1610_v16, 8.507059e+37 }
 0x70b   :  { %v1550_v42 = vpop.permute.xlu2 %1549 }
 0x70c   :  { %v1552_v13 = vmul.f32 %v1550_v42, %v1529_v60 }
 0x70d   :  { %v4726_v29 = vpop.eup %4725 }
 0x70e   :  { %1554 = vrot.lane.b32.xlu0 %v1552_v13, %s5176_s2  ;;  %v1602_v40 = vmul.f32 %v4726_v29, %v1599_v52  ;;  %vm1607_vm3 = vweird.f32 %v4726_v29  ;;  %v6839_v13 = vld [vmem:[#allocation62_spill] sm:$0xff] }
 0x70f   :  { %vm1608_vm4 = vmor %vm1606_vm1, %vm1607_vm3  ;;  %v1433_v61 = vmul.f32 %v1415_v36, %v6839_v13 }
 0x710   :  { %v1603_v55 = vsub.f32 1.0, %v1602_v40 }
 0x712   :  { %v1604_v53 = vmul.f32 %v4726_v29, %v1603_v55 }
 0x713   :  { %v1436_v30 = vpop.permute.xlu1 %1435 }
 0x714   :  { %v1438_v35 = vmul.f32 %v1436_v30, %v1415_v36  ;;  %v1605_v59 = vadd.f32 %v4726_v29, %v1604_v53  ;;  %v6840_v30 = vld [vmem:[#allocation63_spill] sm:$0xff] }
 0x716   :  { %1440 = vrot.lane.b32.xlu2 %v1438_v35, %s5176_s2  ;;  %v1609_v8 = vsel %vm1608_vm4, %v4726_v29, %v1605_v59  ;;  %v1547_v35 = vmul.f32 %v1529_v60, %v6840_v30  ;;  %v4416_v60 = vmul.f32 -1.442695, %v5861_v50 }
 0x717   :  { %v1614_v41 = vsel %vm1611_vm5, %v1613_v23, %v1609_v8 }
 0x718   :  { %v1632_v53 = vmul.f32 %v1614_v41, %v6841_v31 }
 0x731   :  { %v1635_v34 = vpop.permute.xlu0 %1634 }
 0x732   :  { %v1637_v42 = vmul.f32 %v1635_v34, %v1614_v41  ;;  %v4422_v34 = vmul.f32 -1.442695, %v5867_v49 }
 0x734   :  { %1639 = vrot.lane.b32.xlu1 %v1637_v42, %s5176_s2 }
 0x770   :  { %v1441_v63 = vpop.permute.xlu2 %1440 }
 0x771   :  { %v5890_v26 = vadd.f32 %v1441_v63, %v1433_v61 }
 0x773   :  { %4727 = vtanh.f32 %v5890_v26 }
 0x778   :  { %v1328_v44 = vpop.permute.xlu1 %1327 }
 0x779   :  { %v4728_v43 = vpop.eup %4727  ;;  %v5893_v52 = vadd.f32 %v1328_v44, %v1320_v33  ;;  %v4428_v33 = vmul.f32 -1.442695, %v5873_v51  ;;  %v4432_v51 = vmul.f32 -1.442695, %v5879_v45  ;;  %v6845_v45 = vld [vmem:[#allocation25_spill] sm:$0xff] }
 0x77a   :  { %1446 = vrot.lane.b32.xlu0 %v4728_v43, %s5176_s2 }
 0x77b   :  { %4729 = vtanh.f32 %v5893_v52 }
 0x780   :  { %v1555_v29 = vpop.permute.xlu0 %1554 }
 0x781   :  { %v4730_v40 = vpop.eup %4729  ;;  %v5898_v55 = vadd.f32 %v1555_v29, %v1547_v35 }
 0x782   :  { %1333 = vrot.lane.b32.xlu2 %v4730_v40, %s5176_s2 }
 0x783   :  { %4731 = vtanh.f32 %v5898_v55 }
 0x789   :  { %v4732_v36 = vpop.eup %4731 }
 0x78a   :  { %1560 = vrot.lane.b32.xlu1 %v4732_v36, %s5176_s2 }
 0x7a6   :  { %v1640_v59 = vpop.permute.xlu1 %1639 }
 0x7a7   :  { %v5904_v54 = vadd.f32 %v1640_v59, %v1632_v53 }
 0x7a9   :  { %4733 = vtanh.f32 %v5904_v54 }
 0x7aa   :  { %4735 = vpow2.f32 %v4416_v60 }
 0x7af   :  { %v4734_v16 = vpop.eup %4733 }
 0x7b0   :  { %1645 = vrot.lane.b32.xlu2 %v4734_v16, %s5176_s2  ;;  %v4736_v8 = vpop.eup %4735 }
 0x7b1   :  { %v1288_v23 = vadd.f32 1.0, %v4736_v8 }
 0x7b3   :  { %4737 = vrcp.f32 %v1288_v23  ;;  %v1315_v30 = vand.u32 2147483648, %v1288_v23  ;;  %vm1309_vm7 = vweird.f32 %v1288_v23  ;;  %v1313_v35 = vand.u32 2147483647, %v1288_v23 }
 0x7b4   :  { %4739 = vpow2.f32 %v4422_v34  ;;  %v6842_v34 = vld [vmem:[#allocation24_spill] sm:$0xff] }
 0x7b5   :  { %v1316_v36 = vor.u32 1.1754944e-38, %v1315_v30  ;;  %vm1314_vm9 = vcmp.eq.f32.partialorder %v1313_v35, 8.507059e+37 }
 0x7b9   :  { %v4738_v42 = vpop.eup %4737 }
 0x7ba   :  { %v4740_v13 = vpop.eup %4739  ;;  %v1305_v41 = vmul.f32 %v4738_v42, %v1288_v23  ;;  %vm1310_vm6 = vweird.f32 %v4738_v42 }
 0x7bb   :  { %v1401_v61 = vadd.f32 1.0, %v4740_v13  ;;  %vm1311_vm8 = vmor %vm1309_vm7, %vm1310_vm6 }
 0x7bc   :  { %v1306_v63 = vsub.f32 1.0, %v1305_v41 }
 0x7bd   :  { %4741 = vrcp.f32 %v1401_v61  ;;  %vm1422_vm12 = vweird.f32 %v1401_v61 }
 0x7be   :  { %v1307_v44 = vmul.f32 %v4738_v42, %v1306_v63  ;;  %4743 = vpow2.f32 %v4428_v33  ;;  %v1428_v63 = vand.u32 2147483648, %v1401_v61  ;;  %v6844_v33 = vld [vmem:[#allocation26_spill] sm:$0xff] }
 0x7c0   :  { %v1308_v50 = vadd.f32 %v4738_v42, %v1307_v44 }
 0x7c2   :  { %v1312_v29 = vsel %vm1311_vm8, %v4738_v42, %v1308_v50  ;;  %v6843_v42 = vld [vmem:[#allocation23_spill] sm:$0xff]  ;;  %v1426_v50 = vand.u32 2147483647, %v1401_v61 }
 0x7c3   :  { %v4742_v43 = vpop.eup %4741  ;;  %v1317_v53 = vsel %vm1314_vm9, %v1316_v36, %v1312_v29  ;;  %v1429_v29 = vor.u32 1.1754944e-38, %v1428_v63  ;;  %v6847_v36 = vld [vmem:[#allocation27_spill] sm:$0xff] }
 0x7c4   :  { %v4744_v49 = vpop.eup %4743  ;;  %v1418_v40 = vmul.f32 %v4742_v43, %v1401_v61  ;;  %vm1423_vm11 = vweird.f32 %v4742_v43  ;;  %vm1427_vm14 = vcmp.eq.f32.partialorder %v1426_v50, 8.507059e+37  ;;  %v6849_v61 = vld [vmem:[#allocation29_spill] sm:$0xff] }
 0x7c5   :  { %v1515_v31 = vadd.f32 1.0, %v4744_v49  ;;  %vm1424_vm13 = vmor %vm1422_vm12, %vm1423_vm11 }
 0x7c6   :  { %v1419_v60 = vsub.f32 1.0, %v1418_v40  ;;  %v6846_v40 = vld [vmem:[#allocation28_spill] sm:$0xff] }
 0x7c7   :  { %4745 = vrcp.f32 %v1515_v31  ;;  %v1542_v63 = vand.u32 2147483648, %v1515_v31  ;;  %vm1536_vm0 = vweird.f32 %v1515_v31 }
 0x7c8   :  { %4747 = vpow2.f32 %v4432_v51  ;;  %v1420_v23 = vmul.f32 %v4742_v43, %v1419_v60  ;;  %v6848_v60 = vld [vmem:[#allocation30_spill] sm:$0xff] }
 0x7ca   :  { %v1421_v13 = vadd.f32 %v4742_v43, %v1420_v23 }
 0x7cc   :  { %v1425_v30 = vsel %vm1424_vm13, %v4742_v43, %v1421_v13 }
 0x7cd   :  { %v4746_v41 = vpop.eup %4745 }
 0x7ce   :  { %v4748_v44 = vpop.eup %4747  ;;  %v1532_v35 = vmul.f32 %v4746_v41, %v1515_v31  ;;  %vm1537_vm15 = vweird.f32 %v4746_v41 }
 0x7cf   :  { %v5918_v49 = vadd.f32 1.0, %v4748_v44  ;;  %v1540_v44 = vand.u32 2147483647, %v1515_v31  ;;  %vm1538_vm2 = vmor %vm1536_vm0, %vm1537_vm15 }
 0x7d1   :  { %4749 = vrcp.f32 %v5918_v49  ;;  %vm1541_vm3 = vcmp.eq.f32.partialorder %v1540_v44, 8.507059e+37  ;;  %vm1621_vm4 = vweird.f32 %v5918_v49 }
 0x7d7   :  { %v4750_v23 = vpop.eup %4749 }
 0x7d8   :  { %v1617_v50 = vmul.f32 %v4750_v23, %v5918_v49  ;;  %vm1622_vm1 = vweird.f32 %v4750_v23 }
 0x7d9   :  { %vm1623_vm5 = vmor %vm1621_vm4, %vm1622_vm1 }
 0x7dc   :  { %v1334_v59 = vpop.permute.xlu2 %1333 }
 0x7dd   :  { %v1336_v16 = vmul.f32 %v1334_v59, %v1317_v53  ;;  %v1430_v53 = vsel %vm1427_vm14, %v1429_v29, %v1425_v30  ;;  %v1618_v29 = vsub.f32 1.0, %v1617_v50 }
 0x7df   :  { %v1679_v8 = vpack.c.bf16 %v1336_v16, %v1336_v16  ;;  %v1533_v16 = vsub.f32 1.0, %v1532_v35  ;;  %v1543_v35 = vor.u32 1.1754944e-38, %v1542_v63 }
 0x7e1   :  { %4435 = vmatmul.msk.bf16.vlgmr.msra.gmra.mxu2 %vm383_vm10, %v1679_v8  ;;  %4436 = vmatmul.msk.bf16.vlgmr.msra.gmra.mxu3 %vm383_vm10, %v1679_v8  ;;  %v1534_v8 = vmul.f32 %v4746_v41, %v1533_v16  ;;  %v1619_v16 = vmul.f32 %v4750_v23, %v1618_v29  ;;  %v6852_v29 = vld [vmem:[#allocation68_spill] sm:$0xff] }
 0x7e2   :  { %1914 = vmatpush.bf16.msra.mxu2 %v6842_v34  ;;  %1927 = vmatpush.bf16.msra.mxu3 %v6843_v42 }
 0x7e3   :  { %v1535_v13 = vadd.f32 %v4746_v41, %v1534_v8  ;;  %v1625_v8 = vand.u32 2147483647, %v5918_v49 }
 0x7e5   :  { %v1539_v30 = vsel %vm1538_vm2, %v4746_v41, %v1535_v13  ;;  %v1620_v41 = vadd.f32 %v4750_v23, %v1619_v16  ;;  %vm1626_vm6 = vcmp.eq.f32.partialorder %v1625_v8, 8.507059e+37  ;;  %v6857_v16 = vld [vmem:[#allocation36_spill] sm:$0xff] }
 0x7e6   :  { %1915 = vmatpush.bf16.msra.mxu2 %v6844_v33  ;;  %1928 = vmatpush.bf16.msra.mxu3 %v6845_v45  ;;  %v1544_v31 = vsel %vm1541_vm3, %v1543_v35, %v1539_v30  ;;  %v6851_v35 = vld [vmem:[#allocation67_spill] sm:$0xff]  ;;  %v6860_v8 = vld [vmem:[#allocation40_spill] sm:$0xff] }
 0x7e7   :  { %v1624_v13 = vsel %vm1623_vm5, %v4750_v23, %v1620_v41  ;;  %v6850_v23 = vld [vmem:[#allocation66_spill] sm:$0xff]  ;;  %v6858_v41 = vld [vmem:[#allocation37_spill] sm:$0xff] }
 0x7ea   :  { %1916 = vmatpush.bf16.msra.mxu2 %v6846_v40  ;;  %1929 = vmatpush.bf16.msra.mxu3 %v6847_v36 }
 0x7ec   :  { %v1447_v59 = vpop.permute.xlu0 %1446 }
 0x7ed   :  { %v1449_v51 = vmul.f32 %v1447_v59, %v1430_v53 }
 0x7ee   :  { %1917 = vmatpush.bf16.msra.mxu2 %v6848_v60  ;;  %1930 = vmatpush.bf16.msra.mxu3 %v6849_v61 }
 0x7ef   :  { %v1450_v43 = vpack.c.bf16 %v1449_v51, %v1449_v51 }
 0x7f1   :  { %4433 = vmatmul.msk.bf16.vlgmr.msrb.gmra.mxu0 %vm383_vm10, %v1450_v43  ;;  %4434 = vmatmul.msk.bf16.vlgmr.msrb.gmra.mxu1 %vm383_vm10, %v1450_v43 }
 0x7f2   :  { %4441 = vmatmul.msk.bf16.vlgmr.msrb.gmra.mxu2 %vm383_vm10, %v1450_v43  ;;  %4442 = vmatmul.msk.bf16.vlgmr.msrb.gmra.mxu3 %vm383_vm10, %v1450_v43  ;;  %v1627_v43 = vand.u32 2147483648, %v5918_v49 }
 0x7f3   :  { %1901 = vmatpush.bf16.msrb.mxu1 %v5407_v2  ;;  %1888 = vmatpush.bf16.msrb.mxu0 %v5418_v7 }
 0x7f4   :  { %2100 = vmatpush.bf16.msrb.mxu3 %v5718_v27  ;;  %2087 = vmatpush.bf16.msrb.mxu2 %v5723_v20  ;;  %v1628_v63 = vor.u32 1.1754944e-38, %v1627_v43  ;;  %v6859_v43 = vld [vmem:[#allocation38_spill] sm:$0xff] }
 0x7f6   :  { %v1629_v44 = vsel %vm1626_vm6, %v1628_v63, %v1624_v13  ;;  %v6861_v13 = vld [vmem:[#allocation41_spill] sm:$0xff]  ;;  %v6862_v63 = vld [vmem:[#allocation44_spill] sm:$0xff] }
 0x7f7   :  { %1902 = vmatpush.bf16.msrb.mxu1 %v5427_v11  ;;  %1889 = vmatpush.bf16.msrb.mxu0 %v5430_v12 }
 0x7f8   :  { %2101 = vmatpush.bf16.msrb.mxu3 %v5729_v0  ;;  %2088 = vmatpush.bf16.msrb.mxu2 %v5732_v38 }
 0x7fb   :  { %1903 = vmatpush.bf16.msrb.mxu1 %v5445_v18  ;;  %1890 = vmatpush.bf16.msrb.mxu0 %v5448_v19 }
 0x7fc   :  { %v1561_v53 = vpop.permute.xlu1 %1560  ;;  %2102 = vmatpush.bf16.msrb.mxu3 %v5742_v28  ;;  %2089 = vmatpush.bf16.msrb.mxu2 %v5744_v25 }
 0x7fd   :  { %v1563_v59 = vmul.f32 %v1561_v53, %v1544_v31  ;;  %v6853_v31 = vld [vmem:[#allocation69_spill] sm:$0xff]  ;;  %v6854_v53 = vld [vmem:[#allocation70_spill] sm:$0xff] }
 0x7ff   :  { %v1564_v51 = vpack.c.bf16 %v1563_v59, %v1563_v59  ;;  %1904 = vmatpush.bf16.msrb.mxu1 %v5466_v37  ;;  %1891 = vmatpush.bf16.msrb.mxu0 %v5471_v39  ;;  %v6855_v59 = vld [vmem:[#allocation71_spill] sm:$0xff] }
 0x800   :  { %2103 = vmatpush.bf16.msrb.mxu3 %v5770_v47  ;;  %2090 = vmatpush.bf16.msrb.mxu2 %v5772_v32 }
 0x801   :  { %4439 = vmatmul.msk.bf16.vlgmr.msra.gmra.mxu0 %vm383_vm10, %v1564_v51  ;;  %4440 = vmatmul.msk.bf16.vlgmr.msra.gmra.mxu1 %vm383_vm10, %v1564_v51 }
 0x802   :  { %4447 = vmatmul.msk.bf16.vlgmr.msra.gmra.mxu2 %vm383_vm10, %v1564_v51  ;;  %4448 = vmatmul.msk.bf16.vlgmr.msra.gmra.mxu3 %vm383_vm10, %v1564_v51  ;;  %v6856_v51 = vld [vmem:[#allocation35_spill] sm:$0xff] }
 0x803   :  { %1999 = vmatpush.bf16.msra.mxu0 %v5332_v15  ;;  %2012 = vmatpush.bf16.msra.mxu1 %v5312_v4 }
 0x804   :  { %2217 = vmatpush.bf16.msra.mxu3 %v5540_v10  ;;  %2204 = vmatpush.bf16.msra.mxu2 %v5569_v14 }
 0x807   :  { %2000 = vmatpush.bf16.msra.mxu0 %v5345_v21  ;;  %2013 = vmatpush.bf16.msra.mxu1 %v5318_v9 }
 0x808   :  { %2218 = vmatpush.bf16.msra.mxu3 %v5545_v22  ;;  %2205 = vmatpush.bf16.msra.mxu2 %v5616_v62 }
 0x80a   :  { %v1646_v50 = vpop.permute.xlu2 %1645 }
 0x80b   :  { %v1648_v30 = vmul.f32 %v1646_v50, %v1629_v44  ;;  %2001 = vmatpush.bf16.msra.mxu0 %v6826_v46  ;;  %2014 = vmatpush.bf16.msra.mxu1 %v6827_v1  ;;  %v6863_v44 = vld [vmem:[#allocation45_spill] sm:$0xff] }
 0x80c   :  { %2219 = vmatpush.bf16.msra.mxu3 %v5560_v56  ;;  %2206 = vmatpush.bf16.msra.mxu2 %v5619_v5 }
 0x80d   :  { %v1649_v49 = vpack.c.bf16 %v1648_v30, %v1648_v30 }
 0x80f   :  { %2002 = vmatpush.bf16.msra.mxu0 %v6828_v58  ;;  %2015 = vmatpush.bf16.msra.mxu1 %v6829_v3  ;;  %v6868_v3 = vld [vmem:[#allocation31_spill] sm:$0xff] }
 0x810   :  { %2220 = vmatpush.bf16.msra.mxu3 %v5572_v17  ;;  %2207 = vmatpush.bf16.msra.mxu2 %v5623_v48  ;;  %v6866_v48 = vld [vmem:[#allocation60_spill] sm:$0xff] }
 0x811   :  { %4445 = vmatmul.msk.bf16.vlgmr.msrb.gmra.mxu0 %vm383_vm10, %v1649_v49  ;;  %4446 = vmatmul.msk.bf16.vlgmr.msrb.gmra.mxu1 %vm383_vm10, %v1649_v49 }
 0x813   :  { %2117 = vmatpush.bf16.msrb.mxu0 %v5708_v6  ;;  %2130 = vmatpush.bf16.msrb.mxu1 %v5710_v24 }
 0x817   :  { %2118 = vmatpush.bf16.msrb.mxu0 %v6850_v23  ;;  %2131 = vmatpush.bf16.msrb.mxu1 %v6851_v35 }
 0x81b   :  { %2119 = vmatpush.bf16.msrb.mxu0 %v6852_v29  ;;  %2132 = vmatpush.bf16.msrb.mxu1 %v6853_v31  ;;  %v6864_v31 = vld [vmem:[#allocation76_spill] sm:$0xff]  ;;  %v6865_v29 = vld [vmem:[#allocation77_spill] sm:$0xff] }
 0x81f   :  { %2120 = vmatpush.bf16.msrb.mxu0 %v6854_v53  ;;  %2133 = vmatpush.bf16.msrb.mxu1 %v6855_v59 }
 0x821   :  { %4451 = vmatmul.msk.bf16.vlgmr.msra.gmra.mxu0 %vm383_vm10, %v1649_v49  ;;  %4452 = vmatmul.msk.bf16.vlgmr.msra.gmra.mxu1 %vm383_vm10, %v1649_v49 }
 0x823   :  { %2230 = vmatpush.bf16.msra.mxu0 %v6856_v51  ;;  %2243 = vmatpush.bf16.msra.mxu1 %v6857_v16 }
 0x827   :  { %2231 = vmatpush.bf16.msra.mxu0 %v6858_v41  ;;  %2244 = vmatpush.bf16.msra.mxu1 %v6859_v43 }
 0x82b   :  { %2232 = vmatpush.bf16.msra.mxu0 %v6860_v8  ;;  %2245 = vmatpush.bf16.msra.mxu1 %v6861_v13 }
 0x82f   :  { %2233 = vmatpush.bf16.msra.mxu0 %v6862_v63  ;;  %2246 = vmatpush.bf16.msra.mxu1 %v6863_v44 }
 0x864   :  { %v1692_v50 = vpop.f32.mrf.mxu2  ;;  %v1705_v30 = vpop.f32.mrf.mxu3 }
 0x86c   :  { %v1694_v59 = vpop.f32.mrf.mxu2  ;;  %v1707_v49 = vpop.f32.mrf.mxu3 }
 0x86e   :  { %v1662_v53 = vpop.f32.mrf.mxu0  ;;  %v1675_v51 = vpop.f32.mrf.mxu1 }
 0x86f   :  { %v1663_v16 = vadd.f32 %v1662_v53, %v6864_v31  ;;  %v1676_v41 = vadd.f32 %v1675_v51, %v6865_v29  ;;  %v6867_v31 = vld [vmem:[#allocation59_spill] sm:$0xff] }
 0x871   :  { %v1709_v35 = vadd.f32 %v1692_v50, %v1663_v16  ;;  %v5991_v43 = vadd.f32 %v1705_v30, %v1676_v41 }
 0x873   :  { %4751 = vtanh.f32 %v5991_v43 }
 0x875   :  { %v1805_v13 = vpop.f32.mrf.mxu2  ;;  %v1818_v8 = vpop.f32.mrf.mxu3 }
 0x876   :  { %v1664_v63 = vpop.f32.mrf.mxu0  ;;  %v1677_v23 = vpop.f32.mrf.mxu1 }
 0x879   :  { %v4752_v44 = vpop.eup %4751 }
 0x87a   :  { %1752 = vrot.lane.b32.xlu1 %v4752_v44, %s5176_s2 }
 0x87d   :  { %v1807_v59 = vpop.f32.mrf.mxu2  ;;  %v1820_v49 = vpop.f32.mrf.mxu3 }
 0x87e   :  { %v1779_v24 = vpop.f32.mrf.mxu0  ;;  %v1792_v6 = vpop.f32.mrf.mxu1 }
 0x87f   :  { %v1780_v53 = vadd.f32 %v1779_v24, %v6866_v48  ;;  %v1793_v51 = vadd.f32 %v1792_v6, %v6867_v31  ;;  %v6869_v48 = vld [vmem:[#allocation32_spill] sm:$0xff] }
 0x881   :  { %v1822_v16 = vadd.f32 %v1805_v13, %v1780_v53  ;;  %v5997_v41 = vadd.f32 %v1818_v8, %v1793_v51 }
 0x883   :  { %4753 = vtanh.f32 %v5997_v41 }
 0x885   :  { %v1919_v50 = vpop.f32.mrf.mxu2  ;;  %v1932_v30 = vpop.f32.mrf.mxu3 }
 0x886   :  { %v1781_v63 = vpop.f32.mrf.mxu0  ;;  %v1794_v23 = vpop.f32.mrf.mxu1 }
 0x887   :  { %v6870_v23 = vld [vmem:[#allocation21_spill] sm:$0xff] }
 0x889   :  { %v4754_v29 = vpop.eup %4753 }
 0x88a   :  { %1865 = vrot.lane.b32.xlu0 %v4754_v29, %s5176_s2  ;;  %v6871_v29 = vld [vmem:[#allocation52_spill] sm:$0xff] }
 0x88d   :  { %v1921_v44 = vpop.f32.mrf.mxu2  ;;  %v1934_v59 = vpop.f32.mrf.mxu3 }
 0x88e   :  { %v1893_v49 = vpop.f32.mrf.mxu0  ;;  %v1906_v17 = vpop.f32.mrf.mxu1  ;;  %v334_v44 = vadd.f32 %v6871_v29, %v6870_v23  ;;  %v6872_v59 = vld [vmem:[#allocation51_spill] sm:$0xff]  ;;  %v4443_v29 = vmul.f32 -1.442695, %v1822_v16 }
 0x88f   :  { %v1894_v24 = vadd.f32 %v1893_v49, %v6868_v3  ;;  %v1907_v6 = vadd.f32 %v1906_v17, %v6869_v48  ;;  %v305_v31 = vadd.f32 %v6872_v59, %v6837_v57 }
 0x891   :  { %v1936_v13 = vadd.f32 %v1919_v50, %v1894_v24  ;;  %v6003_v8 = vadd.f32 %v1932_v30, %v1907_v6  ;;  %v4437_v6 = vmul.f32 -1.442695, %v1709_v35 }
 0x893   :  { %4755 = vtanh.f32 %v6003_v8 }
 0x896   :  { %v1895_v53 = vpop.f32.mrf.mxu0  ;;  %v1908_v51 = vpop.f32.mrf.mxu1 }
 0x897   :  { %v4449_v53 = vmul.f32 -1.442695, %v1936_v13 }
 0x899   :  { %v4756_v63 = vpop.eup %4755 }
 0x89a   :  { %1979 = vrot.lane.b32.xlu2 %v4756_v63, %s5176_s2 }
 0x89e   :  { %v2004_v58 = vpop.f32.mrf.mxu0  ;;  %v2017_v49 = vpop.f32.mrf.mxu1 }
 0x89f   :  { %v2021_v3 = vadd.f32 %v2004_v58, %v305_v31  ;;  %v6011_v17 = vadd.f32 %v2017_v49, %v334_v44 }
 0x8a1   :  { %4757 = vtanh.f32 %v6011_v17  ;;  %v4453_v56 = vmul.f32 -1.442695, %v2021_v3 }
 0x8a2   :  { %4759 = vpow2.f32 %v4437_v6 }
 0x8a3   :  { %4761 = vpow2.f32 %v4449_v53 }
 0x8a6   :  { %v2006_v50 = vpop.f32.mrf.mxu0  ;;  %v2019_v30 = vpop.f32.mrf.mxu1 }
 0x8a7   :  { %v4758_v24 = vpop.eup %4757 }
 0x8a8   :  { %2064 = vrot.lane.b32.xlu0 %v4758_v24, %s5176_s2  ;;  %v4760_v51 = vpop.eup %4759 }
 0x8a9   :  { %v1717_v63 = vadd.f32 1.0, %v4760_v51  ;;  %v4762_v59 = vpop.eup %4761 }
 0x8aa   :  { %v1944_v58 = vadd.f32 1.0, %v4762_v59 }
 0x8ab   :  { %4763 = vrcp.f32 %v1717_v63  ;;  %v1730_v51 = vand.u32 2147483648, %v1717_v63  ;;  %vm1724_vm8 = vweird.f32 %v1717_v63  ;;  %v1728_v16 = vand.u32 2147483647, %v1717_v63 }
 0x8ac   :  { %4765 = vpow2.f32 %v4443_v29  ;;  %v1957_v46 = vand.u32 2147483648, %v1944_v58  ;;  %vm1951_vm13 = vweird.f32 %v1944_v58 }
 0x8ad   :  { %4767 = vrcp.f32 %v1944_v58  ;;  %v1731_v48 = vor.u32 1.1754944e-38, %v1730_v51  ;;  %vm1729_vm11 = vcmp.eq.f32.partialorder %v1728_v16, 8.507059e+37 }
 0x8b1   :  { %v4764_v31 = vpop.eup %4763 }
 0x8b2   :  { %v4766_v44 = vpop.eup %4765  ;;  %v1720_v49 = vmul.f32 %v4764_v31, %v1717_v63  ;;  %vm1725_vm7 = vweird.f32 %v4764_v31 }
 0x8b3   :  { %v1830_v50 = vadd.f32 1.0, %v4766_v44  ;;  %v4768_v57 = vpop.eup %4767  ;;  %vm1726_vm9 = vmor %vm1724_vm8, %vm1725_vm7 }
 0x8b4   :  { %v1721_v30 = vsub.f32 1.0, %v1720_v49  ;;  %v1947_v35 = vmul.f32 %v4768_v57, %v1944_v58  ;;  %vm1952_vm12 = vweird.f32 %v4768_v57 }
 0x8b5   :  { %4769 = vrcp.f32 %v1830_v50  ;;  %vm1953_vm14 = vmor %vm1951_vm13, %vm1952_vm12  ;;  %v1843_v3 = vand.u32 2147483648, %v1830_v50  ;;  %vm1837_vm2 = vweird.f32 %v1830_v50 }
 0x8b6   :  { %v1722_v24 = vmul.f32 %v4764_v31, %v1721_v30  ;;  %v1948_v53 = vsub.f32 1.0, %v1947_v35  ;;  %4771 = vpow2.f32 %v4453_v56 }
 0x8b7   :  { %v1844_v16 = vor.u32 1.1754944e-38, %v1843_v3 }
 0x8b8   :  { %v1723_v13 = vadd.f32 %v4764_v31, %v1722_v24  ;;  %v1949_v23 = vmul.f32 %v4768_v57, %v1948_v53  ;;  %v1955_v24 = vand.u32 2147483647, %v1944_v58 }
 0x8ba   :  { %v1727_v59 = vsel %vm1726_vm9, %v4764_v31, %v1723_v13  ;;  %v1950_v30 = vadd.f32 %v4768_v57, %v1949_v23  ;;  %v1958_v31 = vor.u32 1.1754944e-38, %v1957_v46  ;;  %vm1956_vm15 = vcmp.eq.f32.partialorder %v1955_v24, 8.507059e+37 }
 0x8bb   :  { %v4770_v6 = vpop.eup %4769  ;;  %v1732_v44 = vsel %vm1729_vm11, %v1731_v48, %v1727_v59  ;;  %v1841_v23 = vand.u32 2147483647, %v1830_v50 }
 0x8bc   :  { %v1833_v29 = vmul.f32 %v4770_v6, %v1830_v50  ;;  %v1954_v63 = vsel %vm1953_vm14, %v4768_v57, %v1950_v30  ;;  %vm1838_vm0 = vweird.f32 %v4770_v6 }
 0x8bd   :  { %v1959_v53 = vsel %vm1956_vm15, %v1958_v31, %v1954_v63  ;;  %vm1839_vm3 = vmor %vm1837_vm2, %vm1838_vm0  ;;  %vm1842_vm1 = vcmp.eq.f32.partialorder %v1841_v23, 8.507059e+37 }
 0x8be   :  { %v1834_v49 = vsub.f32 1.0, %v1833_v29 }
 0x8c0   :  { %v1835_v35 = vmul.f32 %v4770_v6, %v1834_v49 }
 0x8c2   :  { %v1836_v48 = vadd.f32 %v4770_v6, %v1835_v35 }
 0x8ec   :  { %v1753_v5 = vpop.permute.xlu1 %1752 }
 0x8ed   :  { %v1755_v1 = vmul.f32 %v1753_v5, %v1732_v44  ;;  %v4772_v5 = vpop.eup %4771 }
 0x8ee   :  { %v2029_v58 = vadd.f32 1.0, %v4772_v5 }
 0x8ef   :  { %1757 = vrot.lane.b32.xlu2 %v1755_v1, %s5176_s2  ;;  %v1840_v1 = vsel %vm1839_vm3, %v4770_v6, %v1836_v48  ;;  %v1750_v48 = vmul.f32 %v1732_v44, %v5893_v52 }
 0x8f0   :  { %v1845_v57 = vsel %vm1842_vm1, %v1844_v16, %v1840_v1  ;;  %4773 = vrcp.f32 %v2029_v58  ;;  %v2042_v63 = vand.u32 2147483648, %v2029_v58  ;;  %vm2036_vm5 = vweird.f32 %v2029_v58 }
 0x8f1   :  { %v2040_v50 = vand.u32 2147483647, %v2029_v58  ;;  %v1977_v1 = vmul.f32 %v1959_v53, %v5898_v55 }
 0x8f2   :  { %v2043_v35 = vor.u32 1.1754944e-38, %v2042_v63 }
 0x8f3   :  { %vm2041_vm7 = vcmp.eq.f32.partialorder %v2040_v50, 8.507059e+37 }
 0x8f4   :  { %v1980_v13 = vpop.permute.xlu2 %1979 }
 0x8f5   :  { %v1982_v51 = vmul.f32 %v1980_v13, %v1959_v53 }
 0x8f6   :  { %v4774_v29 = vpop.eup %4773 }
 0x8f7   :  { %1984 = vrot.lane.b32.xlu0 %v1982_v51, %s5176_s2  ;;  %v2032_v59 = vmul.f32 %v4774_v29, %v2029_v58  ;;  %vm2037_vm4 = vweird.f32 %v4774_v29 }
 0x8f8   :  { %vm2038_vm6 = vmor %vm2036_vm5, %vm2037_vm4 }
 0x8f9   :  { %v2033_v49 = vsub.f32 1.0, %v2032_v59 }
 0x8fb   :  { %v2034_v30 = vmul.f32 %v4774_v29, %v2033_v49 }
 0x8fc   :  { %v1866_v56 = vpop.permute.xlu0 %1865 }
 0x8fd   :  { %v1868_v46 = vmul.f32 %v1866_v56, %v1845_v57  ;;  %v2035_v24 = vadd.f32 %v4774_v29, %v2034_v30  ;;  %v1863_v56 = vmul.f32 %v1845_v57, %v5890_v26  ;;  %v4438_v26 = vmul.f32 -1.442695, %v5991_v43 }
 0x8ff   :  { %1870 = vrot.lane.b32.xlu1 %v1868_v46, %s5176_s2  ;;  %v2039_v6 = vsel %vm2038_vm6, %v4774_v29, %v2035_v24  ;;  %v4444_v24 = vmul.f32 -1.442695, %v5997_v41 }
 0x900   :  { %v2044_v13 = vsel %vm2041_vm7, %v2043_v35, %v2039_v6 }
 0x901   :  { %v2062_v55 = vmul.f32 %v2044_v13, %v5904_v54 }
 0x91a   :  { %v2065_v31 = vpop.permute.xlu0 %2064 }
 0x91b   :  { %v2067_v51 = vmul.f32 %v2065_v31, %v2044_v13  ;;  %v4450_v31 = vmul.f32 -1.442695, %v6003_v8  ;;  %v4454_v8 = vmul.f32 -1.442695, %v6011_v17 }
 0x91d   :  { %2069 = vrot.lane.b32.xlu1 %v2067_v51, %s5176_s2 }
 0x949   :  { %v1758_v3 = vpop.permute.xlu2 %1757 }
 0x94a   :  { %v6020_v5 = vadd.f32 %v1758_v3, %v1750_v48 }
 0x94c   :  { %4775 = vtanh.f32 %v6020_v5 }
 0x952   :  { %v4776_v23 = vpop.eup %4775 }
 0x953   :  { %1763 = vrot.lane.b32.xlu0 %v4776_v23, %s5176_s2 }
 0x969   :  { %v1985_v58 = vpop.permute.xlu0 %1984 }
 0x96a   :  { %v6025_v16 = vadd.f32 %v1985_v58, %v1977_v1 }
 0x96c   :  { %4777 = vtanh.f32 %v6025_v16 }
 0x971   :  { %v1871_v46 = vpop.permute.xlu1 %1870 }
 0x972   :  { %v4778_v29 = vpop.eup %4777  ;;  %v6029_v52 = vadd.f32 %v1871_v46, %v1863_v56 }
 0x973   :  { %1990 = vrot.lane.b32.xlu1 %v4778_v29, %s5176_s2 }
 0x974   :  { %4779 = vtanh.f32 %v6029_v52 }
 0x97a   :  { %v4780_v44 = vpop.eup %4779 }
 0x97b   :  { %1876 = vrot.lane.b32.xlu2 %v4780_v44, %s5176_s2 }
 0x98f   :  { %v2070_v53 = vpop.permute.xlu1 %2069 }
 0x990   :  { %v6035_v59 = vadd.f32 %v2070_v53, %v2062_v55 }
 0x992   :  { %4781 = vtanh.f32 %v6035_v59 }
 0x993   :  { %4783 = vpow2.f32 %v4438_v26 }
 0x998   :  { %v4782_v49 = vpop.eup %4781 }
 0x999   :  { %2075 = vrot.lane.b32.xlu2 %v4782_v49, %s5176_s2  ;;  %v4784_v57 = vpop.eup %4783 }
 0x99a   :  { %v1718_v30 = vadd.f32 1.0, %v4784_v57 }
 0x99c   :  { %4785 = vrcp.f32 %v1718_v30  ;;  %v1745_v48 = vand.u32 2147483648, %v1718_v30  ;;  %vm1739_vm9 = vweird.f32 %v1718_v30  ;;  %v1743_v3 = vand.u32 2147483647, %v1718_v30 }
 0x99d   :  { %4787 = vpow2.f32 %v4444_v24 }
 0x99e   :  { %v1746_v58 = vor.u32 1.1754944e-38, %v1745_v48  ;;  %vm1744_vm12 = vcmp.eq.f32.partialorder %v1743_v3, 8.507059e+37 }
 0x9a2   :  { %v4786_v63 = vpop.eup %4785 }
 0x9a3   :  { %v4788_v50 = vpop.eup %4787  ;;  %v1735_v54 = vmul.f32 %v4786_v63, %v1718_v30  ;;  %vm1740_vm8 = vweird.f32 %v4786_v63 }
 0x9a4   :  { %v1831_v6 = vadd.f32 1.0, %v4788_v50  ;;  %vm1741_vm11 = vmor %vm1739_vm9, %vm1740_vm8 }
 0x9a5   :  { %v1736_v35 = vsub.f32 1.0, %v1735_v54 }
 0x9a6   :  { %4789 = vrcp.f32 %v1831_v6  ;;  %v1858_v30 = vand.u32 2147483648, %v1831_v6  ;;  %vm1852_vm14 = vweird.f32 %v1831_v6  ;;  %v1856_v24 = vand.u32 2147483647, %v1831_v6 }
 0x9a7   :  { %v1737_v13 = vmul.f32 %v4786_v63, %v1736_v35  ;;  %4791 = vpow2.f32 %v4450_v31 }
 0x9a8   :  { %v1859_v35 = vor.u32 1.1754944e-38, %v1858_v30  ;;  %vm1857_vm0 = vcmp.eq.f32.partialorder %v1856_v24, 8.507059e+37 }
 0x9a9   :  { %v1738_v43 = vadd.f32 %v4786_v63, %v1737_v13 }
 0x9ab   :  { %v1742_v23 = vsel %vm1741_vm11, %v4786_v63, %v1738_v43 }
 0x9ac   :  { %v4790_v51 = vpop.eup %4789  ;;  %v1747_v46 = vsel %vm1744_vm12, %v1746_v58, %v1742_v23 }
 0x9ad   :  { %v4792_v41 = vpop.eup %4791  ;;  %v1848_v1 = vmul.f32 %v4790_v51, %v1831_v6  ;;  %vm1853_vm13 = vweird.f32 %v4790_v51 }
 0x9ae   :  { %v1945_v56 = vadd.f32 1.0, %v4792_v41  ;;  %vm1854_vm15 = vmor %vm1852_vm14, %vm1853_vm13 }
 0x9af   :  { %v1849_v55 = vsub.f32 1.0, %v1848_v1 }
 0x9b0   :  { %4793 = vrcp.f32 %v1945_v56  ;;  %v1972_v23 = vand.u32 2147483648, %v1945_v56  ;;  %vm1966_vm3 = vweird.f32 %v1945_v56  ;;  %v1970_v1 = vand.u32 2147483647, %v1945_v56 }
 0x9b1   :  { %4795 = vpow2.f32 %v4454_v8  ;;  %v1850_v49 = vmul.f32 %v4790_v51, %v1849_v55 }
 0x9b2   :  { %vm1971_vm4 = vcmp.eq.f32.partialorder %v1970_v1, 8.507059e+37  ;;  %v6882_v1 = vld [vmem:[#allocation65_spill] sm:$0xff] }
 0x9b3   :  { %v1851_v26 = vadd.f32 %v4790_v51, %v1850_v49 }
 0x9b5   :  { %v1855_v63 = vsel %vm1854_vm15, %v4790_v51, %v1851_v26 }
 0x9b6   :  { %v4794_v57 = vpop.eup %4793  ;;  %v1860_v31 = vsel %vm1857_vm0, %v1859_v35, %v1855_v63 }
 0x9b7   :  { %v4796_v17 = vpop.eup %4795  ;;  %v1962_v50 = vmul.f32 %v4794_v57, %v1945_v56  ;;  %vm1967_vm2 = vweird.f32 %v4794_v57 }
 0x9b8   :  { %v6049_v54 = vadd.f32 1.0, %v4796_v17  ;;  %vm1968_vm1 = vmor %vm1966_vm3, %vm1967_vm2 }
 0x9b9   :  { %v1963_v48 = vsub.f32 1.0, %v1962_v50 }
 0x9ba   :  { %4797 = vrcp.f32 %v6049_v54  ;;  %vm2051_vm6 = vweird.f32 %v6049_v54  ;;  %v2055_v30 = vand.u32 2147483647, %v6049_v54 }
 0x9bb   :  { %v1964_v51 = vmul.f32 %v4794_v57, %v1963_v48 }
 0x9bc   :  { %vm2056_vm8 = vcmp.eq.f32.partialorder %v2055_v30, 8.507059e+37  ;;  %v6894_v30 = vld [vmem:[#allocation41_spill] sm:$0xff] }
 0x9bd   :  { %v1965_v41 = vadd.f32 %v4794_v57, %v1964_v51  ;;  %v6878_v51 = vld [vmem:[#allocation19_spill] sm:$0xff] }
 0x9c0   :  { %v4798_v3 = vpop.eup %4797 }
 0x9c1   :  { %v2047_v58 = vmul.f32 %v4798_v3, %v6049_v54  ;;  %vm2052_vm5 = vweird.f32 %v4798_v3 }
 0x9c2   :  { %vm2053_vm7 = vmor %vm2051_vm6, %vm2052_vm5 }
 0x9c3   :  { %v2048_v8 = vsub.f32 1.0, %v2047_v58  ;;  %v6883_v58 = vld [vmem:[#allocation66_spill] sm:$0xff] }
 0x9c5   :  { %v1764_v29 = vpop.permute.xlu0 %1763  ;;  %v2049_v49 = vmul.f32 %v4798_v3, %v2048_v8  ;;  %v6886_v8 = vld [vmem:[#allocation69_spill] sm:$0xff] }
 0x9c6   :  { %v1766_v44 = vmul.f32 %v1764_v29, %v1747_v46  ;;  %v1969_v46 = vsel %vm1968_vm1, %v4794_v57, %v1965_v41  ;;  %v1973_v29 = vor.u32 1.1754944e-38, %v1972_v23  ;;  %v2057_v57 = vand.u32 2147483648, %v6049_v54  ;;  %v6875_v54 = vld [vmem:[#allocation39_spill] sm:$0xff]  ;;  %v6880_v41 = vld [vmem:[#allocation48_spill] sm:$0xff] }
 0x9c7   :  { %v2050_v26 = vadd.f32 %v4798_v3, %v2049_v49  ;;  %v6881_v23 = vld [vmem:[#allocation64_spill] sm:$0xff]  ;;  %v6891_v49 = vld [vmem:[#allocation37_spill] sm:$0xff] }
 0x9c8   :  { %v2109_v53 = vpack.c.bf16 %v1766_v44, %v1766_v44  ;;  %v1974_v56 = vsel %vm1971_vm4, %v1973_v29, %v1969_v46  ;;  %v2058_v24 = vor.u32 1.1754944e-38, %v2057_v57  ;;  %v6884_v46 = vld [vmem:[#allocation67_spill] sm:$0xff]  ;;  %v6885_v29 = vld [vmem:[#allocation68_spill] sm:$0xff] }
 0x9c9   :  { %v2054_v17 = vsel %vm2053_vm7, %v4798_v3, %v2050_v26  ;;  %v6879_v3 = vld [vmem:[#allocation43_spill] sm:$0xff]  ;;  %v6892_v26 = vld [vmem:[#allocation38_spill] sm:$0xff]  ;;  %v6893_v57 = vld [vmem:[#allocation40_spill] sm:$0xff] }
 0x9ca   :  { %4457 = vmatmul.msk.bf16.vlgmr.msrb.gmra.mxu0 %vm383_vm10, %v2109_v53  ;;  %4458 = vmatmul.msk.bf16.vlgmr.msrb.gmra.mxu1 %vm383_vm10, %v2109_v53  ;;  %v2059_v63 = vsel %vm2056_vm8, %v2058_v24, %v2054_v17  ;;  %v6895_v17 = vld [vmem:[#allocation44_spill] sm:$0xff]  ;;  %v6896_v24 = vld [vmem:[#allocation45_spill] sm:$0xff] }
 0x9cb   :  { %2344 = vmatpush.bf16.msrb.mxu0 %v6842_v34  ;;  %2357 = vmatpush.bf16.msrb.mxu1 %v6843_v42 }
 0x9cf   :  { %2345 = vmatpush.bf16.msrb.mxu0 %v6844_v33  ;;  %2358 = vmatpush.bf16.msrb.mxu1 %v6845_v45 }
 0x9d3   :  { %2346 = vmatpush.bf16.msrb.mxu0 %v6846_v40  ;;  %2359 = vmatpush.bf16.msrb.mxu1 %v6847_v36 }
 0x9d5   :  { %v1877_v13 = vpop.permute.xlu2 %1876 }
 0x9d6   :  { %v1879_v43 = vmul.f32 %v1877_v13, %v1860_v31  ;;  %v6873_v31 = vld [vmem:[#allocation18_spill] sm:$0xff]  ;;  %v6874_v13 = vld [vmem:[#allocation17_spill] sm:$0xff] }
 0x9d7   :  { %2347 = vmatpush.bf16.msrb.mxu0 %v6848_v60  ;;  %2360 = vmatpush.bf16.msrb.mxu1 %v6849_v61 }
 0x9d8   :  { %v1880_v6 = vpack.c.bf16 %v1879_v43, %v1879_v43  ;;  %v6876_v43 = vld [vmem:[#allocation47_spill] sm:$0xff] }
 0x9da   :  { %4455 = vmatmul.msk.bf16.vlgmr.msrb.gmra.mxu2 %vm383_vm10, %v1880_v6  ;;  %4456 = vmatmul.msk.bf16.vlgmr.msrb.gmra.mxu3 %vm383_vm10, %v1880_v6 }
 0x9db   :  { %4463 = vmatmul.msk.bf16.vlgmr.msra.gmra.mxu0 %vm383_vm10, %v1880_v6  ;;  %4464 = vmatmul.msk.bf16.vlgmr.msra.gmra.mxu1 %vm383_vm10, %v1880_v6  ;;  %v6877_v6 = vld [vmem:[#allocation20_spill] sm:$0xff] }
 0x9dc   :  { %2331 = vmatpush.bf16.msrb.mxu3 %v5407_v2  ;;  %2318 = vmatpush.bf16.msrb.mxu2 %v5418_v7 }
 0x9dd   :  { %2530 = vmatpush.bf16.msra.mxu1 %v5718_v27  ;;  %2517 = vmatpush.bf16.msra.mxu0 %v5723_v20 }
 0x9e0   :  { %2332 = vmatpush.bf16.msrb.mxu3 %v5427_v11  ;;  %2319 = vmatpush.bf16.msrb.mxu2 %v5430_v12 }
 0x9e1   :  { %2531 = vmatpush.bf16.msra.mxu1 %v5729_v0  ;;  %2518 = vmatpush.bf16.msra.mxu0 %v5732_v38 }
 0x9e4   :  { %2333 = vmatpush.bf16.msrb.mxu3 %v5445_v18  ;;  %2320 = vmatpush.bf16.msrb.mxu2 %v5448_v19 }
 0x9e5   :  { %v1991_v44 = vpop.permute.xlu1 %1990  ;;  %2532 = vmatpush.bf16.msra.mxu1 %v5742_v28  ;;  %2519 = vmatpush.bf16.msra.mxu0 %v5744_v25 }
 0x9e6   :  { %v1993_v55 = vmul.f32 %v1991_v44, %v1974_v56  ;;  %v6887_v56 = vld [vmem:[#allocation70_spill] sm:$0xff]  ;;  %v6888_v44 = vld [vmem:[#allocation71_spill] sm:$0xff] }
 0x9e8   :  { %v1994_v53 = vpack.c.bf16 %v1993_v55, %v1993_v55  ;;  %2334 = vmatpush.bf16.msrb.mxu3 %v5466_v37  ;;  %2321 = vmatpush.bf16.msrb.mxu2 %v5471_v39  ;;  %v6889_v55 = vld [vmem:[#allocation35_spill] sm:$0xff] }
 0x9e9   :  { %2533 = vmatpush.bf16.msra.mxu1 %v5770_v47  ;;  %2520 = vmatpush.bf16.msra.mxu0 %v5772_v32 }
 0x9ea   :  { %4461 = vmatmul.msk.bf16.vlgmr.msra.gmra.mxu2 %vm383_vm10, %v1994_v53  ;;  %4462 = vmatmul.msk.bf16.vlgmr.msra.gmra.mxu3 %vm383_vm10, %v1994_v53 }
 0x9eb   :  { %4469 = vmatmul.msk.bf16.vlgmr.msrb.gmra.mxu0 %vm383_vm10, %v1994_v53  ;;  %4470 = vmatmul.msk.bf16.vlgmr.msrb.gmra.mxu1 %vm383_vm10, %v1994_v53  ;;  %v6890_v53 = vld [vmem:[#allocation36_spill] sm:$0xff] }
 0x9ec   :  { %2429 = vmatpush.bf16.msra.mxu2 %v5332_v15  ;;  %2442 = vmatpush.bf16.msra.mxu3 %v5312_v4 }
 0x9ed   :  { %2647 = vmatpush.bf16.msrb.mxu1 %v5540_v10  ;;  %2634 = vmatpush.bf16.msrb.mxu0 %v5569_v14 }
 0x9f0   :  { %2430 = vmatpush.bf16.msra.mxu2 %v5345_v21  ;;  %2443 = vmatpush.bf16.msra.mxu3 %v5318_v9 }
 0x9f1   :  { %2648 = vmatpush.bf16.msrb.mxu1 %v5545_v22  ;;  %2635 = vmatpush.bf16.msrb.mxu0 %v5616_v62 }
 0x9f3   :  { %v2076_v50 = vpop.permute.xlu2 %2075 }
 0x9f4   :  { %v2078_v35 = vmul.f32 %v2076_v50, %v2059_v63  ;;  %2431 = vmatpush.bf16.msra.mxu2 %v6873_v31  ;;  %2444 = vmatpush.bf16.msra.mxu3 %v6874_v13 }
 0x9f5   :  { %2649 = vmatpush.bf16.msrb.mxu1 %v6875_v54  ;;  %2636 = vmatpush.bf16.msrb.mxu0 %v6876_v43 }
 0x9f6   :  { %v2079_v48 = vpack.c.bf16 %v2078_v35, %v2078_v35 }
 0x9f8   :  { %2432 = vmatpush.bf16.msra.mxu2 %v6877_v6  ;;  %2445 = vmatpush.bf16.msra.mxu3 %v6878_v51  ;;  %v6902_v6 = vld [vmem:[#allocation32_spill] sm:$0xff] }
 0x9f9   :  { %2650 = vmatpush.bf16.msrb.mxu1 %v6879_v3  ;;  %2637 = vmatpush.bf16.msrb.mxu0 %v6880_v41  ;;  %v6899_v3 = vld [vmem:[#allocation60_spill] sm:$0xff] }
 0x9fa   :  { %4467 = vmatmul.msk.bf16.vlgmr.msrb.gmra.mxu2 %vm383_vm10, %v2079_v48  ;;  %4468 = vmatmul.msk.bf16.vlgmr.msrb.gmra.mxu3 %vm383_vm10, %v2079_v48 }
 0x9fc   :  { %2547 = vmatpush.bf16.msrb.mxu2 %v6881_v23  ;;  %2560 = vmatpush.bf16.msrb.mxu3 %v6882_v1 }
 0xa00   :  { %2548 = vmatpush.bf16.msrb.mxu2 %v6883_v58  ;;  %2561 = vmatpush.bf16.msrb.mxu3 %v6884_v46 }
 0xa04   :  { %2549 = vmatpush.bf16.msrb.mxu2 %v6885_v29  ;;  %2562 = vmatpush.bf16.msrb.mxu3 %v6886_v8  ;;  %v6897_v8 = vld [vmem:[#allocation76_spill] sm:$0xff]  ;;  %v6898_v29 = vld [vmem:[#allocation77_spill] sm:$0xff] }
 0xa08   :  { %2550 = vmatpush.bf16.msrb.mxu2 %v6887_v56  ;;  %2563 = vmatpush.bf16.msrb.mxu3 %v6888_v44 }
 0xa0a   :  { %4473 = vmatmul.msk.bf16.vlgmr.msra.gmra.mxu2 %vm383_vm10, %v2079_v48  ;;  %4474 = vmatmul.msk.bf16.vlgmr.msra.gmra.mxu3 %vm383_vm10, %v2079_v48 }
 0xa0c   :  { %2660 = vmatpush.bf16.msra.mxu2 %v6889_v55  ;;  %2673 = vmatpush.bf16.msra.mxu3 %v6890_v53 }
 0xa10   :  { %2661 = vmatpush.bf16.msra.mxu2 %v6891_v49  ;;  %2674 = vmatpush.bf16.msra.mxu3 %v6892_v26 }
 0xa14   :  { %2662 = vmatpush.bf16.msra.mxu2 %v6893_v57  ;;  %2675 = vmatpush.bf16.msra.mxu3 %v6894_v30 }
 0xa18   :  { %2663 = vmatpush.bf16.msra.mxu2 %v6895_v17  ;;  %2676 = vmatpush.bf16.msra.mxu3 %v6896_v24 }
 0xa47   :  { %v2122_v63 = vpop.f32.mrf.mxu0  ;;  %v2135_v50 = vpop.f32.mrf.mxu1 }
 0xa4f   :  { %v2124_v35 = vpop.f32.mrf.mxu0  ;;  %v2137_v48 = vpop.f32.mrf.mxu1 }
 0xa58   :  { %v2235_v44 = vpop.f32.mrf.mxu0  ;;  %v2248_v55 = vpop.f32.mrf.mxu1 }
 0xa5d   :  { %v2092_v56 = vpop.f32.mrf.mxu2  ;;  %v2105_v53 = vpop.f32.mrf.mxu3 }
 0xa5e   :  { %v2093_v49 = vadd.f32 %v2092_v56, %v6897_v8  ;;  %v2106_v26 = vadd.f32 %v2105_v53, %v6898_v29  ;;  %v6900_v8 = vld [vmem:[#allocation59_spill] sm:$0xff] }
 0xa5f   :  { %v6901_v29 = vld [vmem:[#allocation31_spill] sm:$0xff] }
 0xa60   :  { %v2139_v46 = vadd.f32 %v2122_v63, %v2093_v49  ;;  %v6122_v57 = vadd.f32 %v2135_v50, %v2106_v26  ;;  %v2237_v30 = vpop.f32.mrf.mxu0  ;;  %v2250_v58 = vpop.f32.mrf.mxu1 }
 0xa62   :  { %4799 = vtanh.f32 %v6122_v57 }
 0xa65   :  { %v2094_v24 = vpop.f32.mrf.mxu2  ;;  %v2107_v17 = vpop.f32.mrf.mxu3 }
 0xa68   :  { %v4800_v1 = vpop.eup %4799  ;;  %v2349_v35 = vpop.f32.mrf.mxu0 }
 0xa69   :  { %v2362_v48 = vpop.f32.mrf.mxu1  ;;  %2182 = vrot.lane.b32.xlu0 %v4800_v1, %s5176_s2 }
 0xa6d   :  { %v2209_v23 = vpop.f32.mrf.mxu2  ;;  %v2222_v41 = vpop.f32.mrf.mxu3 }
 0xa6e   :  { %v2210_v56 = vadd.f32 %v2209_v23, %v6899_v3  ;;  %v2223_v53 = vadd.f32 %v2222_v41, %v6900_v8 }
 0xa70   :  { %v2252_v49 = vadd.f32 %v2235_v44, %v2210_v56  ;;  %v6128_v26 = vadd.f32 %v2248_v55, %v2223_v53  ;;  %v2351_v30 = vpop.f32.mrf.mxu0  ;;  %v6903_v53 = vld [vmem:[#allocation21_spill] sm:$0xff] }
 0xa71   :  { %v2364_v58 = vpop.f32.mrf.mxu1  ;;  %v6904_v30 = vld [vmem:[#allocation54_spill] sm:$0xff] }
 0xa72   :  { %4801 = vtanh.f32 %v6128_v26  ;;  %v336_v58 = vadd.f32 %v6904_v30, %v6903_v53 }
 0xa75   :  { %v2211_v24 = vpop.f32.mrf.mxu2  ;;  %v2224_v17 = vpop.f32.mrf.mxu3 }
 0xa78   :  { %v4802_v63 = vpop.eup %4801 }
 0xa79   :  { %2295 = vrot.lane.b32.xlu1 %v4802_v63, %s5176_s2 }
 0xa7d   :  { %v2323_v50 = vpop.f32.mrf.mxu2  ;;  %v2336_v1 = vpop.f32.mrf.mxu3 }
 0xa7e   :  { %v2324_v51 = vadd.f32 %v2323_v50, %v6901_v29  ;;  %v2337_v23 = vadd.f32 %v2336_v1, %v6902_v6  ;;  %v6906_v29 = vld [vmem:[#allocation53_spill] sm:$0xff] }
 0xa80   :  { %v2366_v3 = vadd.f32 %v2349_v35, %v2324_v51  ;;  %v6134_v41 = vadd.f32 %v2362_v48, %v2337_v23  ;;  %v4459_v48 = vmul.f32 -1.442695, %v2139_v46 }
 0xa82   :  { %4803 = vtanh.f32 %v6134_v41  ;;  %v4471_v1 = vmul.f32 -1.442695, %v2366_v3 }
 0xa85   :  { %v2325_v44 = vpop.f32.mrf.mxu2  ;;  %v2338_v55 = vpop.f32.mrf.mxu3 }
 0xa86   :  { %v4465_v55 = vmul.f32 -1.442695, %v2252_v49  ;;  %v6905_v49 = vld [vmem:[#allocation22_spill] sm:$0xff] }
 0xa87   :  { %v307_v8 = vadd.f32 %v6906_v29, %v6905_v49 }
 0xa88   :  { %v4804_v56 = vpop.eup %4803 }
 0xa89   :  { %2409 = vrot.lane.b32.xlu2 %v4804_v56, %s5176_s2 }
 0xa8d   :  { %v2434_v24 = vpop.f32.mrf.mxu2  ;;  %v2447_v17 = vpop.f32.mrf.mxu3 }
 0xa8e   :  { %v6140_v63 = vadd.f32 %v2447_v17, %v336_v58  ;;  %v2451_v43 = vadd.f32 %v2434_v24, %v307_v8 }
 0xa90   :  { %4805 = vtanh.f32 %v6140_v63  ;;  %v4475_v62 = vmul.f32 -1.442695, %v2451_v43 }
 0xa91   :  { %4807 = vpow2.f32 %v4459_v48 }
 0xa92   :  { %4809 = vpow2.f32 %v4471_v1 }
 0xa95   :  { %v2436_v50 = vpop.f32.mrf.mxu2  ;;  %v2449_v51 = vpop.f32.mrf.mxu3 }
 0xa96   :  { %v4806_v35 = vpop.eup %4805 }
 0xa97   :  { %2494 = vrot.lane.b32.xlu0 %v4806_v35, %s5176_s2  ;;  %v4808_v23 = vpop.eup %4807 }
 0xa98   :  { %v2147_v44 = vadd.f32 1.0, %v4808_v23  ;;  %v4810_v56 = vpop.eup %4809 }
 0xa99   :  { %v2374_v30 = vadd.f32 1.0, %v4810_v56 }
 0xa9a   :  { %4811 = vrcp.f32 %v2147_v44  ;;  %v2160_v23 = vand.u32 2147483648, %v2147_v44  ;;  %vm2154_vm11 = vweird.f32 %v2147_v44 }
 0xa9b   :  { %4813 = vpow2.f32 %v4465_v55  ;;  %v2158_v55 = vand.u32 2147483647, %v2147_v44  ;;  %vm2381_vm15 = vweird.f32 %v2374_v30  ;;  %v2385_v29 = vand.u32 2147483647, %v2374_v30 }
 0xa9c   :  { %4815 = vrcp.f32 %v2374_v30 }
 0xa9d   :  { %vm2159_vm13 = vcmp.eq.f32.partialorder %v2158_v55, 8.507059e+37  ;;  %vm2386_vm2 = vcmp.eq.f32.partialorder %v2385_v29, 8.507059e+37 }
 0xaa0   :  { %v4812_v58 = vpop.eup %4811 }
 0xaa1   :  { %v4814_v17 = vpop.eup %4813  ;;  %v2150_v53 = vmul.f32 %v4812_v58, %v2147_v44  ;;  %vm2155_vm9 = vweird.f32 %v4812_v58 }
 0xaa2   :  { %v2260_v50 = vadd.f32 1.0, %v4814_v17  ;;  %v4816_v6 = vpop.eup %4815  ;;  %vm2156_vm12 = vmor %vm2154_vm11, %vm2155_vm9 }
 0xaa3   :  { %v2151_v51 = vsub.f32 1.0, %v2150_v53  ;;  %v2377_v46 = vmul.f32 %v4816_v6, %v2374_v30  ;;  %v2161_v53 = vor.u32 1.1754944e-38, %v2160_v23  ;;  %vm2382_vm14 = vweird.f32 %v4816_v6 }
 0xaa4   :  { %4817 = vrcp.f32 %v2260_v50  ;;  %vm2383_vm0 = vmor %vm2381_vm15, %vm2382_vm14  ;;  %v2273_v43 = vand.u32 2147483648, %v2260_v50  ;;  %vm2267_vm1 = vweird.f32 %v2260_v50  ;;  %v2271_v23 = vand.u32 2147483647, %v2260_v50 }
 0xaa5   :  { %v2152_v35 = vmul.f32 %v4812_v58, %v2151_v51  ;;  %v2378_v1 = vsub.f32 1.0, %v2377_v46  ;;  %v2387_v46 = vand.u32 2147483648, %v2374_v30  ;;  %4819 = vpow2.f32 %v4475_v62 }
 0xaa6   :  { %vm2272_vm5 = vcmp.eq.f32.partialorder %v2271_v23, 8.507059e+37 }
 0xaa7   :  { %v2153_v3 = vadd.f32 %v4812_v58, %v2152_v35  ;;  %v2379_v17 = vmul.f32 %v4816_v6, %v2378_v1  ;;  %v2388_v24 = vor.u32 1.1754944e-38, %v2387_v46 }
 0xaa9   :  { %v2157_v54 = vsel %vm2156_vm12, %v4812_v58, %v2153_v3  ;;  %v2380_v22 = vadd.f32 %v4816_v6, %v2379_v17 }
 0xaaa   :  { %v4818_v48 = vpop.eup %4817  ;;  %v2162_v51 = vsel %vm2159_vm13, %v2161_v53, %v2157_v54 }
 0xaab   :  { %v2263_v56 = vmul.f32 %v4818_v48, %v2260_v50  ;;  %v2384_v44 = vsel %vm2383_vm0, %v4816_v6, %v2380_v22  ;;  %vm2268_vm3 = vweird.f32 %v4818_v48 }
 0xaac   :  { %v2389_v3 = vsel %vm2386_vm2, %v2388_v24, %v2384_v44  ;;  %vm2269_vm4 = vmor %vm2267_vm1, %vm2268_vm3 }
 0xaad   :  { %v2264_v31 = vsub.f32 1.0, %v2263_v56  ;;  %v2274_v56 = vor.u32 1.1754944e-38, %v2273_v43 }
 0xaaf   :  { %v2265_v8 = vmul.f32 %v4818_v48, %v2264_v31 }
 0xab1   :  { %v2266_v54 = vadd.f32 %v4818_v48, %v2265_v8 }
 0xab3   :  { %v2270_v55 = vsel %vm2269_vm4, %v4818_v48, %v2266_v54 }
 0xab4   :  { %v2275_v62 = vsel %vm2272_vm5, %v2274_v56, %v2270_v55  ;;  %v2407_v56 = vmul.f32 %v2389_v3, %v6025_v16  ;;  %v4460_v16 = vmul.f32 -1.442695, %v6122_v57 }
 0xadb   :  { %v2183_v13 = vpop.permute.xlu0 %2182 }
 0xadc   :  { %v2185_v35 = vmul.f32 %v2183_v13, %v2162_v51  ;;  %v4820_v13 = vpop.eup %4819 }
 0xadd   :  { %v2459_v30 = vadd.f32 1.0, %v4820_v13  ;;  %v2180_v13 = vmul.f32 %v2162_v51, %v6020_v5 }
 0xade   :  { %2187 = vrot.lane.b32.xlu1 %v2185_v35, %s5176_s2 }
 0xadf   :  { %4821 = vrcp.f32 %v2459_v30  ;;  %v2472_v29 = vand.u32 2147483648, %v2459_v30  ;;  %vm2466_vm7 = vweird.f32 %v2459_v30  ;;  %v2470_v50 = vand.u32 2147483647, %v2459_v30 }
 0xae1   :  { %v2473_v44 = vor.u32 1.1754944e-38, %v2472_v29  ;;  %vm2471_vm9 = vcmp.eq.f32.partialorder %v2470_v50, 8.507059e+37 }
 0xae3   :  { %v2410_v58 = vpop.permute.xlu2 %2409 }
 0xae4   :  { %v2412_v1 = vmul.f32 %v2410_v58, %v2389_v3 }
 0xae5   :  { %v4822_v6 = vpop.eup %4821 }
 0xae6   :  { %2414 = vrot.lane.b32.xlu0 %v2412_v1, %s5176_s2  ;;  %v2462_v17 = vmul.f32 %v4822_v6, %v2459_v30  ;;  %vm2467_vm6 = vweird.f32 %v4822_v6  ;;  %v2293_v1 = vmul.f32 %v2275_v62, %v6029_v52 }
 0xae7   :  { %vm2468_vm8 = vmor %vm2466_vm7, %vm2467_vm6 }
 0xae8   :  { %v2463_v53 = vsub.f32 1.0, %v2462_v17 }
 0xaea   :  { %v2464_v35 = vmul.f32 %v4822_v6, %v2463_v53 }
 0xaeb   :  { %v2296_v22 = vpop.permute.xlu1 %2295 }
 0xaec   :  { %v2298_v31 = vmul.f32 %v2296_v22, %v2275_v62  ;;  %v2465_v46 = vadd.f32 %v4822_v6, %v2464_v35  ;;  %v4466_v35 = vmul.f32 -1.442695, %v6128_v26 }
 0xaee   :  { %2300 = vrot.lane.b32.xlu2 %v2298_v31, %s5176_s2  ;;  %v2469_v48 = vsel %vm2468_vm8, %v4822_v6, %v2465_v46 }
 0xaef   :  { %v2474_v24 = vsel %vm2471_vm9, %v2473_v44, %v2469_v48  ;;  %v4472_v44 = vmul.f32 -1.442695, %v6134_v41  ;;  %v4476_v41 = vmul.f32 -1.442695, %v6140_v63 }
 0xaf0   :  { %v2492_v5 = vmul.f32 %v2474_v24, %v6035_v59 }
 0xb09   :  { %v2495_v8 = vpop.permute.xlu0 %2494 }
 0xb0a   :  { %v2497_v58 = vmul.f32 %v2495_v8, %v2474_v24 }
 0xb0c   :  { %2499 = vrot.lane.b32.xlu1 %v2497_v58, %s5176_s2 }
 0xb48   :  { %v2301_v54 = vpop.permute.xlu2 %2300 }
 0xb49   :  { %v6151_v43 = vadd.f32 %v2301_v54, %v2293_v1 }
 0xb4b   :  { %4823 = vtanh.f32 %v6151_v43 }
 0xb50   :  { %v2188_v23 = vpop.permute.xlu1 %2187 }
 0xb51   :  { %v4824_v55 = vpop.eup %4823  ;;  %v6155_v30 = vadd.f32 %v2188_v23, %v2180_v13 }
 0xb52   :  { %2306 = vrot.lane.b32.xlu0 %v4824_v55, %s5176_s2 }
 0xb53   :  { %4825 = vtanh.f32 %v6155_v30 }
 0xb58   :  { %v2415_v22 = vpop.permute.xlu0 %2414 }
 0xb59   :  { %v4826_v31 = vpop.eup %4825  ;;  %v6160_v52 = vadd.f32 %v2415_v22, %v2407_v56 }
 0xb5a   :  { %2193 = vrot.lane.b32.xlu2 %v4826_v31, %s5176_s2 }
 0xb5b   :  { %4827 = vtanh.f32 %v6160_v52 }
 0xb61   :  { %v4828_v62 = vpop.eup %4827 }
 0xb62   :  { %2420 = vrot.lane.b32.xlu1 %v4828_v62, %s5176_s2 }
 0xb7e   :  { %v2500_v51 = vpop.permute.xlu1 %2499 }
 0xb7f   :  { %v6166_v6 = vadd.f32 %v2500_v51, %v2492_v5 }
 0xb81   :  { %4829 = vtanh.f32 %v6166_v6 }
 0xb82   :  { %4831 = vpow2.f32 %v4460_v16 }
 0xb87   :  { %v4830_v17 = vpop.eup %4829 }
 0xb88   :  { %2505 = vrot.lane.b32.xlu2 %v4830_v17, %s5176_s2  ;;  %v4832_v3 = vpop.eup %4831 }
 0xb89   :  { %v2148_v53 = vadd.f32 1.0, %v4832_v3 }
 0xb8b   :  { %4833 = vrcp.f32 %v2148_v53  ;;  %v2175_v58 = vand.u32 2147483648, %v2148_v53  ;;  %vm2169_vm12 = vweird.f32 %v2148_v53  ;;  %v2173_v1 = vand.u32 2147483647, %v2148_v53 }
 0xb8c   :  { %4835 = vpow2.f32 %v4466_v35 }
 0xb8d   :  { %v2176_v23 = vor.u32 1.1754944e-38, %v2175_v58  ;;  %vm2174_vm14 = vcmp.eq.f32.partialorder %v2173_v1, 8.507059e+37 }
 0xb91   :  { %v4834_v46 = vpop.eup %4833 }
 0xb92   :  { %v4836_v29 = vpop.eup %4835  ;;  %v2165_v59 = vmul.f32 %v4834_v46, %v2148_v53  ;;  %vm2170_vm11 = vweird.f32 %v4834_v46 }
 0xb93   :  { %v2261_v50 = vadd.f32 1.0, %v4836_v29  ;;  %vm2171_vm13 = vmor %vm2169_vm12, %vm2170_vm11 }
 0xb94   :  { %v2166_v48 = vsub.f32 1.0, %v2165_v59 }
 0xb95   :  { %4837 = vrcp.f32 %v2261_v50  ;;  %v2288_v3 = vand.u32 2147483648, %v2261_v50  ;;  %vm2282_vm0 = vweird.f32 %v2261_v50  ;;  %v2286_v53 = vand.u32 2147483647, %v2261_v50 }
 0xb96   :  { %v2167_v8 = vmul.f32 %v4834_v46, %v2166_v48  ;;  %4839 = vpow2.f32 %v4472_v44 }
 0xb97   :  { %v2289_v59 = vor.u32 1.1754944e-38, %v2288_v3  ;;  %vm2287_vm3 = vcmp.eq.f32.partialorder %v2286_v53, 8.507059e+37  ;;  %v6907_v53 = vld [vmem:[#allocation34_spill] sm:$0xff] }
 0xb98   :  { %v2168_v57 = vadd.f32 %v4834_v46, %v2167_v8 }
 0xb9a   :  { %v2172_v54 = vsel %vm2171_vm13, %v4834_v46, %v2168_v57 }
 0xb9b   :  { %v4838_v24 = vpop.eup %4837  ;;  %v2177_v56 = vsel %vm2174_vm14, %v2176_v23, %v2172_v54 }
 0xb9c   :  { %v4840_v26 = vpop.eup %4839  ;;  %v2278_v13 = vmul.f32 %v4838_v24, %v2261_v50  ;;  %vm2283_vm15 = vweird.f32 %v4838_v24 }
 0xb9d   :  { %v2375_v55 = vadd.f32 1.0, %v4840_v26  ;;  %vm2284_vm2 = vmor %vm2282_vm0, %vm2283_vm15 }
 0xb9e   :  { %v2279_v62 = vsub.f32 1.0, %v2278_v13 }
 0xb9f   :  { %4841 = vrcp.f32 %v2375_v55  ;;  %v2402_v26 = vand.u32 2147483648, %v2375_v55  ;;  %vm2396_vm4 = vweird.f32 %v2375_v55  ;;  %v2400_v54 = vand.u32 2147483647, %v2375_v55 }
 0xba0   :  { %4843 = vpow2.f32 %v4476_v41  ;;  %v2280_v51 = vmul.f32 %v4838_v24, %v2279_v62 }
 0xba1   :  { %vm2401_vm6 = vcmp.eq.f32.partialorder %v2400_v54, 8.507059e+37  ;;  %v6917_v54 = vld [vmem:[#allocation64_spill] sm:$0xff] }
 0xba2   :  { %v2281_v17 = vadd.f32 %v4838_v24, %v2280_v51 }
 0xba4   :  { %v2285_v35 = vsel %vm2284_vm2, %v4838_v24, %v2281_v17 }
 0xba5   :  { %v4842_v16 = vpop.eup %4841  ;;  %v2290_v48 = vsel %vm2287_vm3, %v2289_v59, %v2285_v35  ;;  %v6908_v35 = vld [vmem:[#allocation46_spill] sm:$0xff] }
 0xba6   :  { %v4844_v63 = vpop.eup %4843  ;;  %v2392_v46 = vmul.f32 %v4842_v16, %v2375_v55  ;;  %vm2397_vm1 = vweird.f32 %v4842_v16 }
 0xba7   :  { %v6180_v29 = vadd.f32 1.0, %v4844_v63  ;;  %vm2398_vm5 = vmor %vm2396_vm4, %vm2397_vm1 }
 0xba8   :  { %v2393_v57 = vsub.f32 1.0, %v2392_v46 }
 0xba9   :  { %4845 = vrcp.f32 %v6180_v29  ;;  %v2487_v17 = vand.u32 2147483648, %v6180_v29  ;;  %vm2481_vm8 = vweird.f32 %v6180_v29 }
 0xbaa   :  { %v2394_v24 = vmul.f32 %v4842_v16, %v2393_v57  ;;  %v6912_v57 = vld [vmem:[#allocation47_spill] sm:$0xff] }
 0xbab   :  { %v2488_v63 = vor.u32 1.1754944e-38, %v2487_v17  ;;  %v6928_v17 = vld [vmem:[#allocation38_spill] sm:$0xff] }
 0xbac   :  { %v2395_v1 = vadd.f32 %v4842_v16, %v2394_v24  ;;  %v6913_v24 = vld [vmem:[#allocation20_spill] sm:$0xff] }
 0xbae   :  { %v2399_v23 = vsel %vm2398_vm5, %v4842_v16, %v2395_v1  ;;  %v2485_v16 = vand.u32 2147483647, %v6180_v29  ;;  %v6915_v1 = vld [vmem:[#allocation43_spill] sm:$0xff] }
 0xbaf   :  { %v4846_v58 = vpop.eup %4845 }
 0xbb0   :  { %v2477_v13 = vmul.f32 %v4846_v58, %v6180_v29  ;;  %vm2482_vm7 = vweird.f32 %v4846_v58  ;;  %vm2486_vm11 = vcmp.eq.f32.partialorder %v2485_v16, 8.507059e+37  ;;  %v6911_v29 = vld [vmem:[#allocation39_spill] sm:$0xff]  ;;  %v6929_v16 = vld [vmem:[#allocation40_spill] sm:$0xff] }
 0xbb1   :  { %vm2483_vm9 = vmor %vm2481_vm8, %vm2482_vm7 }
 0xbb4   :  { %v2194_v22 = vpop.permute.xlu2 %2193 }
 0xbb5   :  { %v2196_v31 = vmul.f32 %v2194_v22, %v2177_v56  ;;  %v2403_v56 = vor.u32 1.1754944e-38, %v2402_v26  ;;  %v2478_v22 = vsub.f32 1.0, %v2477_v13  ;;  %v6916_v26 = vld [vmem:[#allocation48_spill] sm:$0xff]  ;;  %v6918_v13 = vld [vmem:[#allocation65_spill] sm:$0xff] }
 0xbb7   :  { %v2539_v5 = vpack.c.bf16 %v2196_v31, %v2196_v31  ;;  %v2404_v55 = vsel %vm2401_vm6, %v2403_v56, %v2399_v23  ;;  %v6919_v23 = vld [vmem:[#allocation66_spill] sm:$0xff]  ;;  %v6920_v56 = vld [vmem:[#allocation67_spill] sm:$0xff] }
 0xbb9   :  { %4479 = vmatmul.msk.bf16.vlgmr.msrb.gmra.mxu2 %vm383_vm10, %v2539_v5  ;;  %4480 = vmatmul.msk.bf16.vlgmr.msrb.gmra.mxu3 %vm383_vm10, %v2539_v5  ;;  %v2479_v5 = vmul.f32 %v4846_v58, %v2478_v22  ;;  %v6921_v22 = vld [vmem:[#allocation68_spill] sm:$0xff] }
 0xbba   :  { %2774 = vmatpush.bf16.msrb.mxu2 %v6842_v34  ;;  %2787 = vmatpush.bf16.msrb.mxu3 %v6843_v42 }
 0xbbb   :  { %v2480_v51 = vadd.f32 %v4846_v58, %v2479_v5  ;;  %v6926_v5 = vld [vmem:[#allocation36_spill] sm:$0xff] }
 0xbbd   :  { %v2484_v3 = vsel %vm2483_vm9, %v4846_v58, %v2480_v51  ;;  %v6914_v58 = vld [vmem:[#allocation19_spill] sm:$0xff]  ;;  %v6927_v51 = vld [vmem:[#allocation37_spill] sm:$0xff] }
 0xbbe   :  { %2775 = vmatpush.bf16.msrb.mxu2 %v6844_v33  ;;  %2788 = vmatpush.bf16.msrb.mxu3 %v6845_v45  ;;  %v2489_v46 = vsel %vm2486_vm11, %v2488_v63, %v2484_v3  ;;  %v6930_v3 = vld [vmem:[#allocation41_spill] sm:$0xff]  ;;  %v6931_v63 = vld [vmem:[#allocation44_spill] sm:$0xff] }
 0xbc2   :  { %2776 = vmatpush.bf16.msrb.mxu2 %v6846_v40  ;;  %2789 = vmatpush.bf16.msrb.mxu3 %v6847_v36 }
 0xbc4   :  { %v2307_v44 = vpop.permute.xlu0 %2306 }
 0xbc5   :  { %v2309_v8 = vmul.f32 %v2307_v44, %v2290_v48  ;;  %v6909_v44 = vld [vmem:[#allocation18_spill] sm:$0xff] }
 0xbc6   :  { %2777 = vmatpush.bf16.msrb.mxu2 %v6848_v60  ;;  %2790 = vmatpush.bf16.msrb.mxu3 %v6849_v61 }
 0xbc7   :  { %v2310_v50 = vpack.c.bf16 %v2309_v8, %v2309_v8  ;;  %v6910_v8 = vld [vmem:[#allocation17_spill] sm:$0xff] }
 0xbc9   :  { %4477 = vmatmul.msk.bf16.vlgmr.msra.gmra.mxu0 %vm383_vm10, %v2310_v50  ;;  %4478 = vmatmul.msk.bf16.vlgmr.msra.gmra.mxu1 %vm383_vm10, %v2310_v50 }
 0xbca   :  { %4485 = vmatmul.msk.bf16.vlgmr.msra.gmra.mxu2 %vm383_vm10, %v2310_v50  ;;  %4486 = vmatmul.msk.bf16.vlgmr.msra.gmra.mxu3 %vm383_vm10, %v2310_v50 }
 0xbcb   :  { %2761 = vmatpush.bf16.msra.mxu1 %v5407_v2  ;;  %2748 = vmatpush.bf16.msra.mxu0 %v5418_v7 }
 0xbcc   :  { %2960 = vmatpush.bf16.msra.mxu3 %v5718_v27  ;;  %2947 = vmatpush.bf16.msra.mxu2 %v5723_v20 }
 0xbcf   :  { %2762 = vmatpush.bf16.msra.mxu1 %v5427_v11  ;;  %2749 = vmatpush.bf16.msra.mxu0 %v5430_v12 }
 0xbd0   :  { %2961 = vmatpush.bf16.msra.mxu3 %v5729_v0  ;;  %2948 = vmatpush.bf16.msra.mxu2 %v5732_v38 }
 0xbd3   :  { %2763 = vmatpush.bf16.msra.mxu1 %v5445_v18  ;;  %2750 = vmatpush.bf16.msra.mxu0 %v5448_v19 }
 0xbd4   :  { %v2421_v41 = vpop.permute.xlu1 %2420  ;;  %2962 = vmatpush.bf16.msra.mxu3 %v5742_v28  ;;  %2949 = vmatpush.bf16.msra.mxu2 %v5744_v25 }
 0xbd5   :  { %v2423_v31 = vmul.f32 %v2421_v41, %v2404_v55  ;;  %v6922_v55 = vld [vmem:[#allocation69_spill] sm:$0xff]  ;;  %v6923_v41 = vld [vmem:[#allocation70_spill] sm:$0xff] }
 0xbd7   :  { %v2424_v62 = vpack.c.bf16 %v2423_v31, %v2423_v31  ;;  %2764 = vmatpush.bf16.msra.mxu1 %v5466_v37  ;;  %2751 = vmatpush.bf16.msra.mxu0 %v5471_v39  ;;  %v6924_v31 = vld [vmem:[#allocation71_spill] sm:$0xff] }
 0xbd8   :  { %2963 = vmatpush.bf16.msra.mxu3 %v5770_v47  ;;  %2950 = vmatpush.bf16.msra.mxu2 %v5772_v32 }
 0xbd9   :  { %4483 = vmatmul.msk.bf16.vlgmr.msrb.gmra.mxu0 %vm383_vm10, %v2424_v62  ;;  %4484 = vmatmul.msk.bf16.vlgmr.msrb.gmra.mxu1 %vm383_vm10, %v2424_v62 }
 0xbda   :  { %4491 = vmatmul.msk.bf16.vlgmr.msrb.gmra.mxu2 %vm383_vm10, %v2424_v62  ;;  %4492 = vmatmul.msk.bf16.vlgmr.msrb.gmra.mxu3 %vm383_vm10, %v2424_v62  ;;  %v6925_v62 = vld [vmem:[#allocation35_spill] sm:$0xff] }
 0xbdb   :  { %2859 = vmatpush.bf16.msrb.mxu0 %v5332_v15  ;;  %2872 = vmatpush.bf16.msrb.mxu1 %v5312_v4 }
 0xbdc   :  { %3077 = vmatpush.bf16.msrb.mxu3 %v5540_v10  ;;  %3064 = vmatpush.bf16.msrb.mxu2 %v5569_v14 }
 0xbdf   :  { %2860 = vmatpush.bf16.msrb.mxu0 %v5345_v21  ;;  %2873 = vmatpush.bf16.msrb.mxu1 %v5318_v9 }
 0xbe0   :  { %3078 = vmatpush.bf16.msrb.mxu3 %v6907_v53  ;;  %3065 = vmatpush.bf16.msrb.mxu2 %v6908_v35 }
 0xbe2   :  { %v2506_v59 = vpop.permute.xlu2 %2505 }
 0xbe3   :  { %v2508_v48 = vmul.f32 %v2506_v59, %v2489_v46  ;;  %2861 = vmatpush.bf16.msrb.mxu0 %v6909_v44  ;;  %2874 = vmatpush.bf16.msrb.mxu1 %v6910_v8  ;;  %v6932_v46 = vld [vmem:[#allocation45_spill] sm:$0xff] }
 0xbe4   :  { %3079 = vmatpush.bf16.msrb.mxu3 %v6911_v29  ;;  %3066 = vmatpush.bf16.msrb.mxu2 %v6912_v57 }
 0xbe5   :  { %v2509_v50 = vpack.c.bf16 %v2508_v48, %v2508_v48 }
 0xbe7   :  { %2862 = vmatpush.bf16.msrb.mxu0 %v6913_v24  ;;  %2875 = vmatpush.bf16.msrb.mxu1 %v6914_v58 }
 0xbe8   :  { %3080 = vmatpush.bf16.msrb.mxu3 %v6915_v1  ;;  %3067 = vmatpush.bf16.msrb.mxu2 %v6916_v26  ;;  %v6935_v26 = vld [vmem:[#allocation59_spill] sm:$0xff]  ;;  %v6937_v1 = vld [vmem:[#allocation32_spill] sm:$0xff] }
 0xbe9   :  { %4489 = vmatmul.msk.bf16.vlgmr.msra.gmra.mxu0 %vm383_vm10, %v2509_v50  ;;  %4490 = vmatmul.msk.bf16.vlgmr.msra.gmra.mxu1 %vm383_vm10, %v2509_v50 }
 0xbeb   :  { %2977 = vmatpush.bf16.msra.mxu0 %v6917_v54  ;;  %2990 = vmatpush.bf16.msra.mxu1 %v6918_v13 }
 0xbef   :  { %2978 = vmatpush.bf16.msra.mxu0 %v6919_v23  ;;  %2991 = vmatpush.bf16.msra.mxu1 %v6920_v56 }
 0xbf3   :  { %2979 = vmatpush.bf16.msra.mxu0 %v6921_v22  ;;  %2992 = vmatpush.bf16.msra.mxu1 %v6922_v55  ;;  %v6933_v55 = vld [vmem:[#allocation76_spill] sm:$0xff]  ;;  %v6934_v22 = vld [vmem:[#allocation77_spill] sm:$0xff] }
 0xbf7   :  { %2980 = vmatpush.bf16.msra.mxu0 %v6923_v41  ;;  %2993 = vmatpush.bf16.msra.mxu1 %v6924_v31 }
 0xbf9   :  { %4495 = vmatmul.msk.bf16.vlgmr.msrb.gmra.mxu0 %vm383_vm10, %v2509_v50  ;;  %4496 = vmatmul.msk.bf16.vlgmr.msrb.gmra.mxu1 %vm383_vm10, %v2509_v50 }
 0xbfb   :  { %3090 = vmatpush.bf16.msrb.mxu0 %v6925_v62  ;;  %3103 = vmatpush.bf16.msrb.mxu1 %v6926_v5 }
 0xbff   :  { %3091 = vmatpush.bf16.msrb.mxu0 %v6927_v51  ;;  %3104 = vmatpush.bf16.msrb.mxu1 %v6928_v17 }
 0xc03   :  { %3092 = vmatpush.bf16.msrb.mxu0 %v6929_v16  ;;  %3105 = vmatpush.bf16.msrb.mxu1 %v6930_v3 }
 0xc07   :  { %3093 = vmatpush.bf16.msrb.mxu0 %v6931_v63  ;;  %3106 = vmatpush.bf16.msrb.mxu1 %v6932_v46 }
 0xc3c   :  { %v2552_v59 = vpop.f32.mrf.mxu2  ;;  %v2565_v48 = vpop.f32.mrf.mxu3 }
 0xc44   :  { %v2554_v31 = vpop.f32.mrf.mxu2  ;;  %v2567_v50 = vpop.f32.mrf.mxu3 }
 0xc46   :  { %v2522_v41 = vpop.f32.mrf.mxu0  ;;  %v2535_v62 = vpop.f32.mrf.mxu1 }
 0xc47   :  { %v2523_v5 = vadd.f32 %v2522_v41, %v6933_v55  ;;  %v2536_v51 = vadd.f32 %v2535_v62, %v6934_v22 }
 0xc49   :  { %v2569_v56 = vadd.f32 %v2552_v59, %v2523_v5  ;;  %v6253_v17 = vadd.f32 %v2565_v48, %v2536_v51 }
 0xc4b   :  { %4847 = vtanh.f32 %v6253_v17 }
 0xc4d   :  { %v2665_v3 = vpop.f32.mrf.mxu2  ;;  %v2678_v16 = vpop.f32.mrf.mxu3 }
 0xc4e   :  { %v2524_v63 = vpop.f32.mrf.mxu0  ;;  %v2537_v23 = vpop.f32.mrf.mxu1 }
 0xc51   :  { %v4848_v46 = vpop.eup %4847 }
 0xc52   :  { %2612 = vrot.lane.b32.xlu1 %v4848_v46, %s5176_s2 }
 0xc55   :  { %v2667_v31 = vpop.f32.mrf.mxu2  ;;  %v2680_v50 = vpop.f32.mrf.mxu3 }
 0xc56   :  { %v2639_v13 = vpop.f32.mrf.mxu0  ;;  %v2652_v54 = vpop.f32.mrf.mxu1  ;;  %v6936_v50 = vld [vmem:[#allocation31_spill] sm:$0xff] }
 0xc57   :  { %v2653_v41 = vadd.f32 %v2652_v54, %v6935_v26 }
 0xc59   :  { %v6258_v55 = vadd.f32 %v2678_v16, %v2653_v41 }
 0xc5b   :  { %4849 = vtanh.f32 %v6258_v55 }
 0xc5d   :  { %v2779_v62 = vpop.f32.mrf.mxu2  ;;  %v2792_v5 = vpop.f32.mrf.mxu3 }
 0xc5e   :  { %v2641_v51 = vpop.f32.mrf.mxu0  ;;  %v2654_v59 = vpop.f32.mrf.mxu1 }
 0xc5f   :  { %v6938_v59 = vld [vmem:[#allocation21_spill] sm:$0xff] }
 0xc61   :  { %v4850_v48 = vpop.eup %4849 }
 0xc62   :  { %2725 = vrot.lane.b32.xlu0 %v4850_v48, %s5176_s2  ;;  %v6939_v48 = vld [vmem:[#allocation56_spill] sm:$0xff] }
 0xc65   :  { %v2781_v23 = vpop.f32.mrf.mxu2  ;;  %v2794_v63 = vpop.f32.mrf.mxu3 }
 0xc66   :  { %v2753_v46 = vpop.f32.mrf.mxu0  ;;  %v2766_v31 = vpop.f32.mrf.mxu1  ;;  %v339_v23 = vadd.f32 %v6939_v48, %v6938_v59  ;;  %v6940_v63 = vld [vmem:[#allocation55_spill] sm:$0xff] }
 0xc67   :  { %v2754_v22 = vadd.f32 %v2753_v46, %v6936_v50  ;;  %v2767_v58 = vadd.f32 %v2766_v31, %v6937_v1  ;;  %v310_v24 = vadd.f32 %v6940_v63, %v6905_v49 }
 0xc69   :  { %v2796_v54 = vadd.f32 %v2779_v62, %v2754_v22  ;;  %v6264_v16 = vadd.f32 %v2792_v5, %v2767_v58  ;;  %v6941_v5 = vld [vmem:[#allocation60_spill] sm:$0xff] }
 0xc6b   :  { %4851 = vtanh.f32 %v6264_v16 }
 0xc6e   :  { %v2755_v41 = vpop.f32.mrf.mxu0  ;;  %v2768_v26 = vpop.f32.mrf.mxu1 }
 0xc6f   :  { %v4481_v26 = vmul.f32 -1.442695, %v2569_v56  ;;  %v2640_v41 = vadd.f32 %v2639_v13, %v6941_v5 }
 0xc71   :  { %v4852_v51 = vpop.eup %4851  ;;  %v2682_v59 = vadd.f32 %v2665_v3, %v2640_v41 }
 0xc72   :  { %2839 = vrot.lane.b32.xlu2 %v4852_v51, %s5176_s2  ;;  %v4493_v51 = vmul.f32 -1.442695, %v2796_v54 }
 0xc73   :  { %v4487_v49 = vmul.f32 -1.442695, %v2682_v59 }
 0xc76   :  { %v2864_v57 = vpop.f32.mrf.mxu0  ;;  %v2877_v46 = vpop.f32.mrf.mxu1 }
 0xc77   :  { %v2881_v50 = vadd.f32 %v2864_v57, %v310_v24  ;;  %v6272_v31 = vadd.f32 %v2877_v46, %v339_v23 }
 0xc79   :  { %4853 = vtanh.f32 %v6272_v31  ;;  %v4497_v29 = vmul.f32 -1.442695, %v2881_v50 }
 0xc7a   :  { %4855 = vpow2.f32 %v4481_v26 }
 0xc7b   :  { %4857 = vpow2.f32 %v4493_v51 }
 0xc7e   :  { %v2866_v58 = vpop.f32.mrf.mxu0  ;;  %v2879_v22 = vpop.f32.mrf.mxu1 }
 0xc7f   :  { %v4854_v62 = vpop.eup %4853 }
 0xc80   :  { %2924 = vrot.lane.b32.xlu0 %v4854_v62, %s5176_s2  ;;  %v4856_v48 = vpop.eup %4855 }
 0xc81   :  { %v2577_v63 = vadd.f32 1.0, %v4856_v48  ;;  %v4858_v57 = vpop.eup %4857 }
 0xc82   :  { %v2804_v24 = vadd.f32 1.0, %v4858_v57 }
 0xc83   :  { %4859 = vrcp.f32 %v2577_v63  ;;  %v2590_v41 = vand.u32 2147483648, %v2577_v63  ;;  %vm2584_vm13 = vweird.f32 %v2577_v63  ;;  %v2588_v59 = vand.u32 2147483647, %v2577_v63 }
 0xc84   :  { %4861 = vpow2.f32 %v4487_v49  ;;  %v2817_v44 = vand.u32 2147483648, %v2804_v24  ;;  %vm2811_vm2 = vweird.f32 %v2804_v24 }
 0xc85   :  { %4863 = vrcp.f32 %v2804_v24  ;;  %v2591_v57 = vor.u32 1.1754944e-38, %v2590_v41  ;;  %vm2589_vm15 = vcmp.eq.f32.partialorder %v2588_v59, 8.507059e+37 }
 0xc89   :  { %v4860_v23 = vpop.eup %4859 }
 0xc8a   :  { %v4862_v46 = vpop.eup %4861  ;;  %v2580_v58 = vmul.f32 %v4860_v23, %v2577_v63  ;;  %vm2585_vm12 = vweird.f32 %v4860_v23 }
 0xc8b   :  { %v2690_v22 = vadd.f32 1.0, %v4862_v46  ;;  %v4864_v56 = vpop.eup %4863  ;;  %vm2586_vm14 = vmor %vm2584_vm13, %vm2585_vm12 }
 0xc8c   :  { %v2581_v62 = vsub.f32 1.0, %v2580_v58  ;;  %v2807_v13 = vmul.f32 %v4864_v56, %v2804_v24  ;;  %vm2812_vm0 = vweird.f32 %v4864_v56 }
 0xc8d   :  { %4865 = vrcp.f32 %v2690_v22  ;;  %vm2813_vm3 = vmor %vm2811_vm2, %vm2812_vm0  ;;  %v2703_v50 = vand.u32 2147483648, %v2690_v22  ;;  %vm2697_vm5 = vweird.f32 %v2690_v22 }
 0xc8e   :  { %v2582_v26 = vmul.f32 %v4860_v23, %v2581_v62  ;;  %v2808_v3 = vsub.f32 1.0, %v2807_v13  ;;  %4867 = vpow2.f32 %v4497_v29 }
 0xc90   :  { %v2583_v1 = vadd.f32 %v4860_v23, %v2582_v26  ;;  %v2809_v48 = vmul.f32 %v4864_v56, %v2808_v3  ;;  %v2815_v26 = vand.u32 2147483647, %v2804_v24 }
 0xc92   :  { %v2587_v51 = vsel %vm2586_vm14, %v4860_v23, %v2583_v1  ;;  %v2810_v62 = vadd.f32 %v4864_v56, %v2809_v48  ;;  %v2818_v1 = vor.u32 1.1754944e-38, %v2817_v44  ;;  %vm2816_vm1 = vcmp.eq.f32.partialorder %v2815_v26, 8.507059e+37 }
 0xc93   :  { %v4866_v54 = vpop.eup %4865  ;;  %v2592_v46 = vsel %vm2589_vm15, %v2591_v57, %v2587_v51  ;;  %v2704_v51 = vor.u32 1.1754944e-38, %v2703_v50 }
 0xc94   :  { %v2693_v49 = vmul.f32 %v4866_v54, %v2690_v22  ;;  %v2814_v63 = vsel %vm2813_vm3, %v4864_v56, %v2810_v62  ;;  %vm2698_vm4 = vweird.f32 %v4866_v54 }
 0xc95   :  { %v2819_v3 = vsel %vm2816_vm1, %v2818_v1, %v2814_v63  ;;  %vm2699_vm6 = vmor %vm2697_vm5, %vm2698_vm4 }
 0xc96   :  { %v2694_v58 = vsub.f32 1.0, %v2693_v49  ;;  %v2701_v49 = vand.u32 2147483647, %v2690_v22 }
 0xc98   :  { %v2695_v13 = vmul.f32 %v4866_v54, %v2694_v58  ;;  %vm2702_vm7 = vcmp.eq.f32.partialorder %v2701_v49, 8.507059e+37 }
 0xc9a   :  { %v2696_v59 = vadd.f32 %v4866_v54, %v2695_v13 }
 0xcc4   :  { %v2613_v5 = vpop.permute.xlu1 %2612 }
 0xcc5   :  { %v2615_v8 = vmul.f32 %v2613_v5, %v2592_v46  ;;  %v4868_v5 = vpop.eup %4867 }
 0xcc6   :  { %v2889_v24 = vadd.f32 1.0, %v4868_v5 }
 0xcc7   :  { %2617 = vrot.lane.b32.xlu2 %v2615_v8, %s5176_s2  ;;  %v2700_v8 = vsel %vm2699_vm6, %v4866_v54, %v2696_v59  ;;  %v2610_v59 = vmul.f32 %v2592_v46, %v6155_v30 }
 0xcc8   :  { %v2705_v56 = vsel %vm2702_vm7, %v2704_v51, %v2700_v8  ;;  %4869 = vrcp.f32 %v2889_v24  ;;  %v2902_v63 = vand.u32 2147483648, %v2889_v24  ;;  %vm2896_vm9 = vweird.f32 %v2889_v24 }
 0xcc9   :  { %v2900_v22 = vand.u32 2147483647, %v2889_v24  ;;  %v2837_v8 = vmul.f32 %v2819_v3, %v6160_v52 }
 0xcca   :  { %v2903_v13 = vor.u32 1.1754944e-38, %v2902_v63 }
 0xccb   :  { %vm2901_vm12 = vcmp.eq.f32.partialorder %v2900_v22, 8.507059e+37 }
 0xccc   :  { %v2840_v23 = vpop.permute.xlu2 %2839 }
 0xccd   :  { %v2842_v41 = vmul.f32 %v2840_v23, %v2819_v3 }
 0xcce   :  { %v4870_v48 = vpop.eup %4869 }
 0xccf   :  { %2844 = vrot.lane.b32.xlu0 %v2842_v41, %s5176_s2  ;;  %v2892_v57 = vmul.f32 %v4870_v48, %v2889_v24  ;;  %vm2897_vm8 = vweird.f32 %v4870_v48 }
 0xcd0   :  { %vm2898_vm11 = vmor %vm2896_vm9, %vm2897_vm8 }
 0xcd1   :  { %v2893_v58 = vsub.f32 1.0, %v2892_v57 }
 0xcd3   :  { %v2894_v62 = vmul.f32 %v4870_v48, %v2893_v58 }
 0xcd4   :  { %v2726_v29 = vpop.permute.xlu0 %2725 }
 0xcd5   :  { %v2728_v44 = vmul.f32 %v2726_v29, %v2705_v56  ;;  %v2895_v26 = vadd.f32 %v4870_v48, %v2894_v62  ;;  %v2723_v29 = vmul.f32 %v2705_v56, %v6151_v43  ;;  %v4482_v43 = vmul.f32 -1.442695, %v6253_v17 }
 0xcd7   :  { %2730 = vrot.lane.b32.xlu1 %v2728_v44, %s5176_s2  ;;  %v2899_v54 = vsel %vm2898_vm11, %v4870_v48, %v2895_v26  ;;  %v4488_v26 = vmul.f32 -1.442695, %v6258_v55 }
 0xcd8   :  { %v2904_v23 = vsel %vm2901_vm12, %v2903_v13, %v2899_v54 }
 0xcd9   :  { %v2922_v52 = vmul.f32 %v2904_v23, %v6166_v6 }
 0xcf2   :  { %v2925_v1 = vpop.permute.xlu0 %2924 }
 0xcf3   :  { %v2927_v41 = vmul.f32 %v2925_v1, %v2904_v23  ;;  %v4494_v1 = vmul.f32 -1.442695, %v6264_v16  ;;  %v4498_v16 = vmul.f32 -1.442695, %v6272_v31 }
 0xcf5   :  { %2929 = vrot.lane.b32.xlu1 %v2927_v41, %s5176_s2 }
 0xd21   :  { %v2618_v50 = vpop.permute.xlu2 %2617 }
 0xd22   :  { %v6282_v5 = vadd.f32 %v2618_v50, %v2610_v59 }
 0xd24   :  { %4871 = vtanh.f32 %v6282_v5 }
 0xd2a   :  { %v4872_v49 = vpop.eup %4871 }
 0xd2b   :  { %2623 = vrot.lane.b32.xlu0 %v4872_v49, %s5176_s2 }
 0xd41   :  { %v2845_v24 = vpop.permute.xlu0 %2844 }
 0xd42   :  { %v6287_v51 = vadd.f32 %v2845_v24, %v2837_v8 }
 0xd44   :  { %4873 = vtanh.f32 %v6287_v51 }
 0xd49   :  { %v2731_v44 = vpop.permute.xlu1 %2730 }
 0xd4a   :  { %v4874_v48 = vpop.eup %4873  ;;  %v6291_v30 = vadd.f32 %v2731_v44, %v2723_v29 }
 0xd4b   :  { %2850 = vrot.lane.b32.xlu1 %v4874_v48, %s5176_s2 }
 0xd4c   :  { %4875 = vtanh.f32 %v6291_v30 }
 0xd52   :  { %v4876_v46 = vpop.eup %4875 }
 0xd53   :  { %2736 = vrot.lane.b32.xlu2 %v4876_v46, %s5176_s2 }
 0xd67   :  { %v2930_v3 = vpop.permute.xlu1 %2929 }
 0xd68   :  { %v6297_v57 = vadd.f32 %v2930_v3, %v2922_v52 }
 0xd6a   :  { %4877 = vtanh.f32 %v6297_v57 }
 0xd6b   :  { %4879 = vpow2.f32 %v4482_v43 }
 0xd70   :  { %v4878_v58 = vpop.eup %4877 }
 0xd71   :  { %2935 = vrot.lane.b32.xlu2 %v4878_v58, %s5176_s2  ;;  %v4880_v56 = vpop.eup %4879 }
 0xd72   :  { %v2578_v62 = vadd.f32 1.0, %v4880_v56 }
 0xd74   :  { %4881 = vrcp.f32 %v2578_v62  ;;  %v2605_v59 = vand.u32 2147483648, %v2578_v62  ;;  %vm2599_vm14 = vweird.f32 %v2578_v62  ;;  %v2603_v50 = vand.u32 2147483647, %v2578_v62 }
 0xd75   :  { %4883 = vpow2.f32 %v4488_v26 }
 0xd76   :  { %v2606_v24 = vor.u32 1.1754944e-38, %v2605_v59  ;;  %vm2604_vm0 = vcmp.eq.f32.partialorder %v2603_v50, 8.507059e+37 }
 0xd7a   :  { %v4882_v63 = vpop.eup %4881 }
 0xd7b   :  { %v4884_v22 = vpop.eup %4883  ;;  %v2595_v6 = vmul.f32 %v4882_v63, %v2578_v62  ;;  %vm2600_vm13 = vweird.f32 %v4882_v63 }
 0xd7c   :  { %v2691_v54 = vadd.f32 1.0, %v4884_v22  ;;  %vm2601_vm15 = vmor %vm2599_vm14, %vm2600_vm13 }
 0xd7d   :  { %v2596_v13 = vsub.f32 1.0, %v2595_v6 }
 0xd7e   :  { %4885 = vrcp.f32 %v2691_v54  ;;  %v2718_v62 = vand.u32 2147483648, %v2691_v54  ;;  %vm2712_vm3 = vweird.f32 %v2691_v54  ;;  %v2716_v26 = vand.u32 2147483647, %v2691_v54 }
 0xd7f   :  { %v2597_v23 = vmul.f32 %v4882_v63, %v2596_v13  ;;  %4887 = vpow2.f32 %v4494_v1 }
 0xd80   :  { %v2719_v13 = vor.u32 1.1754944e-38, %v2718_v62  ;;  %vm2717_vm4 = vcmp.eq.f32.partialorder %v2716_v26, 8.507059e+37 }
 0xd81   :  { %v2598_v17 = vadd.f32 %v4882_v63, %v2597_v23 }
 0xd83   :  { %v2602_v49 = vsel %vm2601_vm15, %v4882_v63, %v2598_v17 }
 0xd84   :  { %v4886_v41 = vpop.eup %4885  ;;  %v2607_v44 = vsel %vm2604_vm0, %v2606_v24, %v2602_v49 }
 0xd85   :  { %v4888_v55 = vpop.eup %4887  ;;  %v2708_v8 = vmul.f32 %v4886_v41, %v2691_v54  ;;  %vm2713_vm2 = vweird.f32 %v4886_v41 }
 0xd86   :  { %v2805_v29 = vadd.f32 1.0, %v4888_v55  ;;  %vm2714_vm1 = vmor %vm2712_vm3, %vm2713_vm2 }
 0xd87   :  { %v2709_v52 = vsub.f32 1.0, %v2708_v8 }
 0xd88   :  { %4889 = vrcp.f32 %v2805_v29  ;;  %v2832_v49 = vand.u32 2147483648, %v2805_v29  ;;  %vm2826_vm6 = vweird.f32 %v2805_v29  ;;  %v2830_v8 = vand.u32 2147483647, %v2805_v29 }
 0xd89   :  { %4891 = vpow2.f32 %v4498_v16  ;;  %v2710_v58 = vmul.f32 %v4886_v41, %v2709_v52 }
 0xd8a   :  { %vm2831_vm8 = vcmp.eq.f32.partialorder %v2830_v8, 8.507059e+37  ;;  %v6955_v8 = vld [vmem:[#allocation69_spill] sm:$0xff] }
 0xd8b   :  { %v2711_v43 = vadd.f32 %v4886_v41, %v2710_v58 }
 0xd8d   :  { %v2715_v63 = vsel %vm2714_vm1, %v4886_v41, %v2711_v43 }
 0xd8e   :  { %v4890_v56 = vpop.eup %4889  ;;  %v2720_v1 = vsel %vm2717_vm4, %v2719_v13, %v2715_v63  ;;  %v6943_v13 = vld [vmem:[#allocation17_spill] sm:$0xff] }
 0xd8f   :  { %v4892_v31 = vpop.eup %4891  ;;  %v2822_v22 = vmul.f32 %v4890_v56, %v2805_v29  ;;  %vm2827_vm5 = vweird.f32 %v4890_v56 }
 0xd90   :  { %v6311_v6 = vadd.f32 1.0, %v4892_v31  ;;  %vm2828_vm7 = vmor %vm2826_vm6, %vm2827_vm5 }
 0xd91   :  { %v2823_v59 = vsub.f32 1.0, %v2822_v22  ;;  %v6942_v22 = vld [vmem:[#allocation18_spill] sm:$0xff] }
 0xd92   :  { %4893 = vrcp.f32 %v6311_v6  ;;  %vm2911_vm11 = vweird.f32 %v6311_v6  ;;  %v2915_v62 = vand.u32 2147483647, %v6311_v6 }
 0xd93   :  { %v2824_v41 = vmul.f32 %v4890_v56, %v2823_v59  ;;  %v6949_v59 = vld [vmem:[#allocation48_spill] sm:$0xff] }
 0xd94   :  { %vm2916_vm13 = vcmp.eq.f32.partialorder %v2915_v62, 8.507059e+37 }
 0xd95   :  { %v2825_v55 = vadd.f32 %v4890_v56, %v2824_v41  ;;  %v6951_v41 = vld [vmem:[#allocation65_spill] sm:$0xff] }
 0xd98   :  { %v4894_v50 = vpop.eup %4893 }
 0xd99   :  { %v2907_v24 = vmul.f32 %v4894_v50, %v6311_v6  ;;  %vm2912_vm9 = vweird.f32 %v4894_v50 }
 0xd9a   :  { %vm2913_vm12 = vmor %vm2911_vm11, %vm2912_vm9 }
 0xd9b   :  { %v2908_v16 = vsub.f32 1.0, %v2907_v24  ;;  %v6956_v24 = vld [vmem:[#allocation70_spill] sm:$0xff] }
 0xd9d   :  { %v2624_v48 = vpop.permute.xlu0 %2623  ;;  %v2909_v58 = vmul.f32 %v4894_v50, %v2908_v16  ;;  %v6959_v16 = vld [vmem:[#allocation36_spill] sm:$0xff] }
 0xd9e   :  { %v2626_v46 = vmul.f32 %v2624_v48, %v2607_v44  ;;  %v2829_v44 = vsel %vm2828_vm7, %v4890_v56, %v2825_v55  ;;  %v2833_v48 = vor.u32 1.1754944e-38, %v2832_v49  ;;  %v2917_v56 = vand.u32 2147483648, %v6311_v6  ;;  %v6944_v6 = vld [vmem:[#allocation39_spill] sm:$0xff]  ;;  %v6954_v49 = vld [vmem:[#allocation68_spill] sm:$0xff] }
 0xd9f   :  { %v2910_v43 = vadd.f32 %v4894_v50, %v2909_v58  ;;  %v6953_v55 = vld [vmem:[#allocation67_spill] sm:$0xff]  ;;  %v6964_v58 = vld [vmem:[#allocation44_spill] sm:$0xff] }
 0xda0   :  { %v2969_v3 = vpack.c.bf16 %v2626_v46, %v2626_v46  ;;  %v2834_v29 = vsel %vm2831_vm8, %v2833_v48, %v2829_v44  ;;  %v2918_v26 = vor.u32 1.1754944e-38, %v2917_v56  ;;  %v6957_v44 = vld [vmem:[#allocation71_spill] sm:$0xff] }
 0xda1   :  { %v2914_v31 = vsel %vm2913_vm12, %v4894_v50, %v2910_v43  ;;  %v6952_v50 = vld [vmem:[#allocation66_spill] sm:$0xff]  ;;  %v6958_v48 = vld [vmem:[#allocation35_spill] sm:$0xff]  ;;  %v6965_v43 = vld [vmem:[#allocation45_spill] sm:$0xff] }
 0xda2   :  { %4501 = vmatmul.msk.bf16.vlgmr.msra.gmra.mxu0 %vm383_vm10, %v2969_v3  ;;  %4502 = vmatmul.msk.bf16.vlgmr.msra.gmra.mxu1 %vm383_vm10, %v2969_v3 }
 0xda3   :  { %3204 = vmatpush.bf16.msra.mxu0 %v6842_v34  ;;  %3217 = vmatpush.bf16.msra.mxu1 %v6843_v42 }
 0xda7   :  { %3205 = vmatpush.bf16.msra.mxu0 %v6844_v33  ;;  %3218 = vmatpush.bf16.msra.mxu1 %v6845_v45 }
 0xdab   :  { %3206 = vmatpush.bf16.msra.mxu0 %v6846_v40  ;;  %3219 = vmatpush.bf16.msra.mxu1 %v6847_v36 }
 0xdad   :  { %v2737_v23 = vpop.permute.xlu2 %2736 }
 0xdae   :  { %v2739_v17 = vmul.f32 %v2737_v23, %v2720_v1  ;;  %v6945_v1 = vld [vmem:[#allocation47_spill] sm:$0xff]  ;;  %v6946_v23 = vld [vmem:[#allocation20_spill] sm:$0xff] }
 0xdaf   :  { %3207 = vmatpush.bf16.msra.mxu0 %v6848_v60  ;;  %3220 = vmatpush.bf16.msra.mxu1 %v6849_v61 }
 0xdb0   :  { %v2740_v54 = vpack.c.bf16 %v2739_v17, %v2739_v17  ;;  %v6948_v17 = vld [vmem:[#allocation43_spill] sm:$0xff] }
 0xdb2   :  { %4499 = vmatmul.msk.bf16.vlgmr.msra.gmra.mxu2 %vm383_vm10, %v2740_v54  ;;  %4500 = vmatmul.msk.bf16.vlgmr.msra.gmra.mxu3 %vm383_vm10, %v2740_v54 }
 0xdb3   :  { %4507 = vmatmul.msk.bf16.vlgmr.msrb.gmra.mxu0 %vm383_vm10, %v2740_v54  ;;  %4508 = vmatmul.msk.bf16.vlgmr.msrb.gmra.mxu1 %vm383_vm10, %v2740_v54  ;;  %v6950_v54 = vld [vmem:[#allocation64_spill] sm:$0xff] }
 0xdb4   :  { %3191 = vmatpush.bf16.msra.mxu3 %v5407_v2  ;;  %3178 = vmatpush.bf16.msra.mxu2 %v5418_v7 }
 0xdb5   :  { %3390 = vmatpush.bf16.msrb.mxu1 %v5718_v27  ;;  %3377 = vmatpush.bf16.msrb.mxu0 %v5723_v20 }
 0xdb8   :  { %3192 = vmatpush.bf16.msra.mxu3 %v5427_v11  ;;  %3179 = vmatpush.bf16.msra.mxu2 %v5430_v12 }
 0xdb9   :  { %3391 = vmatpush.bf16.msrb.mxu1 %v5729_v0  ;;  %3378 = vmatpush.bf16.msrb.mxu0 %v5732_v38 }
 0xdbc   :  { %3193 = vmatpush.bf16.msra.mxu3 %v5445_v18  ;;  %3180 = vmatpush.bf16.msra.mxu2 %v5448_v19 }
 0xdbd   :  { %v2851_v46 = vpop.permute.xlu1 %2850  ;;  %3392 = vmatpush.bf16.msrb.mxu1 %v5742_v28  ;;  %3379 = vmatpush.bf16.msrb.mxu0 %v5744_v25 }
 0xdbe   :  { %v2853_v52 = vmul.f32 %v2851_v46, %v2834_v29  ;;  %v6960_v29 = vld [vmem:[#allocation37_spill] sm:$0xff]  ;;  %v6961_v46 = vld [vmem:[#allocation38_spill] sm:$0xff] }
 0xdc0   :  { %v2854_v3 = vpack.c.bf16 %v2853_v52, %v2853_v52  ;;  %3194 = vmatpush.bf16.msra.mxu3 %v5466_v37  ;;  %3181 = vmatpush.bf16.msra.mxu2 %v5471_v39  ;;  %v6962_v52 = vld [vmem:[#allocation40_spill] sm:$0xff] }
 0xdc1   :  { %3393 = vmatpush.bf16.msrb.mxu1 %v5770_v47  ;;  %3380 = vmatpush.bf16.msrb.mxu0 %v5772_v32  ;;  %v6971_v47 = vld [vmem:[#allocation32_spill] sm:$0xff] }
 0xdc2   :  { %4505 = vmatmul.msk.bf16.vlgmr.msrb.gmra.mxu2 %vm383_vm10, %v2854_v3  ;;  %4506 = vmatmul.msk.bf16.vlgmr.msrb.gmra.mxu3 %vm383_vm10, %v2854_v3 }
 0xdc3   :  { %4513 = vmatmul.msk.bf16.vlgmr.msra.gmra.mxu0 %vm383_vm10, %v2854_v3  ;;  %4514 = vmatmul.msk.bf16.vlgmr.msra.gmra.mxu1 %vm383_vm10, %v2854_v3  ;;  %v6963_v3 = vld [vmem:[#allocation41_spill] sm:$0xff] }
 0xdc4   :  { %3289 = vmatpush.bf16.msrb.mxu2 %v5332_v15  ;;  %3302 = vmatpush.bf16.msrb.mxu3 %v5312_v4  ;;  %v2919_v4 = vsel %vm2916_vm13, %v2918_v26, %v2914_v31 }
 0xdc5   :  { %3507 = vmatpush.bf16.msra.mxu1 %v5540_v10  ;;  %3494 = vmatpush.bf16.msra.mxu0 %v5569_v14 }
 0xdc8   :  { %3290 = vmatpush.bf16.msrb.mxu2 %v5345_v21  ;;  %3303 = vmatpush.bf16.msrb.mxu3 %v5318_v9  ;;  %v6947_v9 = vld [vmem:[#allocation19_spill] sm:$0xff] }
 0xdc9   :  { %3508 = vmatpush.bf16.msra.mxu1 %v6907_v53  ;;  %3495 = vmatpush.bf16.msra.mxu0 %v6908_v35 }
 0xdcb   :  { %v2936_v15 = vpop.permute.xlu2 %2935 }
 0xdcc   :  { %v2938_v63 = vmul.f32 %v2936_v15, %v2919_v4  ;;  %3291 = vmatpush.bf16.msrb.mxu2 %v6942_v22  ;;  %3304 = vmatpush.bf16.msrb.mxu3 %v6943_v13  ;;  %v6966_v13 = vld [vmem:[#allocation76_spill] sm:$0xff] }
 0xdcd   :  { %3509 = vmatpush.bf16.msra.mxu1 %v6944_v6  ;;  %3496 = vmatpush.bf16.msra.mxu0 %v6945_v1 }
 0xdce   :  { %v2939_v21 = vpack.c.bf16 %v2938_v63, %v2938_v63 }
 0xdd0   :  { %3292 = vmatpush.bf16.msrb.mxu2 %v6946_v23  ;;  %3305 = vmatpush.bf16.msrb.mxu3 %v6947_v9  ;;  %v6967_v23 = vld [vmem:[#allocation77_spill] sm:$0xff] }
 0xdd1   :  { %3510 = vmatpush.bf16.msra.mxu1 %v6948_v17  ;;  %3497 = vmatpush.bf16.msra.mxu0 %v6949_v59 }
 0xdd2   :  { %4511 = vmatmul.msk.bf16.vlgmr.msra.gmra.mxu2 %vm383_vm10, %v2939_v21  ;;  %4512 = vmatmul.msk.bf16.vlgmr.msra.gmra.mxu3 %vm383_vm10, %v2939_v21 }
 0xdd4   :  { %3407 = vmatpush.bf16.msra.mxu2 %v6950_v54  ;;  %3420 = vmatpush.bf16.msra.mxu3 %v6951_v41 }
 0xdd8   :  { %3408 = vmatpush.bf16.msra.mxu2 %v6952_v50  ;;  %3421 = vmatpush.bf16.msra.mxu3 %v6953_v55 }
 0xddc   :  { %3409 = vmatpush.bf16.msra.mxu2 %v6954_v49  ;;  %3422 = vmatpush.bf16.msra.mxu3 %v6955_v8 }
 0xde0   :  { %3410 = vmatpush.bf16.msra.mxu2 %v6956_v24  ;;  %3423 = vmatpush.bf16.msra.mxu3 %v6957_v44 }
 0xde2   :  { %4517 = vmatmul.msk.bf16.vlgmr.msrb.gmra.mxu2 %vm383_vm10, %v2939_v21  ;;  %4518 = vmatmul.msk.bf16.vlgmr.msrb.gmra.mxu3 %vm383_vm10, %v2939_v21 }
 0xde4   :  { %3520 = vmatpush.bf16.msrb.mxu2 %v6958_v48  ;;  %3533 = vmatpush.bf16.msrb.mxu3 %v6959_v16 }
 0xde8   :  { %3521 = vmatpush.bf16.msrb.mxu2 %v6960_v29  ;;  %3534 = vmatpush.bf16.msrb.mxu3 %v6961_v46 }
 0xdec   :  { %3522 = vmatpush.bf16.msrb.mxu2 %v6962_v52  ;;  %3535 = vmatpush.bf16.msrb.mxu3 %v6963_v3 }
 0xdf0   :  { %3523 = vmatpush.bf16.msrb.mxu2 %v6964_v58  ;;  %3536 = vmatpush.bf16.msrb.mxu3 %v6965_v43  ;;  %v6968_v58 = vld [vmem:[#allocation60_spill] sm:$0xff] }
 0xe1f   :  { %v2982_v56 = vpop.f32.mrf.mxu0  ;;  %v2995_v62 = vpop.f32.mrf.mxu1 }
 0xe27   :  { %v2984_v31 = vpop.f32.mrf.mxu0  ;;  %v2997_v26 = vpop.f32.mrf.mxu1 }
 0xe30   :  { %v3095_v4 = vpop.f32.mrf.mxu0  ;;  %v3108_v15 = vpop.f32.mrf.mxu1 }
 0xe35   :  { %v2952_v63 = vpop.f32.mrf.mxu2  ;;  %v2965_v22 = vpop.f32.mrf.mxu3 }
 0xe36   :  { %v2953_v21 = vadd.f32 %v2952_v63, %v6966_v13  ;;  %v2966_v9 = vadd.f32 %v2965_v22, %v6967_v23  ;;  %v6969_v13 = vld [vmem:[#allocation59_spill] sm:$0xff] }
 0xe37   :  { %v6970_v23 = vld [vmem:[#allocation31_spill] sm:$0xff] }
 0xe38   :  { %v2999_v59 = vadd.f32 %v2982_v56, %v2953_v21  ;;  %v6384_v17 = vadd.f32 %v2995_v62, %v2966_v9  ;;  %v3097_v1 = vpop.f32.mrf.mxu0  ;;  %v3110_v6 = vpop.f32.mrf.mxu1 }
 0xe3a   :  { %4895 = vtanh.f32 %v6384_v17 }
 0xe3d   :  { %v2954_v35 = vpop.f32.mrf.mxu2  ;;  %v2967_v53 = vpop.f32.mrf.mxu3 }
 0xe40   :  { %v4896_v14 = vpop.eup %4895  ;;  %v3209_v31 = vpop.f32.mrf.mxu0 }
 0xe41   :  { %v3222_v26 = vpop.f32.mrf.mxu1  ;;  %3042 = vrot.lane.b32.xlu0 %v4896_v14, %s5176_s2 }
 0xe45   :  { %v3069_v10 = vpop.f32.mrf.mxu2  ;;  %v3082_v43 = vpop.f32.mrf.mxu3 }
 0xe46   :  { %v3070_v63 = vadd.f32 %v3069_v10, %v6968_v58  ;;  %v3083_v22 = vadd.f32 %v3082_v43, %v6969_v13 }
 0xe48   :  { %v3112_v56 = vadd.f32 %v3095_v4, %v3070_v63  ;;  %v6390_v62 = vadd.f32 %v3108_v15, %v3083_v22  ;;  %v3211_v1 = vpop.f32.mrf.mxu0  ;;  %v6972_v22 = vld [vmem:[#allocation21_spill] sm:$0xff] }
 0xe49   :  { %v3224_v6 = vpop.f32.mrf.mxu1  ;;  %v6973_v1 = vld [vmem:[#allocation58_spill] sm:$0xff] }
 0xe4a   :  { %4897 = vtanh.f32 %v6390_v62  ;;  %v341_v6 = vadd.f32 %v6973_v1, %v6972_v22 }
 0xe4d   :  { %v3071_v35 = vpop.f32.mrf.mxu2  ;;  %v3084_v53 = vpop.f32.mrf.mxu3 }
 0xe50   :  { %v4898_v21 = vpop.eup %4897 }
 0xe51   :  { %3155 = vrot.lane.b32.xlu1 %v4898_v21, %s5176_s2 }
 0xe55   :  { %v3183_v9 = vpop.f32.mrf.mxu2  ;;  %v3196_v14 = vpop.f32.mrf.mxu3 }
 0xe56   :  { %v3184_v32 = vadd.f32 %v3183_v9, %v6970_v23  ;;  %v3197_v10 = vadd.f32 %v3196_v14, %v6971_v47  ;;  %v6975_v23 = vld [vmem:[#allocation57_spill] sm:$0xff] }
 0xe58   :  { %v3226_v58 = vadd.f32 %v3209_v31, %v3184_v32  ;;  %v6396_v43 = vadd.f32 %v3222_v26, %v3197_v10  ;;  %v4503_v26 = vmul.f32 -1.442695, %v2999_v59 }
 0xe5a   :  { %4899 = vtanh.f32 %v6396_v43  ;;  %v4515_v14 = vmul.f32 -1.442695, %v3226_v58 }
 0xe5d   :  { %v3185_v4 = vpop.f32.mrf.mxu2  ;;  %v3198_v15 = vpop.f32.mrf.mxu3 }
 0xe5e   :  { %v4509_v15 = vmul.f32 -1.442695, %v3112_v56  ;;  %v6974_v56 = vld [vmem:[#allocation22_spill] sm:$0xff] }
 0xe5f   :  { %v312_v13 = vadd.f32 %v6975_v23, %v6974_v56 }
 0xe60   :  { %v4900_v63 = vpop.eup %4899 }
 0xe61   :  { %3269 = vrot.lane.b32.xlu2 %v4900_v63, %s5176_s2 }
 0xe65   :  { %v3294_v35 = vpop.f32.mrf.mxu2  ;;  %v3307_v53 = vpop.f32.mrf.mxu3 }
 0xe66   :  { %v6402_v21 = vadd.f32 %v3307_v53, %v341_v6  ;;  %v3311_v3 = vadd.f32 %v3294_v35, %v312_v13 }
 0xe68   :  { %4901 = vtanh.f32 %v6402_v21  ;;  %v4519_v46 = vmul.f32 -1.442695, %v3311_v3 }
 0xe69   :  { %4903 = vpow2.f32 %v4503_v26 }
 0xe6a   :  { %4905 = vpow2.f32 %v4515_v14 }
 0xe6d   :  { %v3296_v9 = vpop.f32.mrf.mxu2  ;;  %v3309_v32 = vpop.f32.mrf.mxu3 }
 0xe6e   :  { %v4902_v31 = vpop.eup %4901 }
 0xe6f   :  { %3354 = vrot.lane.b32.xlu0 %v4902_v31, %s5176_s2  ;;  %v4904_v10 = vpop.eup %4903 }
 0xe70   :  { %v3007_v4 = vadd.f32 1.0, %v4904_v10  ;;  %v4906_v63 = vpop.eup %4905 }
 0xe71   :  { %v3234_v22 = vadd.f32 1.0, %v4906_v63 }
 0xe72   :  { %4907 = vrcp.f32 %v3007_v4  ;;  %v3020_v10 = vand.u32 2147483648, %v3007_v4  ;;  %vm3014_vm15 = vweird.f32 %v3007_v4 }
 0xe73   :  { %4909 = vpow2.f32 %v4509_v15  ;;  %v3018_v15 = vand.u32 2147483647, %v3007_v4  ;;  %vm3241_vm1 = vweird.f32 %v3234_v22  ;;  %v3245_v23 = vand.u32 2147483647, %v3234_v22 }
 0xe74   :  { %4911 = vrcp.f32 %v3234_v22 }
 0xe75   :  { %vm3019_vm2 = vcmp.eq.f32.partialorder %v3018_v15, 8.507059e+37  ;;  %vm3246_vm5 = vcmp.eq.f32.partialorder %v3245_v23, 8.507059e+37 }
 0xe78   :  { %v4908_v1 = vpop.eup %4907 }
 0xe79   :  { %v4910_v6 = vpop.eup %4909  ;;  %v3010_v53 = vmul.f32 %v4908_v1, %v3007_v4  ;;  %vm3015_vm14 = vweird.f32 %v4908_v1 }
 0xe7a   :  { %v3120_v9 = vadd.f32 1.0, %v4910_v6  ;;  %v4912_v47 = vpop.eup %4911  ;;  %vm3016_vm0 = vmor %vm3014_vm15, %vm3015_vm14 }
 0xe7b   :  { %v3011_v32 = vsub.f32 1.0, %v3010_v53  ;;  %v3237_v59 = vmul.f32 %v4912_v47, %v3234_v22  ;;  %v3021_v53 = vor.u32 1.1754944e-38, %v3020_v10  ;;  %vm3242_vm3 = vweird.f32 %v4912_v47 }
 0xe7c   :  { %4913 = vrcp.f32 %v3120_v9  ;;  %vm3243_vm4 = vmor %vm3241_vm1, %vm3242_vm3  ;;  %v3133_v3 = vand.u32 2147483648, %v3120_v9  ;;  %vm3127_vm7 = vweird.f32 %v3120_v9  ;;  %v3131_v10 = vand.u32 2147483647, %v3120_v9 }
 0xe7d   :  { %v3012_v31 = vmul.f32 %v4908_v1, %v3011_v32  ;;  %v3238_v14 = vsub.f32 1.0, %v3237_v59  ;;  %v3247_v59 = vand.u32 2147483648, %v3234_v22  ;;  %4915 = vpow2.f32 %v4519_v46 }
 0xe7e   :  { %v3134_v15 = vor.u32 1.1754944e-38, %v3133_v3  ;;  %vm3132_vm9 = vcmp.eq.f32.partialorder %v3131_v10, 8.507059e+37 }
 0xe7f   :  { %v3013_v58 = vadd.f32 %v4908_v1, %v3012_v31  ;;  %v3239_v6 = vmul.f32 %v4912_v47, %v3238_v14  ;;  %v3248_v35 = vor.u32 1.1754944e-38, %v3247_v59 }
 0xe81   :  { %v3017_v52 = vsel %vm3016_vm0, %v4908_v1, %v3013_v58  ;;  %v3240_v29 = vadd.f32 %v4912_v47, %v3239_v6 }
 0xe82   :  { %v4914_v26 = vpop.eup %4913  ;;  %v3022_v32 = vsel %vm3019_vm2, %v3021_v53, %v3017_v52 }
 0xe83   :  { %v3123_v63 = vmul.f32 %v4914_v26, %v3120_v9  ;;  %v3244_v4 = vsel %vm3243_vm4, %v4912_v47, %v3240_v29  ;;  %vm3128_vm6 = vweird.f32 %v4914_v26  ;;  %v3040_v3 = vmul.f32 %v3022_v32, %v6282_v5 }
 0xe84   :  { %v3249_v58 = vsel %vm3246_vm5, %v3248_v35, %v3244_v4  ;;  %vm3129_vm8 = vmor %vm3127_vm7, %vm3128_vm6 }
 0xe85   :  { %v3124_v28 = vsub.f32 1.0, %v3123_v63 }
 0xe87   :  { %v3125_v13 = vmul.f32 %v4914_v26, %v3124_v28 }
 0xe89   :  { %v3126_v52 = vadd.f32 %v4914_v26, %v3125_v13 }
 0xe8b   :  { %v3130_v56 = vsel %vm3129_vm8, %v4914_v26, %v3126_v52 }
 0xe8c   :  { %v3135_v28 = vsel %vm3132_vm9, %v3134_v15, %v3130_v56 }
 0xeb3   :  { %v3043_v25 = vpop.permute.xlu0 %3042 }
 0xeb4   :  { %v3045_v31 = vmul.f32 %v3043_v25, %v3022_v32  ;;  %v4916_v25 = vpop.eup %4915 }
 0xeb5   :  { %v3319_v22 = vadd.f32 1.0, %v4916_v25 }
 0xeb6   :  { %3047 = vrot.lane.b32.xlu1 %v3045_v31, %s5176_s2 }
 0xeb7   :  { %4917 = vrcp.f32 %v3319_v22  ;;  %v3332_v59 = vand.u32 2147483648, %v3319_v22  ;;  %vm3326_vm12 = vweird.f32 %v3319_v22  ;;  %v3330_v9 = vand.u32 2147483647, %v3319_v22 }
 0xeb9   :  { %v3333_v23 = vor.u32 1.1754944e-38, %v3332_v59  ;;  %vm3331_vm14 = vcmp.eq.f32.partialorder %v3330_v9, 8.507059e+37 }
 0xebb   :  { %v3270_v1 = vpop.permute.xlu2 %3269 }
 0xebc   :  { %v3272_v14 = vmul.f32 %v3270_v1, %v3249_v58  ;;  %v3153_v1 = vmul.f32 %v3135_v28, %v6291_v30 }
 0xebd   :  { %v4918_v46 = vpop.eup %4917 }
 0xebe   :  { %3274 = vrot.lane.b32.xlu0 %v3272_v14, %s5176_s2  ;;  %v3322_v63 = vmul.f32 %v4918_v46, %v3319_v22  ;;  %vm3327_vm11 = vweird.f32 %v4918_v46  ;;  %v3267_v22 = vmul.f32 %v3249_v58, %v6287_v51 }
 0xebf   :  { %vm3328_vm13 = vmor %vm3326_vm12, %vm3327_vm11 }
 0xec0   :  { %v3323_v6 = vsub.f32 1.0, %v3322_v63  ;;  %v4504_v63 = vmul.f32 -1.442695, %v6384_v17 }
 0xec2   :  { %v3324_v53 = vmul.f32 %v4918_v46, %v3323_v6  ;;  %v4510_v6 = vmul.f32 -1.442695, %v6390_v62 }
 0xec3   :  { %v3156_v47 = vpop.permute.xlu1 %3155 }
 0xec4   :  { %v3158_v29 = vmul.f32 %v3156_v47, %v3135_v28  ;;  %v3325_v31 = vadd.f32 %v4918_v46, %v3324_v53 }
 0xec6   :  { %3160 = vrot.lane.b32.xlu2 %v3158_v29, %s5176_s2  ;;  %v3329_v26 = vsel %vm3328_vm13, %v4918_v46, %v3325_v31 }
 0xec7   :  { %v3334_v4 = vsel %vm3331_vm14, %v3333_v23, %v3329_v26  ;;  %v4516_v26 = vmul.f32 -1.442695, %v6396_v43  ;;  %v4520_v43 = vmul.f32 -1.442695, %v6402_v21 }
 0xec8   :  { %v3352_v5 = vmul.f32 %v3334_v4, %v6297_v57 }
 0xee1   :  { %v3355_v13 = vpop.permute.xlu0 %3354 }
 0xee2   :  { %v3357_v35 = vmul.f32 %v3355_v13, %v3334_v4 }
 0xee4   :  { %3359 = vrot.lane.b32.xlu1 %v3357_v35, %s5176_s2 }
 0xf20   :  { %v3161_v14 = vpop.permute.xlu2 %3160 }
 0xf21   :  { %v6413_v52 = vadd.f32 %v3161_v14, %v3153_v1 }
 0xf23   :  { %4919 = vtanh.f32 %v6413_v52 }
 0xf28   :  { %v3048_v25 = vpop.permute.xlu1 %3047 }
 0xf29   :  { %v4920_v10 = vpop.eup %4919  ;;  %v6417_v56 = vadd.f32 %v3048_v25, %v3040_v3 }
 0xf2a   :  { %3166 = vrot.lane.b32.xlu0 %v4920_v10, %s5176_s2 }
 0xf2b   :  { %4921 = vtanh.f32 %v6417_v56 }
 0xf30   :  { %v3275_v15 = vpop.permute.xlu0 %3274 }
 0xf31   :  { %v4922_v47 = vpop.eup %4921  ;;  %v6422_v30 = vadd.f32 %v3275_v15, %v3267_v22 }
 0xf32   :  { %3053 = vrot.lane.b32.xlu2 %v4922_v47, %s5176_s2 }
 0xf33   :  { %4923 = vtanh.f32 %v6422_v30 }
 0xf39   :  { %v4924_v28 = vpop.eup %4923 }
 0xf3a   :  { %3280 = vrot.lane.b32.xlu1 %v4924_v28, %s5176_s2 }
 0xf56   :  { %v3360_v32 = vpop.permute.xlu1 %3359 }
 0xf57   :  { %v3362_v29 = vadd.f32 %v3360_v32, %v3352_v5 }
 0xf59   :  { %4925 = vtanh.f32 %v3362_v29 }
 0xf5a   :  { %4927 = vpow2.f32 %v4504_v63 }
 0xf5f   :  { %v4926_v46 = vpop.eup %4925 }
 0xf60   :  { %3365 = vrot.lane.b32.xlu2 %v4926_v46, %s5176_s2  ;;  %v4928_v51 = vpop.eup %4927 }
 0xf61   :  { %v3008_v58 = vadd.f32 1.0, %v4928_v51 }
 0xf63   :  { %4929 = vrcp.f32 %v3008_v58  ;;  %v3035_v13 = vand.u32 2147483648, %v3008_v58  ;;  %vm3029_vm0 = vweird.f32 %v3008_v58  ;;  %v3033_v35 = vand.u32 2147483647, %v3008_v58 }
 0xf64   :  { %4931 = vpow2.f32 %v4510_v6 }
 0xf65   :  { %v3036_v3 = vor.u32 1.1754944e-38, %v3035_v13  ;;  %vm3034_vm3 = vcmp.eq.f32.partialorder %v3033_v35, 8.507059e+37  ;;  %v6976_v13 = vld [vmem:[#allocation37_spill] sm:$0xff]  ;;  %v6977_v35 = vld [vmem:[#allocation38_spill] sm:$0xff] }
 0xf69   :  { %v4930_v53 = vpop.eup %4929 }
 0xf6a   :  { %v4932_v31 = vpop.eup %4931  ;;  %v3025_v59 = vmul.f32 %v4930_v53, %v3008_v58  ;;  %vm3030_vm15 = vweird.f32 %v4930_v53 }
 0xf6b   :  { %v3121_v9 = vadd.f32 1.0, %v4932_v31  ;;  %vm3031_vm2 = vmor %vm3029_vm0, %vm3030_vm15 }
 0xf6c   :  { %v3026_v57 = vsub.f32 1.0, %v3025_v59 }
 0xf6d   :  { %4933 = vrcp.f32 %v3121_v9  ;;  %v3148_v46 = vand.u32 2147483648, %v3121_v9  ;;  %vm3142_vm4 = vweird.f32 %v3121_v9  ;;  %v3146_v63 = vand.u32 2147483647, %v3121_v9 }
 0xf6e   :  { %v3027_v23 = vmul.f32 %v4930_v53, %v3026_v57  ;;  %4935 = vpow2.f32 %v4516_v26 }
 0xf6f   :  { %vm3147_vm6 = vcmp.eq.f32.partialorder %v3146_v63, 8.507059e+37  ;;  %v6992_v63 = vld [vmem:[#allocation43_spill] sm:$0xff] }
 0xf70   :  { %v3028_v17 = vadd.f32 %v4930_v53, %v3027_v23 }
 0xf72   :  { %v3032_v1 = vsel %vm3031_vm2, %v4930_v53, %v3028_v17  ;;  %v3149_v53 = vor.u32 1.1754944e-38, %v3148_v46  ;;  %v6990_v46 = vld [vmem:[#allocation39_spill] sm:$0xff] }
 0xf73   :  { %v4934_v4 = vpop.eup %4933  ;;  %v3037_v10 = vsel %vm3034_vm3, %v3036_v3, %v3032_v1  ;;  %v6980_v3 = vld [vmem:[#allocation40_spill] sm:$0xff] }
 0xf74   :  { %v4936_v62 = vpop.eup %4935  ;;  %v3138_v14 = vmul.f32 %v4934_v4, %v3121_v9  ;;  %vm3143_vm1 = vweird.f32 %v4934_v4 }
 0xf75   :  { %v3235_v25 = vadd.f32 1.0, %v4936_v62  ;;  %vm3144_vm5 = vmor %vm3142_vm4, %vm3143_vm1 }
 0xf76   :  { %v3139_v47 = vsub.f32 1.0, %v3138_v14  ;;  %v6979_v14 = vld [vmem:[#allocation73_spill] sm:$0xff] }
 0xf77   :  { %4937 = vrcp.f32 %v3235_v25  ;;  %vm3256_vm8 = vweird.f32 %v3235_v25 }
 0xf78   :  { %4939 = vpow2.f32 %v4520_v43  ;;  %v3140_v5 = vmul.f32 %v4934_v4, %v3139_v47  ;;  %v6983_v43 = vld [vmem:[#allocation75_spill] sm:$0xff]  ;;  %v6985_v47 = vld [vmem:[#allocation45_spill] sm:$0xff] }
 0xf7a   :  { %v3141_v32 = vadd.f32 %v4934_v4, %v3140_v5  ;;  %v6987_v5 = vld [vmem:[#allocation42_spill] sm:$0xff] }
 0xf7c   :  { %v3145_v51 = vsel %vm3144_vm5, %v4934_v4, %v3141_v32  ;;  %v6988_v32 = vld [vmem:[#allocation34_spill] sm:$0xff] }
 0xf7d   :  { %v4938_v29 = vpop.eup %4937 }
 0xf7e   :  { %v4940_v21 = vpop.eup %4939  ;;  %v3252_v58 = vmul.f32 %v4938_v29, %v3235_v25  ;;  %vm3257_vm7 = vweird.f32 %v4938_v29 }
 0xf7f   :  { %v6439_v6 = vadd.f32 1.0, %v4940_v21  ;;  %vm3258_vm9 = vmor %vm3256_vm8, %vm3257_vm7  ;;  %v6991_v21 = vld [vmem:[#allocation47_spill] sm:$0xff] }
 0xf81   :  { %4941 = vrcp.f32 %v6439_v6  ;;  %vm3341_vm13 = vweird.f32 %v6439_v6 }
 0xf8c   :  { %v3054_v22 = vpop.permute.xlu2 %3053 }
 0xf8d   :  { %v3056_v15 = vmul.f32 %v3054_v22, %v3037_v10  ;;  %v6982_v22 = vld [vmem:[#allocation74_spill] sm:$0xff] }
 0xf8f   :  { %v3399_v28 = vpack.c.bf16 %v3056_v15, %v3056_v15  ;;  %v6984_v15 = vld [vmem:[#allocation44_spill] sm:$0xff] }
 0xf91   :  { %4523 = vmatmul.msk.bf16.vlgmr.msra.gmra.mxu2 %vm383_vm10, %v3399_v28  ;;  %4524 = vmatmul.msk.bf16.vlgmr.msra.gmra.mxu3 %vm383_vm10, %v3399_v28  ;;  %v6986_v28 = vld [vmem:[#allocation33_spill] sm:$0xff] }
 0xf92   :  { %3634 = vmatpush.bf16.msra.mxu2 %v6842_v34  ;;  %3647 = vmatpush.bf16.msra.mxu3 %v6843_v42  ;;  %v3150_v34 = vsel %vm3147_vm6, %v3149_v53, %v3145_v51  ;;  %v6993_v51 = vld [vmem:[#allocation48_spill] sm:$0xff] }
 0xf96   :  { %3635 = vmatpush.bf16.msra.mxu2 %v6844_v33  ;;  %3648 = vmatpush.bf16.msra.mxu3 %v6845_v45  ;;  %v3253_v33 = vsub.f32 1.0, %v3252_v58 }
 0xf98   :  { %v3254_v59 = vmul.f32 %v4938_v29, %v3253_v33  ;;  %v6994_v33 = vld [vmem:[#allocation76_spill] sm:$0xff] }
 0xf9a   :  { %3636 = vmatpush.bf16.msra.mxu2 %v6846_v40  ;;  %3649 = vmatpush.bf16.msra.mxu3 %v6847_v36  ;;  %v4942_v40 = vpop.eup %4941  ;;  %v3255_v36 = vadd.f32 %v4938_v29, %v3254_v59  ;;  %v6995_v59 = vld [vmem:[#allocation77_spill] sm:$0xff] }
 0xf9b   :  { %v3337_v9 = vmul.f32 %v4942_v40, %v6439_v6  ;;  %vm3342_vm12 = vweird.f32 %v4942_v40 }
 0xf9c   :  { %v3167_v42 = vpop.permute.xlu0 %3166  ;;  %vm3343_vm14 = vmor %vm3341_vm13, %vm3342_vm12 }
 0xf9d   :  { %v3169_v31 = vmul.f32 %v3167_v42, %v3150_v34  ;;  %v3338_v57 = vsub.f32 1.0, %v3337_v9 }
 0xf9e   :  { %3637 = vmatpush.bf16.msra.mxu2 %v6848_v60  ;;  %3650 = vmatpush.bf16.msra.mxu3 %v6849_v61  ;;  %v3262_v60 = vand.u32 2147483648, %v3235_v25  ;;  %v3260_v61 = vand.u32 2147483647, %v3235_v25  ;;  %v6981_v25 = vld [vmem:[#allocation41_spill] sm:$0xff] }
 0xf9f   :  { %v3170_v45 = vpack.c.bf16 %v3169_v31, %v3169_v31  ;;  %v3339_v17 = vmul.f32 %v4942_v40, %v3338_v57 }
 0xfa0   :  { %vm3261_vm11 = vcmp.eq.f32.partialorder %v3260_v61, 8.507059e+37 }
 0xfa1   :  { %4521 = vmatmul.msk.bf16.vlgmr.msrb.gmra.mxu0 %vm383_vm10, %v3170_v45  ;;  %4522 = vmatmul.msk.bf16.vlgmr.msrb.gmra.mxu1 %vm383_vm10, %v3170_v45 }
 0xfa2   :  { %4529 = vmatmul.msk.bf16.vlgmr.msrb.gmra.mxu2 %vm383_vm10, %v3170_v45  ;;  %4530 = vmatmul.msk.bf16.vlgmr.msrb.gmra.mxu3 %vm383_vm10, %v3170_v45 }
 0xfa3   :  { %3608 = vmatpush.bf16.msrb.mxu0 %v5418_v7  ;;  %3621 = vmatpush.bf16.msrb.mxu1 %v5407_v2  ;;  %v3259_v2 = vsel %vm3258_vm9, %v4938_v29, %v3255_v36  ;;  %v3263_v7 = vor.u32 1.1754944e-38, %v3262_v60  ;;  %v6989_v29 = vld [vmem:[#allocation46_spill] sm:$0xff] }
 0xfa4   :  { %3752 = vmatpush.bf16.msrb.mxu2 %v6950_v54  ;;  %3765 = vmatpush.bf16.msrb.mxu3 %v6951_v41 }
 0xfa5   :  { %v3264_v26 = vsel %vm3261_vm11, %v3263_v7, %v3259_v2 }
 0xfa7   :  { %3609 = vmatpush.bf16.msrb.mxu0 %v5430_v12  ;;  %3622 = vmatpush.bf16.msrb.mxu1 %v5427_v11 }
 0xfa8   :  { %3753 = vmatpush.bf16.msrb.mxu2 %v6952_v50  ;;  %3766 = vmatpush.bf16.msrb.mxu3 %v6953_v55 }
 0xfab   :  { %3610 = vmatpush.bf16.msrb.mxu0 %v5448_v19  ;;  %3623 = vmatpush.bf16.msrb.mxu1 %v5445_v18  ;;  %v3340_v18 = vadd.f32 %v4942_v40, %v3339_v17  ;;  %v3347_v19 = vand.u32 2147483648, %v6439_v6  ;;  %v6996_v17 = vld [vmem:[#allocation60_spill] sm:$0xff] }
 0xfac   :  { %v3281_v23 = vpop.permute.xlu1 %3280  ;;  %3754 = vmatpush.bf16.msrb.mxu2 %v6954_v49  ;;  %3767 = vmatpush.bf16.msrb.mxu3 %v6955_v8 }
 0xfad   :  { %v3283_v11 = vmul.f32 %v3281_v23, %v3264_v26  ;;  %v3348_v4 = vor.u32 1.1754944e-38, %v3347_v19  ;;  %v6997_v19 = vld [vmem:[#allocation59_spill] sm:$0xff] }
 0xfaf   :  { %v3284_v12 = vpack.c.bf16 %v3283_v11, %v3283_v11  ;;  %3611 = vmatpush.bf16.msrb.mxu0 %v5471_v39  ;;  %3624 = vmatpush.bf16.msrb.mxu1 %v5466_v37  ;;  %v3345_v37 = vand.u32 2147483647, %v6439_v6  ;;  %v3344_v39 = vsel %vm3343_vm14, %v4942_v40, %v3340_v18 }
 0xfb0   :  { %3755 = vmatpush.bf16.msrb.mxu2 %v6956_v24  ;;  %3768 = vmatpush.bf16.msrb.mxu3 %v6957_v44 }
 0xfb1   :  { %4527 = vmatmul.msk.bf16.vlgmr.msra.gmra.mxu0 %vm383_vm10, %v3284_v12  ;;  %4528 = vmatmul.msk.bf16.vlgmr.msra.gmra.mxu1 %vm383_vm10, %v3284_v12  ;;  %vm3346_vm15 = vcmp.eq.f32.partialorder %v3345_v37, 8.507059e+37 }
 0xfb2   :  { %4535 = vmatmul.msk.bf16.vlgmr.msra.gmra.mxu2 %vm383_vm10, %v3284_v12  ;;  %4536 = vmatmul.msk.bf16.vlgmr.msra.gmra.mxu3 %vm383_vm10, %v3284_v12  ;;  %v3349_v62 = vsel %vm3346_vm15, %v3348_v4, %v3344_v39 }
 0xfb3   :  { %3735 = vmatpush.bf16.msra.mxu1 %v5718_v27  ;;  %3722 = vmatpush.bf16.msra.mxu0 %v5723_v20 }
 0xfb4   :  { %3865 = vmatpush.bf16.msra.mxu2 %v6958_v48  ;;  %3878 = vmatpush.bf16.msra.mxu3 %v6959_v16  ;;  %v6978_v16 = vld [vmem:[#allocation72_spill] sm:$0xff] }
 0xfb7   :  { %3736 = vmatpush.bf16.msra.mxu1 %v5729_v0  ;;  %3723 = vmatpush.bf16.msra.mxu0 %v5732_v38 }
 0xfb8   :  { %3866 = vmatpush.bf16.msra.mxu2 %v6976_v13  ;;  %3879 = vmatpush.bf16.msra.mxu3 %v6977_v35 }
 0xfba   :  { %v3366_v48 = vpop.permute.xlu2 %3365 }
 0xfbb   :  { %v3368_v1 = vmul.f32 %v3366_v48, %v3349_v62  ;;  %3737 = vmatpush.bf16.msra.mxu1 %v6978_v16  ;;  %3724 = vmatpush.bf16.msra.mxu0 %v6979_v14 }
 0xfbc   :  { %3867 = vmatpush.bf16.msra.mxu2 %v6980_v3  ;;  %3880 = vmatpush.bf16.msra.mxu3 %v6981_v25 }
 0xfbd   :  { %v3369_v10 = vpack.c.bf16 %v3368_v1, %v3368_v1 }
 0xfbf   :  { %3738 = vmatpush.bf16.msra.mxu1 %v6982_v22  ;;  %3725 = vmatpush.bf16.msra.mxu0 %v6983_v43 }
 0xfc0   :  { %3868 = vmatpush.bf16.msra.mxu2 %v6984_v15  ;;  %3881 = vmatpush.bf16.msra.mxu3 %v6985_v47  ;;  %v6998_v47 = vld [vmem:[#allocation31_spill] sm:$0xff] }
 0xfc1   :  { %4533 = vmatmul.msk.bf16.vlgmr.msrb.gmra.mxu0 %vm383_vm10, %v3369_v10  ;;  %4534 = vmatmul.msk.bf16.vlgmr.msrb.gmra.mxu1 %vm383_vm10, %v3369_v10 }
 0xfc3   :  { %3852 = vmatpush.bf16.msrb.mxu1 %v6986_v28  ;;  %3839 = vmatpush.bf16.msrb.mxu0 %v6987_v5  ;;  %v6999_v5 = vld [vmem:[#allocation32_spill] sm:$0xff] }
 0xfc7   :  { %3853 = vmatpush.bf16.msrb.mxu1 %v6988_v32  ;;  %3840 = vmatpush.bf16.msrb.mxu0 %v6989_v29 }
 0xfcb   :  { %3854 = vmatpush.bf16.msrb.mxu1 %v6990_v46  ;;  %3841 = vmatpush.bf16.msrb.mxu0 %v6991_v21 }
 0xfcf   :  { %3855 = vmatpush.bf16.msrb.mxu1 %v6992_v63  ;;  %3842 = vmatpush.bf16.msrb.mxu0 %v6993_v51 }
0x1014   :  { %v3412_v58 = vpop.f32.mrf.mxu2  ;;  %v3425_v6 = vpop.f32.mrf.mxu3 }
0x101c   :  { %v3414_v53 = vpop.f32.mrf.mxu2  ;;  %v3427_v34 = vpop.f32.mrf.mxu3 }
0x101e   :  { %v3382_v42 = vpop.f32.mrf.mxu0  ;;  %v3395_v31 = vpop.f32.mrf.mxu1 }
0x101f   :  { %v3383_v45 = vadd.f32 %v3382_v42, %v6994_v33  ;;  %v3396_v40 = vadd.f32 %v3395_v31, %v6995_v59 }
0x1021   :  { %v3429_v36 = vadd.f32 %v3412_v58, %v3383_v45  ;;  %v6502_v60 = vadd.f32 %v3425_v6, %v3396_v40 }
0x1023   :  { %4943 = vtanh.f32 %v6502_v60  ;;  %v4525_v58 = vmul.f32 -1.442695, %v3429_v36 }
0x1025   :  { %v3525_v61 = vpop.f32.mrf.mxu2  ;;  %v3538_v9 = vpop.f32.mrf.mxu3 }
0x1026   :  { %v3384_v2 = vpop.f32.mrf.mxu0  ;;  %v3397_v7 = vpop.f32.mrf.mxu1 }
0x1029   :  { %v4944_v57 = vpop.eup %4943 }
0x102a   :  { %3472 = vrot.lane.b32.xlu0 %v4944_v57, %s5176_s2 }
0x102d   :  { %v3527_v26 = vpop.f32.mrf.mxu2  ;;  %v3540_v23 = vpop.f32.mrf.mxu3 }
0x102e   :  { %v3499_v11 = vpop.f32.mrf.mxu0  ;;  %v3512_v12 = vpop.f32.mrf.mxu1 }
0x102f   :  { %v3500_v18 = vadd.f32 %v3499_v11, %v6996_v17  ;;  %v3513_v37 = vadd.f32 %v3512_v12, %v6997_v19 }
0x1031   :  { %v3542_v39 = vadd.f32 %v3525_v61, %v3500_v18  ;;  %v6508_v4 = vadd.f32 %v3538_v9, %v3513_v37 }
0x1033   :  { %4945 = vtanh.f32 %v6508_v4  ;;  %v4531_v42 = vmul.f32 -1.442695, %v3542_v39 }
0x1035   :  { %v3639_v13 = vpop.f32.mrf.mxu2  ;;  %v3652_v35 = vpop.f32.mrf.mxu3 }
0x1036   :  { %v3501_v62 = vpop.f32.mrf.mxu0  ;;  %v3514_v48 = vpop.f32.mrf.mxu1 }
0x1039   :  { %v4946_v1 = vpop.eup %4945 }
0x103a   :  { %3585 = vrot.lane.b32.xlu1 %v4946_v1, %s5176_s2 }
0x103d   :  { %v3641_v3 = vpop.f32.mrf.mxu2  ;;  %v3654_v25 = vpop.f32.mrf.mxu3 }
0x103e   :  { %v3613_v10 = vpop.f32.mrf.mxu0  ;;  %v3626_v15 = vpop.f32.mrf.mxu1 }
0x103f   :  { %v3614_v28 = vadd.f32 %v3613_v10, %v6998_v47  ;;  %v3627_v32 = vadd.f32 %v3626_v15, %v6999_v5 }
0x1041   :  { %v3656_v29 = vadd.f32 %v3639_v13, %v3614_v28  ;;  %v6514_v46 = vadd.f32 %v3652_v35, %v3627_v32 }
0x1043   :  { %4947 = vtanh.f32 %v6514_v46  ;;  %v4537_v6 = vmul.f32 -1.442695, %v3656_v29 }
0x1044   :  { %4949 = vpow2.f32 %v4525_v58 }
0x1045   :  { %4951 = vpow2.f32 %v4537_v6 }
0x1046   :  { %v3615_v21 = vpop.f32.mrf.mxu0  ;;  %v3628_v63 = vpop.f32.mrf.mxu1 }
0x1049   :  { %v4948_v51 = vpop.eup %4947 }
0x104a   :  { %3699 = vrot.lane.b32.xlu2 %v4948_v51, %s5176_s2  ;;  %v4950_v53 = vpop.eup %4949 }
0x104b   :  { %v3437_v34 = vadd.f32 1.0, %v4950_v53  ;;  %v4952_v31 = vpop.eup %4951 }
0x104c   :  { %v3664_v45 = vadd.f32 1.0, %v4952_v31 }
0x104d   :  { %4953 = vrcp.f32 %v3437_v34  ;;  %v3450_v18 = vand.u32 2147483648, %v3437_v34  ;;  %vm3444_vm2 = vweird.f32 %v3437_v34  ;;  %v3448_v37 = vand.u32 2147483647, %v3437_v34 }
0x104e   :  { %4955 = vpow2.f32 %v4531_v42  ;;  %v3677_v15 = vand.u32 2147483648, %v3664_v45  ;;  %vm3671_vm5 = vweird.f32 %v3664_v45  ;;  %v3675_v47 = vand.u32 2147483647, %v3664_v45 }
0x104f   :  { %4957 = vrcp.f32 %v3664_v45  ;;  %v3451_v62 = vor.u32 1.1754944e-38, %v3450_v18  ;;  %vm3449_vm1 = vcmp.eq.f32.partialorder %v3448_v37, 8.507059e+37 }
0x1050   :  { %v3678_v32 = vor.u32 1.1754944e-38, %v3677_v15  ;;  %vm3676_vm7 = vcmp.eq.f32.partialorder %v3675_v47, 8.507059e+37 }
0x1053   :  { %v4954_v40 = vpop.eup %4953 }
0x1054   :  { %v4956_v61 = vpop.eup %4955  ;;  %v3440_v9 = vmul.f32 %v4954_v40, %v3437_v34  ;;  %vm3445_vm0 = vweird.f32 %v4954_v40 }
0x1055   :  { %v3550_v2 = vadd.f32 1.0, %v4956_v61  ;;  %v4958_v57 = vpop.eup %4957  ;;  %vm3446_vm3 = vmor %vm3444_vm2, %vm3445_vm0 }
0x1056   :  { %v3441_v7 = vsub.f32 1.0, %v3440_v9  ;;  %v3667_v36 = vmul.f32 %v4958_v57, %v3664_v45  ;;  %vm3672_vm4 = vweird.f32 %v4958_v57 }
0x1057   :  { %4959 = vrcp.f32 %v3550_v2  ;;  %vm3673_vm6 = vmor %vm3671_vm5, %vm3672_vm4  ;;  %v3563_v58 = vand.u32 2147483648, %v3550_v2  ;;  %vm3557_vm9 = vweird.f32 %v3550_v2  ;;  %v3561_v6 = vand.u32 2147483647, %v3550_v2 }
0x1058   :  { %v3442_v26 = vmul.f32 %v4954_v40, %v3441_v7  ;;  %v3668_v11 = vsub.f32 1.0, %v3667_v36 }
0x1059   :  { %v3564_v34 = vor.u32 1.1754944e-38, %v3563_v58  ;;  %vm3562_vm12 = vcmp.eq.f32.partialorder %v3561_v6, 8.507059e+37 }
0x105a   :  { %v3443_v23 = vadd.f32 %v4954_v40, %v3442_v26  ;;  %v3669_v13 = vmul.f32 %v4958_v57, %v3668_v11 }
0x105c   :  { %v3447_v39 = vsel %vm3446_vm3, %v4954_v40, %v3443_v23  ;;  %v3670_v25 = vadd.f32 %v4958_v57, %v3669_v13 }
0x105d   :  { %v4960_v12 = vpop.eup %4959  ;;  %v3452_v1 = vsel %vm3449_vm1, %v3451_v62, %v3447_v39  ;;  %v4532_v39 = vmul.f32 -1.442695, %v6508_v4 }
0x105e   :  { %v3553_v35 = vmul.f32 %v4960_v12, %v3550_v2  ;;  %v3674_v28 = vsel %vm3673_vm6, %v4958_v57, %v3670_v25  ;;  %vm3558_vm8 = vweird.f32 %v4960_v12  ;;  %v3470_v57 = vmul.f32 %v3452_v1, %v6417_v56 }
0x105f   :  { %v3679_v21 = vsel %vm3676_vm7, %v3678_v32, %v3674_v28  ;;  %vm3559_vm11 = vmor %vm3557_vm9, %vm3558_vm8  ;;  %v4526_v56 = vmul.f32 -1.442695, %v6502_v60 }
0x1060   :  { %v3554_v10 = vsub.f32 1.0, %v3553_v35  ;;  %v3697_v40 = vmul.f32 %v3679_v21, %v6422_v30 }
0x1062   :  { %v3555_v5 = vmul.f32 %v4960_v12, %v3554_v10 }
0x1064   :  { %v3556_v51 = vadd.f32 %v4960_v12, %v3555_v5 }
0x1066   :  { %v3560_v53 = vsel %vm3559_vm11, %v4960_v12, %v3556_v51 }
0x1067   :  { %v3565_v31 = vsel %vm3562_vm12, %v3564_v34, %v3560_v53 }
0x1068   :  { %v3583_v23 = vmul.f32 %v3565_v31, %v6413_v52 }
0x109c   :  { %v3473_v48 = vpop.permute.xlu0 %3472 }
0x109d   :  { %v3475_v3 = vmul.f32 %v3473_v48, %v3452_v1  ;;  %v4538_v48 = vmul.f32 -1.442695, %v6514_v46 }
0x109f   :  { %3477 = vrot.lane.b32.xlu0 %v3475_v3, %s5176_s2 }
0x10a4   :  { %v3700_v29 = vpop.permute.xlu2 %3699 }
0x10a5   :  { %v3702_v63 = vmul.f32 %v3700_v29, %v3679_v21 }
0x10a7   :  { %3704 = vrot.lane.b32.xlu2 %v3702_v63, %s5176_s2 }
0x10ac   :  { %v3586_v42 = vpop.permute.xlu1 %3585 }
0x10ad   :  { %v3588_v45 = vmul.f32 %v3586_v42, %v3565_v31 }
0x10af   :  { %3590 = vrot.lane.b32.xlu1 %v3588_v45, %s5176_s2 }
0x1101   :  { %v3705_v61 = vpop.permute.xlu2 %3704 }
0x1102   :  { %v3707_v9 = vadd.f32 %v3705_v61, %v3697_v40 }
0x1104   :  { %4961 = vtanh.f32 %v3707_v9 }
0x110a   :  { %v4962_v7 = vpop.eup %4961 }
0x110b   :  { %3710 = vrot.lane.b32.xlu2 %v4962_v7, %s5176_s2 }
0x1111   :  { %v3478_v2 = vpop.permute.xlu0 %3477 }
0x1112   :  { %v6524_v26 = vadd.f32 %v3478_v2, %v3470_v57 }
0x1114   :  { %4963 = vtanh.f32 %v6524_v26 }
0x111a   :  { %v4964_v36 = vpop.eup %4963 }
0x111b   :  { %3483 = vrot.lane.b32.xlu0 %v4964_v36, %s5176_s2 }
0x1121   :  { %v3591_v11 = vpop.permute.xlu1 %3590 }
0x1122   :  { %v6529_v30 = vadd.f32 %v3591_v11, %v3583_v23 }
0x1124   :  { %4965 = vtanh.f32 %v6529_v30 }
0x1125   :  { %4967 = vpow2.f32 %v4526_v56 }
0x112a   :  { %v4966_v12 = vpop.eup %4965 }
0x112b   :  { %3596 = vrot.lane.b32.xlu1 %v4966_v12, %s5176_s2  ;;  %v4968_v18 = vpop.eup %4967 }
0x112c   :  { %v3438_v37 = vadd.f32 1.0, %v4968_v18 }
0x112e   :  { %4969 = vrcp.f32 %v3438_v37  ;;  %v3465_v10 = vand.u32 2147483648, %v3438_v37  ;;  %vm3459_vm14 = vweird.f32 %v3438_v37  ;;  %v3463_v47 = vand.u32 2147483647, %v3438_v37 }
0x112f   :  { %4971 = vpow2.f32 %v4532_v39 }
0x1130   :  { %v3466_v32 = vor.u32 1.1754944e-38, %v3465_v10  ;;  %vm3464_vm0 = vcmp.eq.f32.partialorder %v3463_v47, 8.507059e+37 }
0x1134   :  { %v4970_v13 = vpop.eup %4969 }
0x1135   :  { %v4972_v35 = vpop.eup %4971  ;;  %v3455_v52 = vmul.f32 %v4970_v13, %v3438_v37  ;;  %vm3460_vm13 = vweird.f32 %v4970_v13 }
0x1136   :  { %v3551_v62 = vadd.f32 1.0, %v4972_v35  ;;  %vm3461_vm15 = vmor %vm3459_vm14, %vm3460_vm13 }
0x1137   :  { %v3456_v1 = vsub.f32 1.0, %v3455_v52 }
0x1138   :  { %4973 = vrcp.f32 %v3551_v62  ;;  %v3578_v34 = vand.u32 2147483648, %v3551_v62  ;;  %vm3572_vm3 = vweird.f32 %v3551_v62  ;;  %v3576_v31 = vand.u32 2147483647, %v3551_v62 }
0x1139   :  { %4975 = vpow2.f32 %v4538_v48  ;;  %v3457_v3 = vmul.f32 %v4970_v13, %v3456_v1 }
0x113a   :  { %v3579_v40 = vor.u32 1.1754944e-38, %v3578_v34  ;;  %vm3577_vm4 = vcmp.eq.f32.partialorder %v3576_v31, 8.507059e+37 }
0x113b   :  { %v3458_v25 = vadd.f32 %v4970_v13, %v3457_v3 }
0x113d   :  { %v3462_v4 = vsel %vm3461_vm15, %v4970_v13, %v3458_v25 }
0x113e   :  { %v4974_v60 = vpop.eup %4973  ;;  %v3467_v29 = vsel %vm3464_vm0, %v3466_v32, %v3462_v4 }
0x113f   :  { %v4976_v15 = vpop.eup %4975  ;;  %v3568_v28 = vmul.f32 %v4974_v60, %v3551_v62  ;;  %vm3573_vm2 = vweird.f32 %v4974_v60 }
0x1140   :  { %v3665_v5 = vadd.f32 1.0, %v4976_v15  ;;  %vm3574_vm1 = vmor %vm3572_vm3, %vm3573_vm2 }
0x1141   :  { %v3569_v63 = vsub.f32 1.0, %v3568_v28 }
0x1142   :  { %4977 = vrcp.f32 %v3665_v5  ;;  %vm3686_vm6 = vweird.f32 %v3665_v5 }
0x1143   :  { %v3570_v58 = vmul.f32 %v4974_v60, %v3569_v63 }
0x1145   :  { %v3571_v53 = vadd.f32 %v4974_v60, %v3570_v58 }
0x1147   :  { %v3575_v45 = vsel %vm3574_vm1, %v4974_v60, %v3571_v53 }
0x1148   :  { %v4978_v6 = vpop.eup %4977 }
0x1149   :  { %v3682_v42 = vmul.f32 %v4978_v6, %v3665_v5  ;;  %vm3687_vm5 = vweird.f32 %v4978_v6 }
0x114a   :  { %vm3688_vm7 = vmor %vm3686_vm6, %vm3687_vm5 }
0x1165   :  { %v3711_v57 = vpop.permute.xlu2 %3710 }
0x118d   :  { %v3484_v21 = vpop.permute.xlu0 %3483 }
0x118e   :  { %v3486_v46 = vmul.f32 %v3484_v21, %v3467_v29 }
0x1190   :  { %v3744_v51 = vpack.c.bf16 %v3486_v46, %v3486_v46 }
0x1192   :  { %4541 = vmatmul.msk.bf16.vlgmr.msrb.gmra.mxu2 %vm383_vm10, %v3744_v51  ;;  %4542 = vmatmul.msk.bf16.vlgmr.msrb.gmra.mxu3 %vm383_vm10, %v3744_v51 }
0x1193   :  { %3983 = vmatpush.bf16.msrb.mxu2 %v6950_v54  ;;  %3996 = vmatpush.bf16.msrb.mxu3 %v6951_v41  ;;  %v3683_v54 = vsub.f32 1.0, %v3682_v42  ;;  %v3580_v41 = vsel %vm3577_vm4, %v3579_v40, %v3575_v45 }
0x1197   :  { %3984 = vmatpush.bf16.msrb.mxu2 %v6952_v50  ;;  %3997 = vmatpush.bf16.msrb.mxu3 %v6953_v55  ;;  %v3684_v50 = vmul.f32 %v4978_v6, %v3683_v54 }
0x119b   :  { %3985 = vmatpush.bf16.msrb.mxu2 %v6954_v49  ;;  %3998 = vmatpush.bf16.msrb.mxu3 %v6955_v8  ;;  %v3685_v49 = vadd.f32 %v4978_v6, %v3684_v50  ;;  %v3692_v8 = vand.u32 2147483648, %v3665_v5 }
0x119d   :  { %v3597_v61 = vpop.permute.xlu1 %3596  ;;  %v3693_v7 = vor.u32 1.1754944e-38, %v3692_v8 }
0x119e   :  { %v3599_v9 = vmul.f32 %v3597_v61, %v3580_v41 }
0x119f   :  { %3986 = vmatpush.bf16.msrb.mxu2 %v6956_v24  ;;  %3999 = vmatpush.bf16.msrb.mxu3 %v6957_v44  ;;  %v3690_v24 = vand.u32 2147483647, %v3665_v5  ;;  %v3689_v44 = vsel %vm3688_vm7, %v4978_v6, %v3685_v49 }
0x11a0   :  { %v3600_v55 = vpack.c.bf16 %v3599_v9, %v3599_v9 }
0x11a1   :  { %vm3691_vm8 = vcmp.eq.f32.partialorder %v3690_v24, 8.507059e+37 }
0x11a2   :  { %4539 = vmatmul.msk.bf16.vlgmr.msra.gmra.mxu0 %vm383_vm10, %v3600_v55  ;;  %4540 = vmatmul.msk.bf16.vlgmr.msra.gmra.mxu1 %vm383_vm10, %v3600_v55  ;;  %v3694_v2 = vsel %vm3691_vm8, %v3693_v7, %v3689_v44 }
0x11a3   :  { %4547 = vmatmul.msk.bf16.vlgmr.msra.gmra.mxu2 %vm383_vm10, %v3600_v55  ;;  %4548 = vmatmul.msk.bf16.vlgmr.msra.gmra.mxu3 %vm383_vm10, %v3600_v55  ;;  %v3713_v36 = vmul.f32 %v3711_v57, %v3694_v2 }
0x11a4   :  { %3966 = vmatpush.bf16.msra.mxu1 %v5718_v27  ;;  %3953 = vmatpush.bf16.msra.mxu0 %v5723_v20 }
0x11a5   :  { %v3714_v27 = vpack.c.bf16 %v3713_v36, %v3713_v36 }
0x11a8   :  { %3967 = vmatpush.bf16.msra.mxu1 %v5729_v0  ;;  %3954 = vmatpush.bf16.msra.mxu0 %v5732_v38 }
0x11ac   :  { %3968 = vmatpush.bf16.msra.mxu1 %v6978_v16  ;;  %3955 = vmatpush.bf16.msra.mxu0 %v6979_v14 }
0x11b0   :  { %3969 = vmatpush.bf16.msra.mxu1 %v6982_v22  ;;  %3956 = vmatpush.bf16.msra.mxu0 %v6983_v43 }
0x11b2   :  { %4545 = vmatmul.msk.bf16.vlgmr.msrb.gmra.mxu0 %vm383_vm10, %v3714_v27  ;;  %4546 = vmatmul.msk.bf16.vlgmr.msrb.gmra.mxu1 %vm383_vm10, %v3714_v27 }
0x1215   :  { %v3757_v20 = vpop.f32.mrf.mxu2  ;;  %v3770_v0 = vpop.f32.mrf.mxu3 }
0x121d   :  { %v3759_v38 = vpop.f32.mrf.mxu2  ;;  %v3772_v23 = vpop.f32.mrf.mxu3 }
0x121f   :  { %v3727_v11 = vpop.f32.mrf.mxu0  ;;  %v3740_v12 = vpop.f32.mrf.mxu1 }
0x1220   :  { %v3728_v56 = vadd.f32 %v3727_v11, %v6994_v33  ;;  %v3741_v16 = vadd.f32 %v3740_v12, %v6995_v59 }
0x1222   :  { %v3774_v14 = vadd.f32 %v3757_v20, %v3728_v56  ;;  %v6562_v18 = vadd.f32 %v3770_v0, %v3741_v16 }
0x1224   :  { %4979 = vtanh.f32 %v6562_v18  ;;  %v4543_v4 = vmul.f32 -1.442695, %v3774_v14  ;;  %v4544_v11 = vmul.f32 -1.442695, %v6562_v18 }
0x1226   :  { %v3870_v22 = vpop.f32.mrf.mxu2  ;;  %v3883_v43 = vpop.f32.mrf.mxu3 }
0x1227   :  { %v3729_v37 = vpop.f32.mrf.mxu0  ;;  %v3742_v39 = vpop.f32.mrf.mxu1 }
0x122a   :  { %v4980_v13 = vpop.eup %4979 }
0x122b   :  { %3817 = vrot.lane.b32.xlu0 %v4980_v13, %s5176_s2 }
0x122e   :  { %v3872_v35 = vpop.f32.mrf.mxu2  ;;  %v3885_v52 = vpop.f32.mrf.mxu3 }
0x122f   :  { %v3844_v62 = vpop.f32.mrf.mxu0  ;;  %v3857_v48 = vpop.f32.mrf.mxu1 }
0x1230   :  { %v3845_v1 = vadd.f32 %v3844_v62, %v6996_v17  ;;  %v3858_v3 = vadd.f32 %v3857_v48, %v6997_v19 }
0x1232   :  { %v3887_v25 = vadd.f32 %v3870_v22, %v3845_v1  ;;  %v6568_v60 = vadd.f32 %v3883_v43, %v3858_v3 }
0x1234   :  { %4981 = vtanh.f32 %v6568_v60  ;;  %v4549_v32 = vmul.f32 -1.442695, %v3887_v25  ;;  %v4550_v56 = vmul.f32 -1.442695, %v6568_v60 }
0x1235   :  { %4983 = vpow2.f32 %v4543_v4 }
0x1237   :  { %v3846_v10 = vpop.f32.mrf.mxu0  ;;  %v3859_v15 = vpop.f32.mrf.mxu1 }
0x123a   :  { %v4982_v47 = vpop.eup %4981 }
0x123b   :  { %3930 = vrot.lane.b32.xlu1 %v4982_v47, %s5176_s2  ;;  %v4984_v28 = vpop.eup %4983 }
0x123c   :  { %v3782_v5 = vadd.f32 1.0, %v4984_v28 }
0x123e   :  { %4985 = vrcp.f32 %v3782_v5  ;;  %v3795_v6 = vand.u32 2147483648, %v3782_v5  ;;  %vm3789_vm11 = vweird.f32 %v3782_v5  ;;  %v3793_v53 = vand.u32 2147483647, %v3782_v5 }
0x123f   :  { %4987 = vpow2.f32 %v4549_v32 }
0x1240   :  { %v3796_v31 = vor.u32 1.1754944e-38, %v3795_v6  ;;  %vm3794_vm13 = vcmp.eq.f32.partialorder %v3793_v53, 8.507059e+37 }
0x1244   :  { %v4986_v17 = vpop.eup %4985 }
0x1245   :  { %v4988_v29 = vpop.eup %4987  ;;  %v3785_v19 = vmul.f32 %v4986_v17, %v3782_v5  ;;  %vm3790_vm9 = vweird.f32 %v4986_v17 }
0x1246   :  { %v3895_v21 = vadd.f32 1.0, %v4988_v29  ;;  %vm3791_vm12 = vmor %vm3789_vm11, %vm3790_vm9 }
0x1247   :  { %v3786_v46 = vsub.f32 1.0, %v3785_v19 }
0x1248   :  { %4989 = vrcp.f32 %v3895_v21  ;;  %v3908_v50 = vand.u32 2147483648, %v3895_v21  ;;  %vm3902_vm15 = vweird.f32 %v3895_v21  ;;  %v3906_v55 = vand.u32 2147483647, %v3895_v21 }
0x1249   :  { %v3787_v63 = vmul.f32 %v4986_v17, %v3786_v46 }
0x124a   :  { %v3909_v8 = vor.u32 1.1754944e-38, %v3908_v50  ;;  %vm3907_vm2 = vcmp.eq.f32.partialorder %v3906_v55, 8.507059e+37 }
0x124b   :  { %v3788_v51 = vadd.f32 %v4986_v17, %v3787_v63 }
0x124d   :  { %v3792_v34 = vsel %vm3791_vm12, %v4986_v17, %v3788_v51 }
0x124e   :  { %v4990_v58 = vpop.eup %4989  ;;  %v3797_v40 = vsel %vm3794_vm13, %v3796_v31, %v3792_v34 }
0x124f   :  { %v3898_v42 = vmul.f32 %v4990_v58, %v3895_v21  ;;  %vm3903_vm14 = vweird.f32 %v4990_v58  ;;  %v3815_v57 = vmul.f32 %v3797_v40, %v6524_v26 }
0x1250   :  { %vm3904_vm0 = vmor %vm3902_vm15, %vm3903_vm14 }
0x1251   :  { %v3899_v41 = vsub.f32 1.0, %v3898_v42 }
0x1253   :  { %v3900_v61 = vmul.f32 %v4990_v58, %v3899_v41 }
0x1255   :  { %v3901_v9 = vadd.f32 %v4990_v58, %v3900_v61 }
0x1257   :  { %v3905_v49 = vsel %vm3904_vm0, %v4990_v58, %v3901_v9 }
0x1258   :  { %v3910_v44 = vsel %vm3907_vm2, %v3909_v8, %v3905_v49 }
0x1259   :  { %v3928_v20 = vmul.f32 %v3910_v44, %v6529_v30 }
0x129d   :  { %v3818_v45 = vpop.permute.xlu0 %3817 }
0x129e   :  { %v3820_v54 = vmul.f32 %v3818_v45, %v3797_v40 }
0x12a0   :  { %3822 = vrot.lane.b32.xlu2 %v3820_v54, %s5176_s2 }
0x12ad   :  { %v3931_v24 = vpop.permute.xlu1 %3930 }
0x12ae   :  { %v3933_v7 = vmul.f32 %v3931_v24, %v3910_v44 }
0x12b0   :  { %3935 = vrot.lane.b32.xlu0 %v3933_v7, %s5176_s2 }
0x12fa   :  { %v3823_v2 = vpop.permute.xlu2 %3822 }
0x12fb   :  { %v6575_v36 = vadd.f32 %v3823_v2, %v3815_v57 }
0x12fd   :  { %4991 = vtanh.f32 %v6575_v36 }
0x1303   :  { %v4992_v27 = vpop.eup %4991 }
0x1304   :  { %3828 = vrot.lane.b32.xlu1 %v4992_v27, %s5176_s2 }
0x1322   :  { %v3936_v0 = vpop.permute.xlu0 %3935 }
0x1323   :  { %v3938_v38 = vadd.f32 %v3936_v0, %v3928_v20  ;;  %v4070_v0 = vld [vmem:[%s6649_s13 + $0x38] sm:$0xff] }
0x1324   :  { %4086 = vmatpush.msrb.mxu0 %v4070_v0 }
0x1325   :  { %4993 = vtanh.f32 %v3938_v38  ;;  %v4069_v38 = vld [vmem:[%s6649_s13 + $0x30] sm:$0xff] }
0x1326   :  { %4995 = vpow2.f32 %v4544_v11  ;;  %4087 = vmatpush.msrb.mxu0 %v4069_v38  ;;  %v4067_v11 = vld [vmem:[%s6649_s13 + $0x20] sm:$0xff] }
0x132b   :  { %v4994_v23 = vpop.eup %4993 }
0x132c   :  { %3941 = vrot.lane.b32.xlu2 %v4994_v23, %s5176_s2  ;;  %v4996_v26 = vpop.eup %4995  ;;  %v4068_v23 = vld [vmem:[%s6649_s13 + $0x28] sm:$0xff] }
0x132d   :  { %v3783_v12 = vadd.f32 1.0, %v4996_v26  ;;  %4088 = vmatpush.msrb.mxu0 %v4068_v23  ;;  %v4066_v26 = vld [vmem:[%s6649_s13 + $0x18] sm:$0xff] }
0x132f   :  { %4997 = vrcp.f32 %v3783_v12  ;;  %v3810_v35 = vand.u32 2147483648, %v3783_v12  ;;  %vm3804_vm1 = vweird.f32 %v3783_v12  ;;  %v3808_v18 = vand.u32 2147483647, %v3783_v12  ;;  %4089 = vmatpush.msrb.mxu0 %v4067_v11 }
0x1330   :  { %4999 = vpow2.f32 %v4550_v56  ;;  %v4064_v56 = vld [vmem:[%s6649_s13 + $0x8] sm:$0xff] }
0x1331   :  { %v3811_v48 = vor.u32 1.1754944e-38, %v3810_v35  ;;  %vm3809_vm5 = vcmp.eq.f32.partialorder %v3808_v18, 8.507059e+37  ;;  %4090 = vmatpush.msrb.mxu0 %v4066_v26  ;;  %v4102_v35 = vld [vmem:[%s6651_s15 + $0x18] sm:$0xff]  ;;  %v4100_v18 = vld [vmem:[%s6651_s15 + $0x8] sm:$0xff] }
0x1332   :  { %4123 = vmatpush.msrb.mxu1 %v4102_v35 }
0x1335   :  { %v4998_v16 = vpop.eup %4997 }
0x1336   :  { %v5000_v14 = vpop.eup %4999  ;;  %v3800_v22 = vmul.f32 %v4998_v16, %v3783_v12  ;;  %vm3805_vm3 = vweird.f32 %v4998_v16  ;;  %v4065_v12 = vld [vmem:[%s6649_s13 + $0x10] sm:$0xff] }
0x1337   :  { %v3896_v43 = vadd.f32 1.0, %v5000_v14  ;;  %vm3806_vm4 = vmor %vm3804_vm1, %vm3805_vm3  ;;  %4091 = vmatpush.msrb.mxu0 %v4065_v12  ;;  %vm4107_vm1 = vcmask 261120  }
0x1338   :  { %v3801_v30 = vsub.f32 1.0, %v3800_v22 }
0x1339   :  { %5001 = vrcp.f32 %v3896_v43  ;;  %v3923_v4 = vand.u32 2147483648, %v3896_v43  ;;  %vm3917_vm7 = vweird.f32 %v3896_v43  ;;  %v3921_v28 = vand.u32 2147483647, %v3896_v43  ;;  %4092 = vmatpush.msrb.mxu0 %v4064_v56 }
0x133a   :  { %v3802_v37 = vmul.f32 %v4998_v16, %v3801_v30 }
0x133b   :  { %v3924_v32 = vor.u32 1.1754944e-38, %v3923_v4  ;;  %vm3922_vm9 = vcmp.eq.f32.partialorder %v3921_v28, 8.507059e+37 }
0x133c   :  { %v3803_v39 = vadd.f32 %v4998_v16, %v3802_v37 }
0x133e   :  { %v3807_v52 = vsel %vm3806_vm4, %v4998_v16, %v3803_v39  ;;  %vm4131_vm4 = vcmask 7168  }
0x133f   :  { %v5002_v13 = vpop.eup %5001  ;;  %v3812_v1 = vsel %vm3809_vm5, %v3811_v48, %v3807_v52 }
0x1340   :  { %v3913_v62 = vmul.f32 %v5002_v13, %v3896_v43  ;;  %vm3918_vm6 = vweird.f32 %v5002_v13 }
0x1341   :  { %vm3919_vm8 = vmor %vm3917_vm7, %vm3918_vm6 }
0x1342   :  { %v3914_v60 = vsub.f32 1.0, %v3913_v62 }
0x1344   :  { %v3915_v15 = vmul.f32 %v5002_v13, %v3914_v60 }
0x1346   :  { %v3916_v47 = vadd.f32 %v5002_v13, %v3915_v15 }
0x1348   :  { %v3920_v5 = vsel %vm3919_vm8, %v5002_v13, %v3916_v47  ;;  %v4063_v13 = vld [vmem:[%s6649_s13] sm:$0xff] }
0x1349   :  { %v3925_v17 = vsel %vm3922_vm9, %v3924_v32, %v3920_v5  ;;  %4093 = vmatpush.msrb.mxu0 %v4063_v13  ;;  %v4099_v5 = vld [vmem:[%s6651_s15] sm:$0xff] }
0x134a   :  { %v4629_v32 = vld [vmem:[%s6650_s14] ss:$0 sm:$0xff] }
0x1376   :  { %v3829_v3 = vpop.permute.xlu1 %3828 }
0x1377   :  { %v3831_v25 = vmul.f32 %v3829_v3, %v3812_v1 }
0x1379   :  { %v3975_v10 = vpack.c.bf16 %v3831_v25, %v3831_v25 }
0x137b   :  { %4553 = vmatmul.msk.bf16.vlgmr.msrb.gmra.mxu2 %vm383_vm10, %v3975_v10  ;;  %4554 = vmatmul.msk.bf16.vlgmr.msrb.gmra.mxu3 %vm383_vm10, %v3975_v10 }
0x1386   :  { %v3942_v29 = vpop.permute.xlu2 %3941 }
0x1387   :  { %v3944_v19 = vmul.f32 %v3942_v29, %v3925_v17 }
0x1389   :  { %v3945_v21 = vpack.c.bf16 %v3944_v19, %v3944_v19 }
0x138b   :  { %4551 = vmatmul.msk.bf16.vlgmr.msra.gmra.mxu0 %vm383_vm10, %v3945_v21  ;;  %4552 = vmatmul.msk.bf16.vlgmr.msra.gmra.mxu1 %vm383_vm10, %v3945_v21  ;;  %v4630_v21 = vld [vmem:[#allocation2] ss:$0 sm:$0xff] }
0x13fe   :  { %v3988_v46 = vpop.f32.mrf.mxu2  ;;  %v4001_v63 = vpop.f32.mrf.mxu3 }
0x1406   :  { %v3990_v51 = vpop.f32.mrf.mxu2  ;;  %v4003_v58 = vpop.f32.mrf.mxu3 }
0x1408   :  { %v3958_v6 = vpop.f32.mrf.mxu0  ;;  %v3971_v53 = vpop.f32.mrf.mxu1 }
0x1409   :  { %v3959_v34 = vadd.f32 %v3958_v6, %v6994_v33  ;;  %v3972_v42 = vadd.f32 %v3971_v53, %v6995_v59 }
0x140b   :  { %v4005_v31 = vadd.f32 %v3988_v46, %v3959_v34  ;;  %v4006_v45 = vadd.f32 %v4001_v63, %v3972_v42 }
0x140d   :  { %5003 = vtanh.f32 %v4006_v45  ;;  %v4555_v61 = vmul.f32 -1.442695, %v4005_v31  ;;  %v4556_v30 = vmul.f32 -1.442695, %v4006_v45 }
0x140f   :  { %5005 = vpow2.f32 %v4555_v61 }
0x1410   :  { %v3960_v40 = vpop.f32.mrf.mxu0  ;;  %v3973_v54 = vpop.f32.mrf.mxu1 }
0x1413   :  { %v5004_v41 = vpop.eup %5003 }
0x1414   :  { %4048 = vrot.lane.b32.xlu0 %v5004_v41, %s5176_s2 }
0x1415   :  { %v5006_v9 = vpop.eup %5005 }
0x1416   :  { %v4013_v50 = vadd.f32 1.0, %v5006_v9 }
0x1418   :  { %5007 = vrcp.f32 %v4013_v50  ;;  %v4026_v59 = vand.u32 2147483648, %v4013_v50  ;;  %vm4020_vm12 = vweird.f32 %v4013_v50  ;;  %v4024_v44 = vand.u32 2147483647, %v4013_v50 }
0x141a   :  { %v4027_v57 = vor.u32 1.1754944e-38, %v4026_v59  ;;  %vm4025_vm14 = vcmp.eq.f32.partialorder %v4024_v44, 8.507059e+37 }
0x141e   :  { %v5008_v55 = vpop.eup %5007 }
0x141f   :  { %v4016_v49 = vmul.f32 %v5008_v55, %v4013_v50  ;;  %vm4021_vm11 = vweird.f32 %v5008_v55 }
0x1420   :  { %vm4022_vm13 = vmor %vm4020_vm12, %vm4021_vm11 }
0x1421   :  { %v4017_v8 = vsub.f32 1.0, %v4016_v49 }
0x1423   :  { %v4018_v24 = vmul.f32 %v5008_v55, %v4017_v8 }
0x1425   :  { %v4019_v33 = vadd.f32 %v5008_v55, %v4018_v24 }
0x1427   :  { %v4023_v7 = vsel %vm4022_vm13, %v5008_v55, %v4019_v33 }
0x1428   :  { %v4028_v27 = vsel %vm4025_vm14, %v4027_v57, %v4023_v7 }
0x1429   :  { %v4046_v16 = vmul.f32 %v4028_v27, %v6575_v36  ;;  %v4101_v36 = vld [vmem:[%s6651_s15 + $0x10] sm:$0xff] }
0x142a   :  { %4124 = vmatpush.msrb.mxu1 %v4101_v36 }
0x142c   :  { %4125 = vmatpush.msrb.mxu1 %v4100_v18 }
0x142e   :  { %4126 = vmatpush.msrb.mxu1 %v4099_v5 }
0x1486   :  { %v4049_v2 = vpop.permute.xlu0 %4048 }
0x1487   :  { %v4051_v20 = vmul.f32 %v4049_v2, %v4028_v27 }
0x1489   :  { %4053 = vrot.lane.b32.xlu1 %v4051_v20, %s5176_s2 }
0x14fb   :  { %v4054_v14 = vpop.permute.xlu1 %4053 }
0x14fc   :  { %v4056_v22 = vadd.f32 %v4054_v14, %v4046_v16 }
0x14fe   :  { %5009 = vtanh.f32 %v4056_v22 }
0x14ff   :  { %5011 = vpow2.f32 %v4556_v30 }
0x1504   :  { %v5010_v43 = vpop.eup %5009 }
0x1505   :  { %4059 = vrot.lane.b32.xlu2 %v5010_v43, %s5176_s2  ;;  %v5012_v37 = vpop.eup %5011 }
0x1506   :  { %v4014_v39 = vadd.f32 1.0, %v5012_v37 }
0x1508   :  { %5013 = vrcp.f32 %v4014_v39  ;;  %v4041_v25 = vand.u32 2147483648, %v4014_v39  ;;  %vm4035_vm0 = vweird.f32 %v4014_v39  ;;  %v4039_v60 = vand.u32 2147483647, %v4014_v39 }
0x150a   :  { %v4042_v15 = vor.u32 1.1754944e-38, %v4041_v25  ;;  %vm4040_vm3 = vcmp.eq.f32.partialorder %v4039_v60, 8.507059e+37 }
0x150e   :  { %v5014_v52 = vpop.eup %5013 }
0x150f   :  { %v4031_v62 = vmul.f32 %v5014_v52, %v4014_v39  ;;  %vm4036_vm15 = vweird.f32 %v5014_v52 }
0x1510   :  { %vm4037_vm2 = vmor %vm4035_vm0, %vm4036_vm15 }
0x1511   :  { %v4032_v48 = vsub.f32 1.0, %v4031_v62 }
0x1513   :  { %v4033_v1 = vmul.f32 %v5014_v52, %v4032_v48 }
0x1515   :  { %v4034_v3 = vadd.f32 %v5014_v52, %v4033_v1 }
0x1517   :  { %v4038_v10 = vsel %vm4037_vm2, %v5014_v52, %v4034_v3 }
0x1518   :  { %v4043_v47 = vsel %vm4040_vm3, %v4042_v15, %v4038_v10 }
0x155f   :  { %v4060_v4 = vpop.permute.xlu2 %4059 }
0x1560   :  { %v4062_v28 = vmul.f32 %v4060_v4, %v4043_v47 }
0x1562   :  { %4557 = vmatmul.msk.f32.vlgmr.msrb.gmra.mxu0 %vm383_vm10, %v4062_v28 }
0x15df   :  { %v4095_v17 = vpop.f32.mrf.mxu0 }
0x15e0   :  { %v4096_v29 = vadd.f32 %v4629_v32, %v4095_v17 }
0x15e2   :  { %v4098_v19 = vmax.f32 %v4096_v29, 0.0 }
0x15e4   :  { %4558 = vmatmul.msk.f32.vlgmr.msrb.gmra.mxu1 %vm4107_vm1, %v4098_v19 }
0x1661   :  { %v4128_v46 = vpop.f32.mrf.mxu1 }
0x1662   :  { %v4129_v63 = vadd.f32 %v4630_v21, %v4128_v46 }
0x1664   :  { %4132 = vst.msk [vmem:[%s6653_s17] sm:$0xff] %vm4131_vm4, %v4129_v63 }
0x1665   :  { %4137 = vsyncpa [#allocation4], 1 }
0x1666   :  { %4138 = vsyncpa [#allocation6], 1 }
0x1667   :  { %4139 = vsyncpa [#allocation9], 1 }
0x1668   :  { %4140 = vsyncpa [#allocation12], 1 }

</bundles_post_ra>
